<compile_context>
chip_gen: v7x
topology: tpu7x:2x2x1
jax: 0.10.0
libtpu: 0.0.40
codegen_flags: <defaults>
</compile_context>

<pallas_src>
import functools

import jax
import jax.numpy as jnp
from jax.experimental import pallas as pl
from jax.experimental.pallas import tpu as pltpu


# -----------------------------------------------------------------------------
# Fused Pallas kernel: [pad -> Conv3d(3^3) -> bias -> ReLU -> GroupNorm] x 2
# -----------------------------------------------------------------------------
def _make_fused_double_conv_kernel(D, H, W, Cin, Cout, eps):
    DH = D * H
    WCo = W * Cout
    K1 = (W + 2) * Cin       # folded-kw contraction depth, conv1
    K2 = (W + 2) * Cout      # folded-kw contraction depth, conv2

    def conv_stage(src_ref, wb_ref, K, bias, gamma, beta, gproj):
        # src_ref : (D+2, H+2, (W+2)*C) zero-padded activation, W & C merged in lanes
        #           (interior W coords at lane blocks [0, W), pad slots at W, W+1)
        # wb_ref  : (9, (W+2)*C, W*Cout) banded conv weights (kw folded into K)
        acc = jnp.zeros((DH, WCo), jnp.float32)
        for kd in range(3):
            for kh in range(3):
                slab = src_ref[kd:kd + D, kh:kh + H, :]          # (D, H, (W+2)*C)
                acc = acc + jnp.dot(slab.reshape(DH, K),
                                    wb_ref[kd * 3 + kh],
                                    preferred_element_type=jnp.float32)
        acc = jnp.maximum(acc + bias, 0.0)                       # conv bias + ReLU

        # GroupNorm: per-column sums, then one tiny matmul against the group
        # projection matrix gives per-group mean / E[x^2] already broadcast
        # back to every column; apply as a single fused scale+shift.
        stats = jnp.concatenate(
            [jnp.sum(acc, axis=0, keepdims=True),
             jnp.sum(acc * acc, axis=0, keepdims=True)], axis=0)  # (2, W*Cout)
        pstats = jnp.dot(stats, gproj, preferred_element_type=jnp.float32)
        mean_c = pstats[0:1, :]
        var_c = pstats[1:2, :] - mean_c * mean_c
        scale = gamma * jax.lax.rsqrt(var_c + eps)
        shift = beta - mean_c * scale
        return acc * scale + shift                               # (DH, W*Cout)

    def kernel(x_ref, wb1_ref, wb2_ref, pv_ref, gproj_ref, o_ref, xp_ref, hp_ref):
        # In-kernel zero padding: zero the padded scratch volumes (cheap VMEM
        # stores; done every step so megacore sharding stays correct), then
        # write the interior.
        xp_ref[...] = jnp.zeros_like(xp_ref)
        hp_ref[...] = jnp.zeros_like(hp_ref)
        xp_ref[1:D + 1, 1:H + 1, 0:W * Cin] = x_ref[0]

        gproj = gproj_ref[...]
        y1 = conv_stage(xp_ref, wb1_ref, K1,
                        pv_ref[0:1, :], pv_ref[1:2, :], pv_ref[2:3, :], gproj)
        # padded intermediate stays in VMEM (no HBM round trip between convs)
        hp_ref[1:D + 1, 1:H + 1, 0:W * Cout] = y1.reshape(D, H, WCo)
        y2 = conv_stage(hp_ref, wb2_ref, K2,
                        pv_ref[3:4, :], pv_ref[4:5, :], pv_ref[5:6, :], gproj)
        o_ref[0] = y2.astype(o_ref.dtype)

    return kernel


# -----------------------------------------------------------------------------
# Host-side weight preparation (tiny, one-time)
# -----------------------------------------------------------------------------
def _fold_kw_weights(w, W):
    """(3,3,3,Cin,Cout) DHWIO -> (9, (W+2)*Cin, W*Cout) banded 'kw folded into K'.

    Padded-W coordinate `a`: real inputs at a in [0,W), zero slots at a=W, W+1.
    out[b] += w[kw] * in[b+kw-1]; a = (b+kw-1) mod (W+2) sends the out-of-range
    taps (-1, W) to the zero slots.
    """
    kD, kH, kW, Cin, Cout = w.shape
    a = jnp.arange(W + 2)
    b = jnp.arange(W)
    k = jnp.arange(kW)
    band = (a[:, None, None] ==
            jnp.mod(b[None, :, None] + k[None, None, :] - 1, W + 2)).astype(w.dtype)
    w9 = w.reshape(kD * kH, kW, Cin, Cout)
    wb = jnp.einsum('abk,pkio->paibo', band, w9)        # (9, W+2, Cin, W, Cout)
    return wb.reshape(kD * kH, (W + 2) * Cin, W * Cout)


def _group_projector(W, Cout, num_groups, count):
    """(W*Cout, W*Cout) matrix: colsum @ gproj == per-group mean broadcast to columns."""
    c = jnp.arange(W * Cout) % Cout
    g = c // (Cout // num_groups)
    same = (g[:, None] == g[None, :]).astype(jnp.float32)
    return same / float(count)


def fused_double_conv(x_ndhwc, w1, b1, g1, be1, w2, b2, g2, be2, *, num_groups, eps=1e-5):
    """x_ndhwc: (N, D, H, W, Cin) f32; weights DHWIO. Returns (N, D, H, W, Cout)."""
    N, D, H, W, Cin = x_ndhwc.shape
    Cout = w1.shape[-1]
    assert Cout % num_groups == 0, "GroupNorm requires Cout % num_groups == 0"
    DH, WCo = D * H, W * Cout
    K1, K2 = (W + 2) * Cin, (W + 2) * Cout

    wb1 = _fold_kw_weights(w1, W)
    wb2 = _fold_kw_weights(w2, W)
    # per-conv bias / gamma / beta, tiled to one value per (w, c) output column
    pv = jnp.stack([jnp.tile(b1, W), jnp.tile(g1, W), jnp.tile(be1, W),
                    jnp.tile(b2, W), jnp.tile(g2, W), jnp.tile(be2, W)],
                   axis=0).astype(jnp.float32)                       # (6, W*Cout)
    gproj = _group_projector(W, Cout, num_groups, D * H * W * (Cout // num_groups))

    x2d = x_ndhwc.reshape(N, D, H, W * Cin)       # merge W & C (free, contiguous)

    kernel = _make_fused_double_conv_kernel(D, H, W, Cin, Cout, eps)

    flops = 2 * N * 9 * DH * WCo * (K1 + K2)
    bytes_accessed = 4 * (x2d.size + wb1.size + wb2.size + pv.size + gproj.size
                          + N * DH * WCo)

    out = pl.pallas_call(
        kernel,
        out_shape=jax.ShapeDtypeStruct((N, DH, WCo), jnp.float32),
        grid=(N,),
        in_specs=[
            pl.BlockSpec((1, D, H, W * Cin), lambda n: (n, 0, 0, 0)),
            pl.BlockSpec((9, K1, WCo), lambda n: (0, 0, 0)),
            pl.BlockSpec((9, K2, WCo), lambda n: (0, 0, 0)),
            pl.BlockSpec((6, WCo), lambda n: (0, 0)),
            pl.BlockSpec((WCo, WCo), lambda n: (0, 0)),
        ],
        out_specs=pl.BlockSpec((1, DH, WCo), lambda n: (n, 0, 0)),
        scratch_shapes=[
            pltpu.VMEM((D + 2, H + 2, K1), jnp.float32),   # padded conv1 input
            pltpu.VMEM((D + 2, H + 2, K2), jnp.float32),   # padded conv2 input
        ],
        compiler_params=pltpu.CompilerParams(dimension_semantics=("parallel",)),
        cost_estimate=pl.CostEstimate(flops=flops, transcendentals=2 * N * WCo,
                                      bytes_accessed=bytes_accessed),
    )(x2d, wb1, wb2, pv, gproj)
    return out.reshape(N, D, H, W, Cout)
    # TODO(synk): for large decoder stages (D,H,W >= 32, Cin >= 128) add a
    # parallel spatial grid axis with a halo and re-derive VMEM limits (v7x).


# -----------------------------------------------------------------------------
# Decoder forward (interpolate=True): nearest upsample + concat + DoubleConv
# -----------------------------------------------------------------------------
@functools.partial(jax.jit, static_argnames=("num_groups",))
def decoder_forward(params, encoder_features, x, *, num_groups):
    # inputs in PyTorch NCDHW layout
    N, C_enc, D, H, W = encoder_features.shape
    _, C_x, d, h, w = x.shape
    # F.interpolate(..., mode='nearest', size=(D,H,W)): src = floor(dst * in/out)
    di = (jnp.arange(D) * d) // D
    hi = (jnp.arange(H) * h) // H
    wi = (jnp.arange(W) * w) // W
    enc = jnp.transpose(encoder_features, (0, 2, 3, 4, 1))     # NCDHW -> NDHWC
    xl = jnp.transpose(x, (0, 2, 3, 4, 1))
    xu = xl[:, di][:, :, hi][:, :, :, wi]                      # nearest upsample
    cat = jnp.concatenate([enc, xu], axis=-1)                  # channels-last concat
    # DoubleConv with in_channels >= out_channels: conv1 Cin->Cout, conv2 Cout->Cout
    y = fused_double_conv(cat,
                          params['w1'], params['b1'], params['g1'], params['be1'],
                          params['w2'], params['b2'], params['g2'], params['be2'],
                          num_groups=num_groups)
    return jnp.transpose(y, (0, 4, 1, 2, 3))                   # NDHWC -> NCDHW
# TODO(synk): ConvTranspose3d upsample (interpolate=False) and the ternary/binary
# ops (BinConv3d / TernaryTanh, only used when ternary_ops=True) are not exercised
# by the default Decoder configuration and are not implemented here.


# -----------------------------------------------------------------------------
# Deterministic parameter init (shapes implied by Decoder(in=24, out=8, groups=4))
# -----------------------------------------------------------------------------
def init_decoder_params(key, in_channels, out_channels):
    ks = jax.random.split(key, 8)

    def conv_init(kw, kb, cin, cout):
        fan = cin * 27
        w = jax.random.normal(kw, (3, 3, 3, cin, cout), jnp.float32) / jnp.sqrt(fan)
        b = 0.05 * jax.random.normal(kb, (cout,), jnp.float32)
        return w, b

    w1, b1 = conv_init(ks[0], ks[1], in_channels, out_channels)
    w2, b2 = conv_init(ks[2], ks[3], out_channels, out_channels)
    g1 = 1.0 + 0.1 * jax.random.normal(ks[4], (out_channels,), jnp.float32)
    be1 = 0.1 * jax.random.normal(ks[5], (out_channels,), jnp.float32)
    g2 = 1.0 + 0.1 * jax.random.normal(ks[6], (out_channels,), jnp.float32)
    be2 = 0.1 * jax.random.normal(ks[7], (out_channels,), jnp.float32)
    return dict(w1=w1, b1=b1, g1=g1, be1=be1, w2=w2, b2=b2, g2=g2, be2=be2)


# -----------------------------------------------------------------------------
# Pure-JAX reference (for a correctness cross-check)
# -----------------------------------------------------------------------------
def _ref_conv_relu_gn(x, w, b, gamma, beta, num_groups, eps=1e-5):
    y = jax.lax.conv_general_dilated(
        x, w, window_strides=(1, 1, 1), padding='SAME',
        dimension_numbers=('NDHWC', 'DHWIO', 'NDHWC'))
    y = y + b
    y = jnp.maximum(y, 0.0)
    N, D, H, W, C = y.shape
    yg = y.reshape(N, D, H, W, num_groups, C // num_groups)
    m = yg.mean(axis=(1, 2, 3, 5), keepdims=True)
    v = ((yg - m) ** 2).mean(axis=(1, 2, 3, 5), keepdims=True)
    yn = (yg - m) / jnp.sqrt(v + eps)
    return yn.reshape(N, D, H, W, C) * gamma + beta


def decoder_forward_ref(params, encoder_features, x, *, num_groups):
    D, H, W = encoder_features.shape[2:]
    d, h, w = x.shape[2:]
    di = (jnp.arange(D) * d) // D
    hi = (jnp.arange(H) * h) // H
    wi = (jnp.arange(W) * w) // W
    xu = x[:, :, di][:, :, :, hi][:, :, :, :, wi]
    cat = jnp.concatenate([encoder_features, xu], axis=1)
    y = jnp.transpose(cat, (0, 2, 3, 4, 1))
    y = _ref_conv_relu_gn(y, params['w1'], params['b1'], params['g1'], params['be1'], num_groups)
    y = _ref_conv_relu_gn(y, params['w2'], params['b2'], params['g2'], params['be2'], num_groups)
    return jnp.transpose(y, (0, 4, 1, 2, 3))


# -----------------------------------------------------------------------------
if __name__ == "__main__":
    key = jax.random.PRNGKey(0)
    N = 2
    C_enc = 8            # encoder skip-connection channels
    C_x = 16             # coarse-path channels (2 * out_channels, UNet convention)
    out_channels = 8
    in_channels = C_enc + C_x          # 24 >= out_channels -> conv1: 24->8, conv2: 8->8
    num_groups = 4
    D = H = W = 8                      # encoder spatial size; x comes at half resolution

    k_enc, k_x, k_p = jax.random.split(key, 3)
    encoder_features = jax.random.normal(k_enc, (N, C_enc, D, H, W), jnp.float32)
    x = jax.random.normal(k_x, (N, C_x, D // 2, H // 2, W // 2), jnp.float32)

    params = init_decoder_params(k_p, in_channels, out_channels)

    out = decoder_forward(params, encoder_features, x, num_groups=num_groups)
    out = jax.block_until_ready(out)

    ref = decoder_forward_ref(params, encoder_features, x, num_groups=num_groups)
    ref = jax.block_until_ready(ref)

    assert out.shape == (N, out_channels, D, H, W), out.shape
    max_err = float(jnp.max(jnp.abs(out - ref)))
    assert max_err < 3e-3, f"mismatch vs reference: {max_err}"

    print("KERNEL_OK")
</pallas_src>

<mosaic_0001>
module attributes {stable_mosaic.version = 11 : i64} {
  func.func @kernel(%arg0: i32, %arg1: memref<1x8x8x192xf32, #tpu.memory_space<vmem>>, %arg2: memref<9x240x64xf32, #tpu.memory_space<vmem>>, %arg3: memref<9x80x64xf32, #tpu.memory_space<vmem>>, %arg4: memref<6x64xf32, #tpu.memory_space<vmem>>, %arg5: memref<64x64xf32, #tpu.memory_space<vmem>>, %arg6: memref<1x64x64xf32, #tpu.memory_space<vmem>>, %arg7: memref<10x10x240xf32, #tpu.memory_space<vmem>>, %arg8: memref<10x10x80xf32, #tpu.memory_space<vmem>>) attributes {dimension_semantics = [#tpu.dimension_semantics<parallel>], iteration_bounds = array<i64: 2>, scalar_prefetch = 0 : i64, scratch_operands = 2 : i64, tpu.core_type = #tpu.core_type<tc>, window_params = [{transform_indices = @transform_0, window_bounds = array<i64: 1, 8, 8, 192>}, {pipeline_mode = #tpu.pipeline_mode<synchronous>, transform_indices = @transform_1, window_bounds = array<i64: 9, 240, 64>}, {pipeline_mode = #tpu.pipeline_mode<synchronous>, transform_indices = @transform_2, window_bounds = array<i64: 9, 80, 64>}, {pipeline_mode = #tpu.pipeline_mode<synchronous>, transform_indices = @transform_3, window_bounds = array<i64: 6, 64>}, {pipeline_mode = #tpu.pipeline_mode<synchronous>, transform_indices = @transform_4, window_bounds = array<i64: 64, 64>}, {transform_indices = @transform_5, window_bounds = array<i64: 1, 64, 64>}]} {
    %cst = arith.constant 0.000000e+00 : f32
    %0 = vector.broadcast %cst : f32 to vector<10x10x240xf32>
    %c0 = arith.constant 0 : index
    %c0_0 = arith.constant 0 : index
    %c0_1 = arith.constant 0 : index
    %1 = vector.load %arg7[%c0, %c0_0, %c0_1] : memref<10x10x240xf32, #tpu.memory_space<vmem>>, vector<10x10x240xf32>
    tpu.vector_store %arg7[%c0, %c0_0, %c0_1], %0 {strides = array<i32>} : memref<10x10x240xf32, #tpu.memory_space<vmem>>, vector<10x10x240xf32>,
    %cst_2 = arith.constant 0.000000e+00 : f32
    %2 = vector.broadcast %cst_2 : f32 to vector<10x10x80xf32>
    %c0_3 = arith.constant 0 : index
    %c0_4 = arith.constant 0 : index
    %c0_5 = arith.constant 0 : index
    %3 = vector.load %arg8[%c0_3, %c0_4, %c0_5] : memref<10x10x80xf32, #tpu.memory_space<vmem>>, vector<10x10x80xf32>
    tpu.vector_store %arg8[%c0_3, %c0_4, %c0_5], %2 {strides = array<i32>} : memref<10x10x80xf32, #tpu.memory_space<vmem>>, vector<10x10x80xf32>,
    %c0_6 = arith.constant 0 : index
    %c0_7 = arith.constant 0 : index
    %c0_8 = arith.constant 0 : index
    %c0_9 = arith.constant 0 : index
    %4 = vector.load %arg1[%c0_6, %c0_7, %c0_8, %c0_9] : memref<1x8x8x192xf32, #tpu.memory_space<vmem>>, vector<1x8x8x192xf32>
    %5 = vector.shape_cast %4 : vector<1x8x8x192xf32> to vector<8x8x192xf32>
    %c1 = arith.constant 1 : index
    %c1_10 = arith.constant 1 : index
    %c0_11 = arith.constant 0 : index
    %6 = vector.load %arg7[%c1, %c1_10, %c0_11] : memref<10x10x240xf32, #tpu.memory_space<vmem>>, vector<8x8x192xf32>
    tpu.vector_store %arg7[%c1, %c1_10, %c0_11], %5 {strides = array<i32>} : memref<10x10x240xf32, #tpu.memory_space<vmem>>, vector<8x8x192xf32>,
    %c0_12 = arith.constant 0 : index
    %c0_13 = arith.constant 0 : index
    %7 = vector.load %arg5[%c0_12, %c0_13] : memref<64x64xf32, #tpu.memory_space<vmem>>, vector<64x64xf32>
    %c0_14 = arith.constant 0 : index
    %c0_15 = arith.constant 0 : index
    %8 = vector.load %arg4[%c0_14, %c0_15] : memref<6x64xf32, #tpu.memory_space<vmem>>, vector<1x64xf32>
    %c1_16 = arith.constant 1 : index
    %c0_17 = arith.constant 0 : index
    %9 = vector.load %arg4[%c1_16, %c0_17] : memref<6x64xf32, #tpu.memory_space<vmem>>, vector<1x64xf32>
    %c2 = arith.constant 2 : index
    %c0_18 = arith.constant 0 : index
    %10 = vector.load %arg4[%c2, %c0_18] : memref<6x64xf32, #tpu.memory_space<vmem>>, vector<1x64xf32>
    %cst_19 = arith.constant 0.000000e+00 : f32
    %11 = vector.broadcast %cst_19 : f32 to vector<64x64xf32>
    %c0_20 = arith.constant 0 : index
    %c0_21 = arith.constant 0 : index
    %c0_22 = arith.constant 0 : index
    %12 = vector.load %arg7[%c0_20, %c0_21, %c0_22] : memref<10x10x240xf32, #tpu.memory_space<vmem>>, vector<8x8x240xf32>
    %13 = vector.shape_cast %12 : vector<8x8x240xf32> to vector<64x240xf32>
    %c0_23 = arith.constant 0 : index
    %c0_24 = arith.constant 0 : index
    %c0_25 = arith.constant 0 : index
    %14 = vector.load %arg2[%c0_23, %c0_24, %c0_25] : memref<9x240x64xf32, #tpu.memory_space<vmem>>, vector<1x240x64xf32>
    %15 = vector.shape_cast %14 : vector<1x240x64xf32> to vector<240x64xf32>
    %cst_26 = arith.constant dense<0.000000e+00> : vector<64x64xf32>
    %16 = tpu.matmul %13, %15, %cst_26 {dimension_numbers = #tpu.dot_dimension_numbers<[1], [0], [0], [1], [0, 0, 1, 1], [], []>} : vector<64x240xf32>, vector<240x64xf32>, vector<64x64xf32> -> vector<64x64xf32>
    %17 = arith.addf %11, %16 : vector<64x64xf32>
    %c0_27 = arith.constant 0 : index
    %c1_28 = arith.constant 1 : index
    %c0_29 = arith.constant 0 : index
    %18 = vector.load %arg7[%c0_27, %c1_28, %c0_29] : memref<10x10x240xf32, #tpu.memory_space<vmem>>, vector<8x8x240xf32>
    %19 = vector.shape_cast %18 : vector<8x8x240xf32> to vector<64x240xf32>
    %c1_30 = arith.constant 1 : index
    %c0_31 = arith.constant 0 : index
    %c0_32 = arith.constant 0 : index
    %20 = vector.load %arg2[%c1_30, %c0_31, %c0_32] : memref<9x240x64xf32, #tpu.memory_space<vmem>>, vector<1x240x64xf32>
    %21 = vector.shape_cast %20 : vector<1x240x64xf32> to vector<240x64xf32>
    %cst_33 = arith.constant dense<0.000000e+00> : vector<64x64xf32>
    %22 = tpu.matmul %19, %21, %cst_33 {dimension_numbers = #tpu.dot_dimension_numbers<[1], [0], [0], [1], [0, 0, 1, 1], [], []>} : vector<64x240xf32>, vector<240x64xf32>, vector<64x64xf32> -> vector<64x64xf32>
    %23 = arith.addf %17, %22 : vector<64x64xf32>
    %c0_34 = arith.constant 0 : index
    %c2_35 = arith.constant 2 : index
    %c0_36 = arith.constant 0 : index
    %24 = vector.load %arg7[%c0_34, %c2_35, %c0_36] : memref<10x10x240xf32, #tpu.memory_space<vmem>>, vector<8x8x240xf32>
    %25 = vector.shape_cast %24 : vector<8x8x240xf32> to vector<64x240xf32>
    %c2_37 = arith.constant 2 : index
    %c0_38 = arith.constant 0 : index
    %c0_39 = arith.constant 0 : index
    %26 = vector.load %arg2[%c2_37, %c0_38, %c0_39] : memref<9x240x64xf32, #tpu.memory_space<vmem>>, vector<1x240x64xf32>
    %27 = vector.shape_cast %26 : vector<1x240x64xf32> to vector<240x64xf32>
    %cst_40 = arith.constant dense<0.000000e+00> : vector<64x64xf32>
    %28 = tpu.matmul %25, %27, %cst_40 {dimension_numbers = #tpu.dot_dimension_numbers<[1], [0], [0], [1], [0, 0, 1, 1], [], []>} : vector<64x240xf32>, vector<240x64xf32>, vector<64x64xf32> -> vector<64x64xf32>
    %29 = arith.addf %23, %28 : vector<64x64xf32>
    %c1_41 = arith.constant 1 : index
    %c0_42 = arith.constant 0 : index
    %c0_43 = arith.constant 0 : index
    %30 = vector.load %arg7[%c1_41, %c0_42, %c0_43] : memref<10x10x240xf32, #tpu.memory_space<vmem>>, vector<8x8x240xf32>
    %31 = vector.shape_cast %30 : vector<8x8x240xf32> to vector<64x240xf32>
    %c3 = arith.constant 3 : index
    %c0_44 = arith.constant 0 : index
    %c0_45 = arith.constant 0 : index
    %32 = vector.load %arg2[%c3, %c0_44, %c0_45] : memref<9x240x64xf32, #tpu.memory_space<vmem>>, vector<1x240x64xf32>
    %33 = vector.shape_cast %32 : vector<1x240x64xf32> to vector<240x64xf32>
    %cst_46 = arith.constant dense<0.000000e+00> : vector<64x64xf32>
    %34 = tpu.matmul %31, %33, %cst_46 {dimension_numbers = #tpu.dot_dimension_numbers<[1], [0], [0], [1], [0, 0, 1, 1], [], []>} : vector<64x240xf32>, vector<240x64xf32>, vector<64x64xf32> -> vector<64x64xf32>
    %35 = arith.addf %29, %34 : vector<64x64xf32>
    %c1_47 = arith.constant 1 : index
    %c1_48 = arith.constant 1 : index
    %c0_49 = arith.constant 0 : index
    %36 = vector.load %arg7[%c1_47, %c1_48, %c0_49] : memref<10x10x240xf32, #tpu.memory_space<vmem>>, vector<8x8x240xf32>
    %37 = vector.shape_cast %36 : vector<8x8x240xf32> to vector<64x240xf32>
    %c4 = arith.constant 4 : index
    %c0_50 = arith.constant 0 : index
    %c0_51 = arith.constant 0 : index
    %38 = vector.load %arg2[%c4, %c0_50, %c0_51] : memref<9x240x64xf32, #tpu.memory_space<vmem>>, vector<1x240x64xf32>
    %39 = vector.shape_cast %38 : vector<1x240x64xf32> to vector<240x64xf32>
    %cst_52 = arith.constant dense<0.000000e+00> : vector<64x64xf32>
    %40 = tpu.matmul %37, %39, %cst_52 {dimension_numbers = #tpu.dot_dimension_numbers<[1], [0], [0], [1], [0, 0, 1, 1], [], []>} : vector<64x240xf32>, vector<240x64xf32>, vector<64x64xf32> -> vector<64x64xf32>
    %41 = arith.addf %35, %40 : vector<64x64xf32>
    %c1_53 = arith.constant 1 : index
    %c2_54 = arith.constant 2 : index
    %c0_55 = arith.constant 0 : index
    %42 = vector.load %arg7[%c1_53, %c2_54, %c0_55] : memref<10x10x240xf32, #tpu.memory_space<vmem>>, vector<8x8x240xf32>
    %43 = vector.shape_cast %42 : vector<8x8x240xf32> to vector<64x240xf32>
    %c5 = arith.constant 5 : index
    %c0_56 = arith.constant 0 : index
    %c0_57 = arith.constant 0 : index
    %44 = vector.load %arg2[%c5, %c0_56, %c0_57] : memref<9x240x64xf32, #tpu.memory_space<vmem>>, vector<1x240x64xf32>
    %45 = vector.shape_cast %44 : vector<1x240x64xf32> to vector<240x64xf32>
    %cst_58 = arith.constant dense<0.000000e+00> : vector<64x64xf32>
    %46 = tpu.matmul %43, %45, %cst_58 {dimension_numbers = #tpu.dot_dimension_numbers<[1], [0], [0], [1], [0, 0, 1, 1], [], []>} : vector<64x240xf32>, vector<240x64xf32>, vector<64x64xf32> -> vector<64x64xf32>
    %47 = arith.addf %41, %46 : vector<64x64xf32>
    %c2_59 = arith.constant 2 : index
    %c0_60 = arith.constant 0 : index
    %c0_61 = arith.constant 0 : index
    %48 = vector.load %arg7[%c2_59, %c0_60, %c0_61] : memref<10x10x240xf32, #tpu.memory_space<vmem>>, vector<8x8x240xf32>
    %49 = vector.shape_cast %48 : vector<8x8x240xf32> to vector<64x240xf32>
    %c6 = arith.constant 6 : index
    %c0_62 = arith.constant 0 : index
    %c0_63 = arith.constant 0 : index
    %50 = vector.load %arg2[%c6, %c0_62, %c0_63] : memref<9x240x64xf32, #tpu.memory_space<vmem>>, vector<1x240x64xf32>
    %51 = vector.shape_cast %50 : vector<1x240x64xf32> to vector<240x64xf32>
    %cst_64 = arith.constant dense<0.000000e+00> : vector<64x64xf32>
    %52 = tpu.matmul %49, %51, %cst_64 {dimension_numbers = #tpu.dot_dimension_numbers<[1], [0], [0], [1], [0, 0, 1, 1], [], []>} : vector<64x240xf32>, vector<240x64xf32>, vector<64x64xf32> -> vector<64x64xf32>
    %53 = arith.addf %47, %52 : vector<64x64xf32>
    %c2_65 = arith.constant 2 : index
    %c1_66 = arith.constant 1 : index
    %c0_67 = arith.constant 0 : index
    %54 = vector.load %arg7[%c2_65, %c1_66, %c0_67] : memref<10x10x240xf32, #tpu.memory_space<vmem>>, vector<8x8x240xf32>
    %55 = vector.shape_cast %54 : vector<8x8x240xf32> to vector<64x240xf32>
    %c7 = arith.constant 7 : index
    %c0_68 = arith.constant 0 : index
    %c0_69 = arith.constant 0 : index
    %56 = vector.load %arg2[%c7, %c0_68, %c0_69] : memref<9x240x64xf32, #tpu.memory_space<vmem>>, vector<1x240x64xf32>
    %57 = vector.shape_cast %56 : vector<1x240x64xf32> to vector<240x64xf32>
    %cst_70 = arith.constant dense<0.000000e+00> : vector<64x64xf32>
    %58 = tpu.matmul %55, %57, %cst_70 {dimension_numbers = #tpu.dot_dimension_numbers<[1], [0], [0], [1], [0, 0, 1, 1], [], []>} : vector<64x240xf32>, vector<240x64xf32>, vector<64x64xf32> -> vector<64x64xf32>
    %59 = arith.addf %53, %58 : vector<64x64xf32>
    %c2_71 = arith.constant 2 : index
    %c2_72 = arith.constant 2 : index
    %c0_73 = arith.constant 0 : index
    %60 = vector.load %arg7[%c2_71, %c2_72, %c0_73] : memref<10x10x240xf32, #tpu.memory_space<vmem>>, vector<8x8x240xf32>
    %61 = vector.shape_cast %60 : vector<8x8x240xf32> to vector<64x240xf32>
    %c8 = arith.constant 8 : index
    %c0_74 = arith.constant 0 : index
    %c0_75 = arith.constant 0 : index
    %62 = vector.load %arg2[%c8, %c0_74, %c0_75] : memref<9x240x64xf32, #tpu.memory_space<vmem>>, vector<1x240x64xf32>
    %63 = vector.shape_cast %62 : vector<1x240x64xf32> to vector<240x64xf32>
    %cst_76 = arith.constant dense<0.000000e+00> : vector<64x64xf32>
    %64 = tpu.matmul %61, %63, %cst_76 {dimension_numbers = #tpu.dot_dimension_numbers<[1], [0], [0], [1], [0, 0, 1, 1], [], []>} : vector<64x240xf32>, vector<240x64xf32>, vector<64x64xf32> -> vector<64x64xf32>
    %65 = arith.addf %59, %64 : vector<64x64xf32>
    %66 = vector.broadcast %8 : vector<1x64xf32> to vector<64x64xf32>
    %67 = arith.addf %65, %66 : vector<64x64xf32>
    %cst_77 = arith.constant 0.000000e+00 : f32
    %68 = vector.broadcast %cst_77 : f32 to vector<64x64xf32>
    %69 = arith.maximumf %67, %68 : vector<64x64xf32>
    %cst_78 = arith.constant dense<0.000000e+00> : vector<64xf32>
    %70 = vector.multi_reduction <add>, %69, %cst_78 [0] : vector<64x64xf32> to vector<64xf32>
    %71 = vector.shape_cast %70 : vector<64xf32> to vector<1x64xf32>
    %72 = arith.mulf %69, %69 : vector<64x64xf32>
    %cst_79 = arith.constant dense<0.000000e+00> : vector<64xf32>
    %73 = vector.multi_reduction <add>, %72, %cst_79 [0] : vector<64x64xf32> to vector<64xf32>
    %74 = vector.shape_cast %73 : vector<64xf32> to vector<1x64xf32>
    %75 = tpu.concatenate %71, %74 in 0 : vector<1x64xf32>, vector<1x64xf32> -> vector<2x64xf32>
    %cst_80 = arith.constant dense<0.000000e+00> : vector<2x64xf32>
    %76 = tpu.matmul %75, %7, %cst_80 {dimension_numbers = #tpu.dot_dimension_numbers<[1], [0], [0], [1], [0, 0, 1, 1], [], []>} : vector<2x64xf32>, vector<64x64xf32>, vector<2x64xf32> -> vector<2x64xf32>
    %77 = vector.extract_strided_slice %76 {offsets = [0, 0], sizes = [1, 64], strides = [1, 1]} : vector<2x64xf32> to vector<1x64xf32>
    %78 = vector.extract_strided_slice %76 {offsets = [1, 0], sizes = [1, 64], strides = [1, 1]} : vector<2x64xf32> to vector<1x64xf32>
    %79 = arith.mulf %77, %77 : vector<1x64xf32>
    %80 = arith.subf %78, %79 : vector<1x64xf32>
    %cst_81 = arith.constant 9.99999974E-6 : f32
    %81 = vector.broadcast %cst_81 : f32 to vector<1x64xf32>
    %82 = arith.addf %80, %81 : vector<1x64xf32>
    %83 = math.rsqrt %82 : vector<1x64xf32>
    %84 = arith.mulf %9, %83 : vector<1x64xf32>
    %85 = arith.mulf %77, %84 : vector<1x64xf32>
    %86 = arith.subf %10, %85 : vector<1x64xf32>
    %87 = vector.broadcast %84 : vector<1x64xf32> to vector<64x64xf32>
    %88 = arith.mulf %69, %87 : vector<64x64xf32>
    %89 = vector.broadcast %86 : vector<1x64xf32> to vector<64x64xf32>
    %90 = arith.addf %88, %89 : vector<64x64xf32>
    %91 = vector.shape_cast %90 : vector<64x64xf32> to vector<8x8x64xf32>
    %c1_82 = arith.constant 1 : index
    %c1_83 = arith.constant 1 : index
    %c0_84 = arith.constant 0 : index
    %92 = vector.load %arg8[%c1_82, %c1_83, %c0_84] : memref<10x10x80xf32, #tpu.memory_space<vmem>>, vector<8x8x64xf32>
    tpu.vector_store %arg8[%c1_82, %c1_83, %c0_84], %91 {strides = array<i32>} : memref<10x10x80xf32, #tpu.memory_space<vmem>>, vector<8x8x64xf32>,
    %c3_85 = arith.constant 3 : index
    %c0_86 = arith.constant 0 : index
    %93 = vector.load %arg4[%c3_85, %c0_86] : memref<6x64xf32, #tpu.memory_space<vmem>>, vector<1x64xf32>
    %c4_87 = arith.constant 4 : index
    %c0_88 = arith.constant 0 : index
    %94 = vector.load %arg4[%c4_87, %c0_88] : memref<6x64xf32, #tpu.memory_space<vmem>>, vector<1x64xf32>
    %c5_89 = arith.constant 5 : index
    %c0_90 = arith.constant 0 : index
    %95 = vector.load %arg4[%c5_89, %c0_90] : memref<6x64xf32, #tpu.memory_space<vmem>>, vector<1x64xf32>
    %cst_91 = arith.constant 0.000000e+00 : f32
    %96 = vector.broadcast %cst_91 : f32 to vector<64x64xf32>
    %c0_92 = arith.constant 0 : index
    %c0_93 = arith.constant 0 : index
    %c0_94 = arith.constant 0 : index
    %97 = vector.load %arg8[%c0_92, %c0_93, %c0_94] : memref<10x10x80xf32, #tpu.memory_space<vmem>>, vector<8x8x80xf32>
    %98 = vector.shape_cast %97 : vector<8x8x80xf32> to vector<64x80xf32>
    %c0_95 = arith.constant 0 : index
    %c0_96 = arith.constant 0 : index
    %c0_97 = arith.constant 0 : index
    %99 = vector.load %arg3[%c0_95, %c0_96, %c0_97] : memref<9x80x64xf32, #tpu.memory_space<vmem>>, vector<1x80x64xf32>
    %100 = vector.shape_cast %99 : vector<1x80x64xf32> to vector<80x64xf32>
    %cst_98 = arith.constant dense<0.000000e+00> : vector<64x64xf32>
    %101 = tpu.matmul %98, %100, %cst_98 {dimension_numbers = #tpu.dot_dimension_numbers<[1], [0], [0], [1], [0, 0, 1, 1], [], []>} : vector<64x80xf32>, vector<80x64xf32>, vector<64x64xf32> -> vector<64x64xf32>
    %102 = arith.addf %96, %101 : vector<64x64xf32>
    %c0_99 = arith.constant 0 : index
    %c1_100 = arith.constant 1 : index
    %c0_101 = arith.constant 0 : index
    %103 = vector.load %arg8[%c0_99, %c1_100, %c0_101] : memref<10x10x80xf32, #tpu.memory_space<vmem>>, vector<8x8x80xf32>
    %104 = vector.shape_cast %103 : vector<8x8x80xf32> to vector<64x80xf32>
    %c1_102 = arith.constant 1 : index
    %c0_103 = arith.constant 0 : index
    %c0_104 = arith.constant 0 : index
    %105 = vector.load %arg3[%c1_102, %c0_103, %c0_104] : memref<9x80x64xf32, #tpu.memory_space<vmem>>, vector<1x80x64xf32>
    %106 = vector.shape_cast %105 : vector<1x80x64xf32> to vector<80x64xf32>
    %cst_105 = arith.constant dense<0.000000e+00> : vector<64x64xf32>
    %107 = tpu.matmul %104, %106, %cst_105 {dimension_numbers = #tpu.dot_dimension_numbers<[1], [0], [0], [1], [0, 0, 1, 1], [], []>} : vector<64x80xf32>, vector<80x64xf32>, vector<64x64xf32> -> vector<64x64xf32>
    %108 = arith.addf %102, %107 : vector<64x64xf32>
    %c0_106 = arith.constant 0 : index
    %c2_107 = arith.constant 2 : index
    %c0_108 = arith.constant 0 : index
    %109 = vector.load %arg8[%c0_106, %c2_107, %c0_108] : memref<10x10x80xf32, #tpu.memory_space<vmem>>, vector<8x8x80xf32>
    %110 = vector.shape_cast %109 : vector<8x8x80xf32> to vector<64x80xf32>
    %c2_109 = arith.constant 2 : index
    %c0_110 = arith.constant 0 : index
    %c0_111 = arith.constant 0 : index
    %111 = vector.load %arg3[%c2_109, %c0_110, %c0_111] : memref<9x80x64xf32, #tpu.memory_space<vmem>>, vector<1x80x64xf32>
    %112 = vector.shape_cast %111 : vector<1x80x64xf32> to vector<80x64xf32>
    %cst_112 = arith.constant dense<0.000000e+00> : vector<64x64xf32>
    %113 = tpu.matmul %110, %112, %cst_112 {dimension_numbers = #tpu.dot_dimension_numbers<[1], [0], [0], [1], [0, 0, 1, 1], [], []>} : vector<64x80xf32>, vector<80x64xf32>, vector<64x64xf32> -> vector<64x64xf32>
    %114 = arith.addf %108, %113 : vector<64x64xf32>
    %c1_113 = arith.constant 1 : index
    %c0_114 = arith.constant 0 : index
    %c0_115 = arith.constant 0 : index
    %115 = vector.load %arg8[%c1_113, %c0_114, %c0_115] : memref<10x10x80xf32, #tpu.memory_space<vmem>>, vector<8x8x80xf32>
    %116 = vector.shape_cast %115 : vector<8x8x80xf32> to vector<64x80xf32>
    %c3_116 = arith.constant 3 : index
    %c0_117 = arith.constant 0 : index
    %c0_118 = arith.constant 0 : index
    %117 = vector.load %arg3[%c3_116, %c0_117, %c0_118] : memref<9x80x64xf32, #tpu.memory_space<vmem>>, vector<1x80x64xf32>
    %118 = vector.shape_cast %117 : vector<1x80x64xf32> to vector<80x64xf32>
    %cst_119 = arith.constant dense<0.000000e+00> : vector<64x64xf32>
    %119 = tpu.matmul %116, %118, %cst_119 {dimension_numbers = #tpu.dot_dimension_numbers<[1], [0], [0], [1], [0, 0, 1, 1], [], []>} : vector<64x80xf32>, vector<80x64xf32>, vector<64x64xf32> -> vector<64x64xf32>
    %120 = arith.addf %114, %119 : vector<64x64xf32>
    %c1_120 = arith.constant 1 : index
    %c1_121 = arith.constant 1 : index
    %c0_122 = arith.constant 0 : index
    %121 = vector.load %arg8[%c1_120, %c1_121, %c0_122] : memref<10x10x80xf32, #tpu.memory_space<vmem>>, vector<8x8x80xf32>
    %122 = vector.shape_cast %121 : vector<8x8x80xf32> to vector<64x80xf32>
    %c4_123 = arith.constant 4 : index
    %c0_124 = arith.constant 0 : index
    %c0_125 = arith.constant 0 : index
    %123 = vector.load %arg3[%c4_123, %c0_124, %c0_125] : memref<9x80x64xf32, #tpu.memory_space<vmem>>, vector<1x80x64xf32>
    %124 = vector.shape_cast %123 : vector<1x80x64xf32> to vector<80x64xf32>
    %cst_126 = arith.constant dense<0.000000e+00> : vector<64x64xf32>
    %125 = tpu.matmul %122, %124, %cst_126 {dimension_numbers = #tpu.dot_dimension_numbers<[1], [0], [0], [1], [0, 0, 1, 1], [], []>} : vector<64x80xf32>, vector<80x64xf32>, vector<64x64xf32> -> vector<64x64xf32>
    %126 = arith.addf %120, %125 : vector<64x64xf32>
    %c1_127 = arith.constant 1 : index
    %c2_128 = arith.constant 2 : index
    %c0_129 = arith.constant 0 : index
    %127 = vector.load %arg8[%c1_127, %c2_128, %c0_129] : memref<10x10x80xf32, #tpu.memory_space<vmem>>, vector<8x8x80xf32>
    %128 = vector.shape_cast %127 : vector<8x8x80xf32> to vector<64x80xf32>
    %c5_130 = arith.constant 5 : index
    %c0_131 = arith.constant 0 : index
    %c0_132 = arith.constant 0 : index
    %129 = vector.load %arg3[%c5_130, %c0_131, %c0_132] : memref<9x80x64xf32, #tpu.memory_space<vmem>>, vector<1x80x64xf32>
    %130 = vector.shape_cast %129 : vector<1x80x64xf32> to vector<80x64xf32>
    %cst_133 = arith.constant dense<0.000000e+00> : vector<64x64xf32>
    %131 = tpu.matmul %128, %130, %cst_133 {dimension_numbers = #tpu.dot_dimension_numbers<[1], [0], [0], [1], [0, 0, 1, 1], [], []>} : vector<64x80xf32>, vector<80x64xf32>, vector<64x64xf32> -> vector<64x64xf32>
    %132 = arith.addf %126, %131 : vector<64x64xf32>
    %c2_134 = arith.constant 2 : index
    %c0_135 = arith.constant 0 : index
    %c0_136 = arith.constant 0 : index
    %133 = vector.load %arg8[%c2_134, %c0_135, %c0_136] : memref<10x10x80xf32, #tpu.memory_space<vmem>>, vector<8x8x80xf32>
    %134 = vector.shape_cast %133 : vector<8x8x80xf32> to vector<64x80xf32>
    %c6_137 = arith.constant 6 : index
    %c0_138 = arith.constant 0 : index
    %c0_139 = arith.constant 0 : index
    %135 = vector.load %arg3[%c6_137, %c0_138, %c0_139] : memref<9x80x64xf32, #tpu.memory_space<vmem>>, vector<1x80x64xf32>
    %136 = vector.shape_cast %135 : vector<1x80x64xf32> to vector<80x64xf32>
    %cst_140 = arith.constant dense<0.000000e+00> : vector<64x64xf32>
    %137 = tpu.matmul %134, %136, %cst_140 {dimension_numbers = #tpu.dot_dimension_numbers<[1], [0], [0], [1], [0, 0, 1, 1], [], []>} : vector<64x80xf32>, vector<80x64xf32>, vector<64x64xf32> -> vector<64x64xf32>
    %138 = arith.addf %132, %137 : vector<64x64xf32>
    %c2_141 = arith.constant 2 : index
    %c1_142 = arith.constant 1 : index
    %c0_143 = arith.constant 0 : index
    %139 = vector.load %arg8[%c2_141, %c1_142, %c0_143] : memref<10x10x80xf32, #tpu.memory_space<vmem>>, vector<8x8x80xf32>
    %140 = vector.shape_cast %139 : vector<8x8x80xf32> to vector<64x80xf32>
    %c7_144 = arith.constant 7 : index
    %c0_145 = arith.constant 0 : index
    %c0_146 = arith.constant 0 : index
    %141 = vector.load %arg3[%c7_144, %c0_145, %c0_146] : memref<9x80x64xf32, #tpu.memory_space<vmem>>, vector<1x80x64xf32>
    %142 = vector.shape_cast %141 : vector<1x80x64xf32> to vector<80x64xf32>
    %cst_147 = arith.constant dense<0.000000e+00> : vector<64x64xf32>
    %143 = tpu.matmul %140, %142, %cst_147 {dimension_numbers = #tpu.dot_dimension_numbers<[1], [0], [0], [1], [0, 0, 1, 1], [], []>} : vector<64x80xf32>, vector<80x64xf32>, vector<64x64xf32> -> vector<64x64xf32>
    %144 = arith.addf %138, %143 : vector<64x64xf32>
    %c2_148 = arith.constant 2 : index
    %c2_149 = arith.constant 2 : index
    %c0_150 = arith.constant 0 : index
    %145 = vector.load %arg8[%c2_148, %c2_149, %c0_150] : memref<10x10x80xf32, #tpu.memory_space<vmem>>, vector<8x8x80xf32>
    %146 = vector.shape_cast %145 : vector<8x8x80xf32> to vector<64x80xf32>
    %c8_151 = arith.constant 8 : index
    %c0_152 = arith.constant 0 : index
    %c0_153 = arith.constant 0 : index
    %147 = vector.load %arg3[%c8_151, %c0_152, %c0_153] : memref<9x80x64xf32, #tpu.memory_space<vmem>>, vector<1x80x64xf32>
    %148 = vector.shape_cast %147 : vector<1x80x64xf32> to vector<80x64xf32>
    %cst_154 = arith.constant dense<0.000000e+00> : vector<64x64xf32>
    %149 = tpu.matmul %146, %148, %cst_154 {dimension_numbers = #tpu.dot_dimension_numbers<[1], [0], [0], [1], [0, 0, 1, 1], [], []>} : vector<64x80xf32>, vector<80x64xf32>, vector<64x64xf32> -> vector<64x64xf32>
    %150 = arith.addf %144, %149 : vector<64x64xf32>
    %151 = vector.broadcast %93 : vector<1x64xf32> to vector<64x64xf32>
    %152 = arith.addf %150, %151 : vector<64x64xf32>
    %cst_155 = arith.constant 0.000000e+00 : f32
    %153 = vector.broadcast %cst_155 : f32 to vector<64x64xf32>
    %154 = arith.maximumf %152, %153 : vector<64x64xf32>
    %cst_156 = arith.constant dense<0.000000e+00> : vector<64xf32>
    %155 = vector.multi_reduction <add>, %154, %cst_156 [0] : vector<64x64xf32> to vector<64xf32>
    %156 = vector.shape_cast %155 : vector<64xf32> to vector<1x64xf32>
    %157 = arith.mulf %154, %154 : vector<64x64xf32>
    %cst_157 = arith.constant dense<0.000000e+00> : vector<64xf32>
    %158 = vector.multi_reduction <add>, %157, %cst_157 [0] : vector<64x64xf32> to vector<64xf32>
    %159 = vector.shape_cast %158 : vector<64xf32> to vector<1x64xf32>
    %160 = tpu.concatenate %156, %159 in 0 : vector<1x64xf32>, vector<1x64xf32> -> vector<2x64xf32>
    %cst_158 = arith.constant dense<0.000000e+00> : vector<2x64xf32>
    %161 = tpu.matmul %160, %7, %cst_158 {dimension_numbers = #tpu.dot_dimension_numbers<[1], [0], [0], [1], [0, 0, 1, 1], [], []>} : vector<2x64xf32>, vector<64x64xf32>, vector<2x64xf32> -> vector<2x64xf32>
    %162 = vector.extract_strided_slice %161 {offsets = [0, 0], sizes = [1, 64], strides = [1, 1]} : vector<2x64xf32> to vector<1x64xf32>
    %163 = vector.extract_strided_slice %161 {offsets = [1, 0], sizes = [1, 64], strides = [1, 1]} : vector<2x64xf32> to vector<1x64xf32>
    %164 = arith.mulf %162, %162 : vector<1x64xf32>
    %165 = arith.subf %163, %164 : vector<1x64xf32>
    %cst_159 = arith.constant 9.99999974E-6 : f32
    %166 = vector.broadcast %cst_159 : f32 to vector<1x64xf32>
    %167 = arith.addf %165, %166 : vector<1x64xf32>
    %168 = math.rsqrt %167 : vector<1x64xf32>
    %169 = arith.mulf %94, %168 : vector<1x64xf32>
    %170 = arith.mulf %162, %169 : vector<1x64xf32>
    %171 = arith.subf %95, %170 : vector<1x64xf32>
    %172 = vector.broadcast %169 : vector<1x64xf32> to vector<64x64xf32>
    %173 = arith.mulf %154, %172 : vector<64x64xf32>
    %174 = vector.broadcast %171 : vector<1x64xf32> to vector<64x64xf32>
    %175 = arith.addf %173, %174 : vector<64x64xf32>
    %c0_160 = arith.constant 0 : index
    %c0_161 = arith.constant 0 : index
    %c0_162 = arith.constant 0 : index
    %176 = vector.load %arg6[%c0_160, %c0_161, %c0_162] : memref<1x64x64xf32, #tpu.memory_space<vmem>>, vector<1x64x64xf32>
    %177 = vector.shape_cast %176 : vector<1x64x64xf32> to vector<64x64xf32>
    %178 = vector.shape_cast %175 : vector<64x64xf32> to vector<1x64x64xf32>
    tpu.vector_store %arg6[%c0_160, %c0_161, %c0_162], %178 {strides = array<i32>} : memref<1x64x64xf32, #tpu.memory_space<vmem>>, vector<1x64x64xf32>,
    return
  }
  func.func @transform_0(%arg0: i32) -> (i32, i32, i32, i32) {
    %c0_i32 = arith.constant 0 : i32
    %c0_i32_0 = arith.constant 0 : i32
    %c0_i32_1 = arith.constant 0 : i32
    %c0_i32_2 = arith.constant 0 : i32
    return %arg0, %c0_i32, %c0_i32_0, %c0_i32_1 : i32, i32, i32, i32
  }
  func.func @transform_1(%arg0: i32) -> (i32, i32, i32) {
    %c0_i32 = arith.constant 0 : i32
    %c0_i32_0 = arith.constant 0 : i32
    %c0_i32_1 = arith.constant 0 : i32
    %c0_i32_2 = arith.constant 0 : i32
    return %c0_i32, %c0_i32_0, %c0_i32_1 : i32, i32, i32
  }
  func.func @transform_2(%arg0: i32) -> (i32, i32, i32) {
    %c0_i32 = arith.constant 0 : i32
    %c0_i32_0 = arith.constant 0 : i32
    %c0_i32_1 = arith.constant 0 : i32
    %c0_i32_2 = arith.constant 0 : i32
    return %c0_i32, %c0_i32_0, %c0_i32_1 : i32, i32, i32
  }
  func.func @transform_3(%arg0: i32) -> (i32, i32) {
    %c0_i32 = arith.constant 0 : i32
    %c0_i32_0 = arith.constant 0 : i32
    %c0_i32_1 = arith.constant 0 : i32
    return %c0_i32, %c0_i32_0 : i32, i32
  }
  func.func @transform_4(%arg0: i32) -> (i32, i32) {
    %c0_i32 = arith.constant 0 : i32
    %c0_i32_0 = arith.constant 0 : i32
    %c0_i32_1 = arith.constant 0 : i32
    return %c0_i32, %c0_i32_0 : i32, i32
  }
  func.func @transform_5(%arg0: i32) -> (i32, i32, i32) {
    %c0_i32 = arith.constant 0 : i32
    %c0_i32_0 = arith.constant 0 : i32
    %c0_i32_1 = arith.constant 0 : i32
    return %arg0, %c0_i32, %c0_i32_0 : i32, i32, i32
  }
}

</mosaic_0001>

<bundles_post_ra>
// kernel: tile.33
= control target key start
LH: loop header
LB: loop body
LE: loop exit
PB: predicated region body
PF: predicated region fallthrough
CT: control target
= control target key end

     0   :  { %s22_s0 = inlined_call_operand.vmem [shape: f32[8], index: 0, kind: input, shape index: {}]   ;;  %s23_s1 = inlined_call_operand.vmem [shape: f32[8,8], index: 1, kind: output, shape index: {}]  }
   0x1   :  { %v4_v0 = vld [vmem:[%s22_s0] ss:$0 sm:$0xff] }
   0x2   :  { %5 = vst [vmem:[%s23_s1] sm:$0xff] %v4_v0 }

// kernel: tile.54
= control target key start
LH: loop header
LB: loop body
LE: loop exit
PB: predicated region body
PF: predicated region fallthrough
CT: control target
= control target key end

     0   :  { %s67_s10 = smov 56   ;;  %s68_s11 = smov 40   ;;  %vm3_vm0 = vcmask 64512   ;;  %vm9_vm1 = vcmask 523712   ;;  %vm15_vm2 = vcmask 458112   ;;  %vm21_vm3 = vcmask 392512   ;;  %s111_s0 = inlined_call_operand.vmem [shape: f32[8,8], index: 0, kind: input, shape index: {}]   ;;  %s112_s1 = inlined_call_operand.vmem [shape: f32[1,64], index: 1, kind: output, shape index: {}]  }
   0x1   :  { %v53_v0 = vld [vmem:[%s111_s0 + $0x7] sm:$0x1]   ;;  %v55_v1 = vld [vmem:[%s111_s0 + $0x5] sm:$0x1]   ;;  %v54_v2 = vld [vmem:[%s111_s0 + $0x6] sm:$0x1]  }
   0x2   :  { %7 = vrot.lane.b32.xlu0 %v53_v0, %s67_s10  ;;  %19 = vrot.lane.b32.xlu1 %v55_v1, %s68_s11  ;;  %v56_v3 = vld [vmem:[%s111_s0 + $0x4] sm:$0x1]   ;;  %v2_v4 = vld [vmem:[%s111_s0] sm:$0x1]   ;;  %s69_s18 = smov 48   ;;  %s70_s19 = smov 32  }
   0x3   :  { %4 = vst.msk [vmem:[#allocation0] sm:$0x1] %vm3_vm0, %v2_v4   ;;  %v57_v5 = vld [vmem:[%s111_s0 + $0x3] sm:$0x1]   ;;  %v58_v6 = vld [vmem:[%s111_s0 + $0x2] sm:$0x1]  }
   0x4   :  { %s71_s24 = smov 24   ;;  %s72_s25 = smov 16   ;;  %v59_v7 = vld [vmem:[%s111_s0 + $0x1] sm:$0x1]   ;;  %vm27_vm4 = vcmask 326912   ;;  %vm33_vm5 = vcmask 261312  }
   0x5   :  { %s73_s0 = smov 8   ;;  %vm39_vm6 = vcmask 195712   ;;  %vm45_vm7 = vcmask 130112  }
   0x6   :  { %13 = vrot.lane.b32.xlu0 %v54_v2, %s69_s18  ;;  %25 = vrot.lane.b32.xlu1 %v56_v3, %s70_s19 }
   0xa   :  { %31 = vrot.lane.b32.xlu0 %v57_v5, %s71_s24  ;;  %37 = vrot.lane.b32.xlu1 %v58_v6, %s72_s25 }
   0xe   :  { %43 = vrot.lane.b32.xlu0 %v59_v7, %s73_s0 }
  0x74   :  { %v8_v8 = vpop.permute.xlu0 %7   ;;  %v20_v9 = vpop.permute.xlu1 %19  }
  0x75   :  { %10 = vst.msk [vmem:[#allocation0] sm:$0x1] %vm9_vm1, %v8_v8  }
  0x78   :  { %v14_v10 = vpop.permute.xlu0 %13   ;;  %v26_v11 = vpop.permute.xlu1 %25  }
  0x79   :  { %16 = vst.msk [vmem:[#allocation0] sm:$0x1] %vm15_vm2, %v14_v10  }
  0x7a   :  { %22 = vst.msk [vmem:[#allocation0] sm:$0x1] %vm21_vm3, %v20_v9  }
  0x7b   :  { %28 = vst.msk [vmem:[#allocation0] sm:$0x1] %vm27_vm4, %v26_v11  }
  0x7c   :  { %v32_v12 = vpop.permute.xlu0 %31   ;;  %v38_v13 = vpop.permute.xlu1 %37  }
  0x7d   :  { %34 = vst.msk [vmem:[#allocation0] sm:$0x1] %vm33_vm5, %v32_v12  }
  0x7e   :  { %40 = vst.msk [vmem:[#allocation0] sm:$0x1] %vm39_vm6, %v38_v13  }
  0x80   :  { %v44_v14 = vpop.permute.xlu0 %43  }
  0x81   :  { %46 = vst.msk [vmem:[#allocation0] sm:$0x1] %vm45_vm7, %v44_v14  }
  0x88   :  { %v50_v15 = vld [vmem:[#allocation0] sm:$0x1] }
  0x89   :  { %52 = vst [vmem:[%s112_s1] sm:$0x1] %v50_v15 }

// kernel: decoder_forward.1
= control target key start
LH: loop header
LB: loop body
LE: loop exit
PB: predicated region body
PF: predicated region fallthrough
CT: control target
= control target key end

     0   :  { %s6161_s18 = smov 0   ;;  %s8305_s0 = inlined_call_operand.vmem [shape: f32[2,8,8,192], index: 0, kind: input, shape index: {}]   ;;  %s8306_s1 = inlined_call_operand.vmem [shape: f32[9,240,64], index: 1, kind: input, shape index: {}]   ;;  %s8307_s2 = inlined_call_operand.vmem [shape: f32[9,80,64], index: 2, kind: input, shape index: {}]   ;;  %s8308_s3 = inlined_call_operand.vmem [shape: f32[6,64], index: 3, kind: input, shape index: {}]   ;;  %s8309_s4 = inlined_call_operand.vmem [shape: f32[64,64], index: 4, kind: input, shape index: {}]   ;;  %s8310_s5 = inlined_call_operand.vmem [shape: f32[2,64,64], index: 5, kind: output, shape index: {}]  }
   0x1 LB: > { %s4444_s19 = sadd.s32 4294967295, %s6126_s18   ;;  %p4448_p0 = scmp.ge.s32.totalorder %s6126_s18, 1  ;;  %s6126_s18 = sphi %s6161_s18, %s15_s18  }
   0x2   : > { %p187_p1 = scmp.lt.s32.totalorder %s6126_s18, 3 }
   0x4   : > { %p188_p2 = pnand %p4448_p0, %p187_p1 }
   0x5   : > { %v4453_v0 = vld [vmem:[%s8306_s1 + $0xf0] sm:$0xff] (!%p188_p2)  ;;  %v4454_v1 = vld [vmem:[%s8306_s1 + $0xf8] sm:$0xff] (!%p188_p2)  ;;  %v4455_v2 = vld [vmem:[%s8306_s1 + $0x100] sm:$0xff] (!%p188_p2)  ;;  %vm226_vm0 = vcmask (!%p188_p2), 916480   ;;  %v6128_v3 = vmov (!%p188_p2), 0.0|0.0   ;;  %v6129_v6 = vmov (!%p188_p2), 0.0  }
   0x6   : > { %191 = sbr.rel (%p188_p2) target bundleno = 1538 (0x602), region = 40  ;;  %5431 = vmatprep.subr.bf16.mxu0 (!%p188_p2), %v6128_v3  ;;  %v5432_v4 = vpack.c.bf16 (!%p188_p2), %v4454_v1, %v4453_v0  ;;  %v4456_v5 = vld [vmem:[%s8306_s1 + $0x108] sm:$0xff] (!%p188_p2)  ;;  %227 = vst.msk [vmem:[#allocation2 + $0x8] sm:$0xff] (!%p188_p2), %vm226_vm0, %v6129_v6  ;;  %vm229_vm1 = vcmask (!%p188_p2), 910336   ;;  %225 = vst [vmem:[#allocation2] sm:$0xff] (!%p188_p2), %v6129_v6  ;;  %5566 = vmatprep.subr.bf16.mxu1 (!%p188_p2), %v6128_v3  ;;  %p215_p3 = scmp.lt.s32.totalorder (!%p188_p2), %s4444_s19, 1 }
   0x7   : > { %228 = vst [vmem:[#allocation2 + $0x10] sm:$0x3] (!%p188_p2), %v6129_v6  ;;  %231 = vst [vmem:[#allocation2 + $0x20] sm:$0xff] (!%p188_p2), %v6129_v6  ;;  %v5435_v7 = vpack.c.bf16 (!%p188_p2), %v4456_v5, %v4455_v2  ;;  %v4457_v8 = vld [vmem:[%s8306_s1 + $0x110] sm:$0xff] (!%p188_p2)  ;;  %v4458_v9 = vld [vmem:[%s8306_s1 + $0x118] sm:$0xff] (!%p188_p2)  ;;  %vm509_vm2 = vcmask (!%p188_p2), 1046528  }
   0x8   : > { %232 = vst.msk [vmem:[#allocation2 + $0x28] sm:$0xff] (!%p188_p2), %vm226_vm0, %v6129_v6  ;;  %233 = vst [vmem:[#allocation2 + $0x30] sm:$0x3] (!%p188_p2), %v6129_v6  ;;  %5433 = vmatpush1.bf16.msra.mxu0 (!%p188_p2), %v5432_v4  ;;  %v5438_v10 = vpack.c.bf16 (!%p188_p2), %v4458_v9, %v4457_v8  ;;  %v4459_v11 = vld [vmem:[%s8306_s1 + $0x120] sm:$0xff] (!%p188_p2)  ;;  %v4460_v12 = vld [vmem:[%s8306_s1 + $0x128] sm:$0xff] (!%p188_p2)  ;;  %vm355_vm3 = vcmask (!%p188_p2), 523265  }
   0x9   : > { %235 = vst [vmem:[#allocation2 + $0x40] sm:$0xff] (!%p188_p2), %v6129_v6  ;;  %236 = vst.msk [vmem:[#allocation2 + $0x48] sm:$0xff] (!%p188_p2), %vm226_vm0, %v6129_v6  ;;  %5434 = vmatprep.subr.bf16.mxu0 (!%p188_p2), %v6128_v3  ;;  %v5441_v15 = vpack.c.bf16 (!%p188_p2), %v4460_v12, %v4459_v11  ;;  %v4461_v18 = vld [vmem:[%s8306_s1 + $0x130] sm:$0xff] (!%p188_p2)  ;;  %v4462_v19 = vld [vmem:[%s8306_s1 + $0x138] sm:$0xff] (!%p188_p2)  ;;  %vm358_vm4 = vcmask (!%p188_p2), 516096   ;;  %vm911_vm5 = vcmask (!%p188_p2), 1045504  }
   0xa   : > { %237 = vst [vmem:[#allocation2 + $0x50] sm:$0x3] (!%p188_p2), %v6129_v6  ;;  %239 = vst [vmem:[#allocation2 + $0x60] sm:$0xff] (!%p188_p2), %v6129_v6  ;;  %v5444_v21 = vpack.c.bf16 (!%p188_p2), %v4462_v19, %v4461_v18  ;;  %v4463_v22 = vld [vmem:[%s8306_s1 + $0x140] sm:$0xff] (!%p188_p2)  ;;  %v4464_v23 = vld [vmem:[%s8306_s1 + $0x148] sm:$0xff] (!%p188_p2)  ;;  %vm6130_vm6 = vmmov (!%p188_p2), 0  }
   0xb   : > { %240 = vst.msk [vmem:[#allocation2 + $0x68] sm:$0xff] (!%p188_p2), %vm226_vm0, %v6129_v6  ;;  %241 = vst [vmem:[#allocation2 + $0x70] sm:$0x3] (!%p188_p2), %v6129_v6  ;;  %v5447_v30 = vpack.c.bf16 (!%p188_p2), %v4464_v23, %v4463_v22  ;;  %v4465_v34 = vld [vmem:[%s8306_s1 + $0x150] sm:$0xff] (!%p188_p2)  ;;  %v4466_v35 = vld [vmem:[%s8306_s1 + $0x158] sm:$0xff] (!%p188_p2)  ;;  %vm2637_vm7 = vcmask (!%p188_p2), 523264  }
   0xc   : > { %243 = vst [vmem:[#allocation2 + $0x80] sm:$0xff] (!%p188_p2), %v6129_v6  ;;  %244 = vst.msk [vmem:[#allocation2 + $0x88] sm:$0xff] (!%p188_p2), %vm226_vm0, %v6129_v6  ;;  %5436 = vmatpush1.bf16.msra.mxu0 (!%p188_p2), %v5435_v7  ;;  %v5450_v45 = vpack.c.bf16 (!%p188_p2), %v4466_v35, %v4465_v34  ;;  %v4467_v49 = vld [vmem:[%s8306_s1 + $0x160] sm:$0xff] (!%p188_p2)  ;;  %v4468_v50 = vld [vmem:[%s8306_s1 + $0x168] sm:$0xff] (!%p188_p2)  ;;  %vm2688_vm8 = vcmask (!%p188_p2), 1040384   ;;  %vm267_vm9 = vcmask (!%p188_p2), 654336  }
   0xd   : > { %245 = vst [vmem:[#allocation2 + $0x90] sm:$0x3] %v6129_v6  ;;  %247 = vst [vmem:[#allocation2 + $0xa0] sm:$0xff] %v6129_v6  ;;  %s8312_s19 = smov (!%p215_p3, %s4444_s19), 1  ;;  %5437 = vmatprep.subr.bf16.mxu0 %v6128_v3  ;;  %v446_v13 = vld [vmem:[#allocation2 + $0x8] sm:$0xfe]  ;;  %v5453_v58 = vpack.c.bf16 %v4468_v50, %v4467_v49 }
   0xe   : > { %248 = vst.msk [vmem:[#allocation2 + $0xa8] sm:$0xff] %vm226_vm0, %v6129_v6  ;;  %249 = vst [vmem:[#allocation2 + $0xb0] sm:$0x3] %v6129_v6  ;;  %v513_v16 = vrot.slane %v446_v13, 1  ;;  %s4923_s11 = sshll.u32 %s8312_s19, 7  ;;  %v4469_v59 = vld [vmem:[%s8306_s1 + $0x170] sm:$0xff] }
   0xf   : > { %251 = vst [vmem:[#allocation2 + $0xc0] sm:$0xff] %v6129_v6  ;;  %252 = vst.msk [vmem:[#allocation2 + $0xc8] sm:$0xff] %vm226_vm0, %v6129_v6  ;;  %s6276_s20 = scalar_lea.vmem %s8305_s0, %s4923_s11  ;;  %v4470_v60 = vld [vmem:[%s8306_s1 + $0x178] sm:$0xff]  ;;  %v4471_v63 = vld [vmem:[%s8306_s1 + $0x180] sm:$0xff]  ;;  %vm269_vm10 = vcmask 648192   ;;  %s4924_s15 = sshll.u32 %s8312_s19, 6 }
  0x10   : > { %253 = vst [vmem:[#allocation2 + $0xd0] sm:$0x3] %v6129_v6  ;;  %255 = vst [vmem:[#allocation2 + $0xe0] sm:$0xff] %v6129_v6  ;;  %5439 = vmatpush1.bf16.msra.mxu0 %v5438_v10  ;;  %v290_v24 = vld [vmem:[%s6276_s20 + $0x8] sm:$0xff]  ;;  %v289_v25 = vld [vmem:[%s6276_s20] sm:$0xff]  ;;  %v5456_v62 = vpack.c.bf16 %v4470_v60, %v4469_v59  ;;  %s224_s21 = scalar_lea.vmem %s8310_s5, %s4924_s15 }
  0x11   : > { %256 = vst.msk [vmem:[#allocation2 + $0xe8] sm:$0xff] %vm226_vm0, %v6129_v6  ;;  %257 = vst [vmem:[#allocation2 + $0xf0] sm:$0x3] %v6129_v6  ;;  %5440 = vmatprep.subr.bf16.mxu0 %v6128_v3  ;;  %v322_v26 = vrot.slane %v290_v24, 7  ;;  %v321_v27 = vrot.slane %v289_v25, 7  ;;  %v292_v28 = vld [vmem:[%s6276_s20 + $0x18] sm:$0xff] }
  0x12   : > { %259 = vst [vmem:[#allocation2 + $0x100] sm:$0xff] %v6129_v6  ;;  %260 = vst.msk [vmem:[#allocation2 + $0x108] sm:$0xff] %vm226_vm0, %v6129_v6  ;;  %v291_v29 = vld [vmem:[%s6276_s20 + $0x10] sm:$0xff]  ;;  %v324_v31 = vrot.slane %v292_v28, 7  ;;  %v294_v33 = vld [vmem:[%s6276_s20 + $0x28] sm:$0xff] }
  0x13   : > { %261 = vst [vmem:[#allocation2 + $0x110] sm:$0x3] %v6129_v6  ;;  %263 = vst [vmem:[#allocation2 + $0x120] sm:$0xff] %v6129_v6  ;;  %v323_v32 = vrot.slane %v291_v29, 7  ;;  %v326_v36 = vrot.slane %v294_v33, 7  ;;  %v293_v37 = vld [vmem:[%s6276_s20 + $0x20] sm:$0xff] }
  0x14   : > { %264 = vst.msk [vmem:[#allocation2 + $0x128] sm:$0xff] %vm226_vm0, %v6129_v6  ;;  %265 = vst [vmem:[#allocation2 + $0x130] sm:$0x3] %v6129_v6  ;;  %5442 = vmatpush1.bf16.msra.mxu0 %v5441_v15  ;;  %v325_v38 = vrot.slane %v293_v37, 7  ;;  %v296_v39 = vld [vmem:[%s6276_s20 + $0x38] sm:$0xff]  ;;  %v295_v40 = vld [vmem:[%s6276_s20 + $0x30] sm:$0xff] }
  0x15   : > { %230 = vst.msk [vmem:[#allocation2 + $0x18] sm:$0x3] %vm229_vm1, %v6129_v6  ;;  %234 = vst.msk [vmem:[#allocation2 + $0x38] sm:$0x3] %vm229_vm1, %v6129_v6  ;;  %5443 = vmatprep.subr.bf16.mxu0 %v6128_v3  ;;  %v328_v41 = vrot.slane %v296_v39, 7  ;;  %v327_v42 = vrot.slane %v295_v40, 7 }
  0x16   : > { %238 = vst.msk [vmem:[#allocation2 + $0x58] sm:$0x3] %vm229_vm1, %v6129_v6  ;;  %242 = vst.msk [vmem:[#allocation2 + $0x78] sm:$0x3] %vm229_vm1, %v6129_v6  ;;  %v298_v43 = vld [vmem:[%s6276_s20 + $0x48] sm:$0xff]  ;;  %v297_v44 = vld [vmem:[%s6276_s20 + $0x40] sm:$0xff] }
  0x17   : > { %246 = vst.msk [vmem:[#allocation2 + $0x98] sm:$0x3] %vm229_vm1, %v6129_v6  ;;  %250 = vst.msk [vmem:[#allocation2 + $0xb8] sm:$0x3] %vm229_vm1, %v6129_v6  ;;  %v330_v46 = vrot.slane %v298_v43, 7  ;;  %v329_v47 = vrot.slane %v297_v44, 7 }
  0x18   : > { %254 = vst.msk [vmem:[#allocation2 + $0xd8] sm:$0x3] %vm229_vm1, %v6129_v6  ;;  %258 = vst.msk [vmem:[#allocation2 + $0xf8] sm:$0x3] %vm229_vm1, %v6129_v6  ;;  %5445 = vmatpush1.bf16.msra.mxu0 %v5444_v21  ;;  %v300_v48 = vld [vmem:[%s6276_s20 + $0x58] sm:$0xff]  ;;  %v299_v52 = vld [vmem:[%s6276_s20 + $0x50] sm:$0xff] }
  0x19   : > { %262 = vst.msk [vmem:[#allocation2 + $0x118] sm:$0x3] %vm229_vm1, %v6129_v6  ;;  %266 = vst.msk [vmem:[#allocation2 + $0x138] sm:$0x3] %vm229_vm1, %v6129_v6  ;;  %5446 = vmatprep.subr.bf16.mxu0 %v6128_v3  ;;  %v332_v51 = vrot.slane %v300_v48, 7  ;;  %v331_v53 = vrot.slane %v299_v52, 7 }
  0x1a   : > { %356 = vst.msk [vmem:[#allocation2 + $0x28] sm:$0xfe] %vm355_vm3, %v322_v26  ;;  %354 = vst [vmem:[#allocation2 + $0x20] sm:$0xfe] %v321_v27  ;;  %v302_v54 = vld [vmem:[%s6276_s20 + $0x68] sm:$0xff]  ;;  %v301_v55 = vld [vmem:[%s6276_s20 + $0x60] sm:$0xff] }
  0x1b   : > { %359 = vst.msk [vmem:[#allocation2 + $0x38] sm:$0x1] %vm358_vm4, %v322_v26  ;;  %357 = vst [vmem:[#allocation2 + $0x30] sm:$0x1] %v321_v27  ;;  %v334_v56 = vrot.slane %v302_v54, 7  ;;  %v333_v57 = vrot.slane %v301_v55, 7 }
  0x1c   : > { %v448_v14 = vld [vmem:[#allocation2 + $0x18] sm:$0x1]  ;;  %361 = vst.msk [vmem:[#allocation2 + $0x48] sm:$0xfe] %vm355_vm3, %v324_v31  ;;  %360 = vst [vmem:[#allocation2 + $0x40] sm:$0xfe] %v323_v32  ;;  %5448 = vmatpush1.bf16.msra.mxu0 %v5447_v30 }
  0x1d   : > { %v514_v17 = vrot.slane %v448_v14, 1  ;;  %363 = vst.msk [vmem:[#allocation2 + $0x58] sm:$0x1] %vm358_vm4, %v324_v31  ;;  %362 = vst [vmem:[#allocation2 + $0x50] sm:$0x1] %v323_v32  ;;  %5449 = vmatprep.subr.bf16.mxu0 %v6128_v3  ;;  %v4472_v0 = vld [vmem:[%s8306_s1 + $0x188] sm:$0xff] }
  0x1e   : > { %365 = vst.msk [vmem:[#allocation2 + $0x68] sm:$0xfe] %vm355_vm3, %v326_v36  ;;  %364 = vst [vmem:[#allocation2 + $0x60] sm:$0xfe] %v325_v38  ;;  %v5459_v1 = vpack.c.bf16 %v4472_v0, %v4471_v63  ;;  %v4473_v2 = vld [vmem:[%s8306_s1 + $0x190] sm:$0xff]  ;;  %v4474_v4 = vld [vmem:[%s8306_s1 + $0x198] sm:$0xff] }
  0x1f   : > { %v515_v20 = vsel %vm509_vm2, %v513_v16, %v514_v17  ;;  %367 = vst.msk [vmem:[#allocation2 + $0x78] sm:$0x1] %vm358_vm4, %v326_v36  ;;  %366 = vst [vmem:[#allocation2 + $0x70] sm:$0x1] %v325_v38  ;;  %v5462_v5 = vpack.c.bf16 %v4474_v4, %v4473_v2  ;;  %v4475_v7 = vld [vmem:[%s8306_s1 + $0x1a0] sm:$0xff]  ;;  %v4476_v8 = vld [vmem:[%s8306_s1 + $0x1a8] sm:$0xff] }
  0x20   : > { %4483 = vmatprep.mubr.msk.f32.mxu0 %vm226_vm0, %v515_v20  ;;  %369 = vst.msk [vmem:[#allocation2 + $0x88] sm:$0xfe] %vm355_vm3, %v328_v41  ;;  %368 = vst [vmem:[#allocation2 + $0x80] sm:$0xfe] %v327_v42  ;;  %5451 = vmatpush1.bf16.msra.mxu0 %v5450_v45  ;;  %v4537_v9 = vld [vmem:[%s8306_s1 + $0x2d0] sm:$0xff]  ;;  %v4538_v10 = vld [vmem:[%s8306_s1 + $0x2d8] sm:$0xff]  ;;  %v5465_v12 = vpack.c.bf16 %v4476_v8, %v4475_v7 }
  0x21   : > { %371 = vst.msk [vmem:[#allocation2 + $0x98] sm:$0x1] %vm358_vm4, %v328_v41  ;;  %370 = vst [vmem:[#allocation2 + $0x90] sm:$0x1] %v327_v42  ;;  %5452 = vmatprep.subr.bf16.mxu0 %v6128_v3  ;;  %v6334_v61 = vld [vmem:[#allocation2 + $0x28] sm:$0xff]  ;;  %v5567_v11 = vpack.c.bf16 %v4538_v10, %v4537_v9  ;;  %v4539_v13 = vld [vmem:[%s8306_s1 + $0x2e0] sm:$0xff] }
  0x22   : > { %373 = vst.msk [vmem:[#allocation2 + $0xa8] sm:$0xfe] %vm355_vm3, %v330_v46  ;;  %372 = vst [vmem:[#allocation2 + $0xa0] sm:$0xfe] %v329_v47  ;;  %4567 = vmatprep.mubr.msk.f32.mxu1 %vm226_vm0, %v6334_v61  ;;  %v4540_v14 = vld [vmem:[%s8306_s1 + $0x2e8] sm:$0xff]  ;;  %v4477_v15 = vld [vmem:[%s8306_s1 + $0x1b0] sm:$0xff] }
  0x23   : > { %375 = vst.msk [vmem:[#allocation2 + $0xb8] sm:$0x1] %vm358_vm4, %v330_v46  ;;  %374 = vst [vmem:[#allocation2 + $0xb0] sm:$0x1] %v329_v47  ;;  %v4478_v16 = vld [vmem:[%s8306_s1 + $0x1b8] sm:$0xff]  ;;  %5568 = vmatpush1.bf16.msra.mxu1 %v5567_v11  ;;  %v5570_v17 = vpack.c.bf16 %v4540_v14, %v4539_v13  ;;  %v4541_v18 = vld [vmem:[%s8306_s1 + $0x2f0] sm:$0xff] }
  0x24   : > { %377 = vst.msk [vmem:[#allocation2 + $0xc8] sm:$0xfe] %vm355_vm3, %v332_v51  ;;  %376 = vst [vmem:[#allocation2 + $0xc0] sm:$0xfe] %v331_v53  ;;  %5454 = vmatpush1.bf16.msra.mxu0 %v5453_v58  ;;  %5569 = vmatprep.subr.bf16.mxu1 %v6128_v3  ;;  %v4542_v19 = vld [vmem:[%s8306_s1 + $0x2f8] sm:$0xff]  ;;  %v5468_v20 = vpack.c.bf16 %v4478_v16, %v4477_v15  ;;  %v4479_v21 = vld [vmem:[%s8306_s1 + $0x1c0] sm:$0xff] }
  0x25   : > { %379 = vst.msk [vmem:[#allocation2 + $0xd8] sm:$0x1] %vm358_vm4, %v332_v51  ;;  %378 = vst [vmem:[#allocation2 + $0xd0] sm:$0x1] %v331_v53  ;;  %5455 = vmatprep.subr.bf16.mxu0 %v6128_v3  ;;  %v4480_v22 = vld [vmem:[%s8306_s1 + $0x1c8] sm:$0xff]  ;;  %v5573_v23 = vpack.c.bf16 %v4542_v19, %v4541_v18  ;;  %v4543_v24 = vld [vmem:[%s8306_s1 + $0x300] sm:$0xff] }
  0x26   : > { %381 = vst.msk [vmem:[#allocation2 + $0xe8] sm:$0xfe] %vm355_vm3, %v334_v56  ;;  %380 = vst [vmem:[#allocation2 + $0xe0] sm:$0xfe] %v333_v57  ;;  %v4544_v25 = vld [vmem:[%s8306_s1 + $0x308] sm:$0xff]  ;;  %v5471_v26 = vpack.c.bf16 %v4480_v22, %v4479_v21  ;;  %v4481_v27 = vld [vmem:[%s8306_s1 + $0x1d0] sm:$0xff] }
  0x27   : > { %383 = vst.msk [vmem:[#allocation2 + $0xf8] sm:$0x1] %vm358_vm4, %v334_v56  ;;  %382 = vst [vmem:[#allocation2 + $0xf0] sm:$0x1] %v333_v57  ;;  %5571 = vmatpush1.bf16.msra.mxu1 %v5570_v17  ;;  %v445_v28 = vld [vmem:[#allocation2] sm:$0xfe]  ;;  %v5576_v32 = vpack.c.bf16 %v4544_v25, %v4543_v24 }
  0x28   : > { %5457 = vmatpush1.bf16.msra.mxu0 %v5456_v62  ;;  %5572 = vmatprep.subr.bf16.mxu1 %v6128_v3  ;;  %v4482_v29 = vld [vmem:[%s8306_s1 + $0x1d8] sm:$0xff]  ;;  %v447_v30 = vld [vmem:[#allocation2 + $0x10] sm:$0x1]  ;;  %v450_v31 = vld [vmem:[#allocation2 + $0x28] sm:$0xfe]  ;;  %v510_v36 = vrot.slane %v445_v28, 1 }
  0x29   : > { %5458 = vmatprep.subr.bf16.mxu0 %v6128_v3  ;;  %v452_v33 = vld [vmem:[#allocation2 + $0x38] sm:$0x1]  ;;  %v4545_v34 = vld [vmem:[%s8306_s1 + $0x310] sm:$0xff]  ;;  %v415_v37 = vld [vmem:[%s8306_s1] sm:$0xff]  ;;  %v5474_v38 = vpack.c.bf16 %v4482_v29, %v4481_v27  ;;  %v511_v39 = vrot.slane %v447_v30, 1  ;;  %v519_v43 = vrot.slane %v450_v31, 1 }
  0x2a   : > { %v4546_v35 = vld [vmem:[%s8306_s1 + $0x318] sm:$0xff]  ;;  %v416_v40 = vld [vmem:[%s8306_s1 + $0x8] sm:$0xff]  ;;  %v449_v41 = vld [vmem:[#allocation2 + $0x20] sm:$0xfe]  ;;  %v520_v44 = vrot.slane %v452_v33, 1 }
  0x2b   : > { %5574 = vmatpush1.bf16.msra.mxu1 %v5573_v23  ;;  %v451_v42 = vld [vmem:[#allocation2 + $0x30] sm:$0x1]  ;;  %v454_v45 = vld [vmem:[#allocation2 + $0x48] sm:$0xfe]  ;;  %v456_v46 = vld [vmem:[#allocation2 + $0x58] sm:$0x1]  ;;  %v5579_v47 = vpack.c.bf16 %v4546_v35, %v4545_v34  ;;  %v512_v52 = vsel %vm509_vm2, %v510_v36, %v511_v39  ;;  %v5477_v53 = vpack.c.bf16 %v416_v40, %v415_v37 }
  0x2c   : > { %5460 = vmatpush1.bf16.msra.mxu0 %v5459_v1  ;;  %5575 = vmatprep.subr.bf16.mxu1 %v6128_v3  ;;  %v4547_v48 = vld [vmem:[%s8306_s1 + $0x320] sm:$0xff]  ;;  %v4548_v49 = vld [vmem:[%s8306_s1 + $0x328] sm:$0xff]  ;;  %v516_v50 = vrot.slane %v449_v41, 1  ;;  %v517_v51 = vrot.slane %v451_v42, 1  ;;  %v417_v54 = vld [vmem:[%s8306_s1 + $0x10] sm:$0xff]  ;;  %v525_v56 = vrot.slane %v454_v45, 1  ;;  %v521_v59 = vsel %vm509_vm2, %v519_v43, %v520_v44 }
  0x2d   : > { %5461 = vmatprep.subr.bf16.mxu0 %v6128_v3  ;;  %v418_v55 = vld [vmem:[%s8306_s1 + $0x18] sm:$0xff]  ;;  %v526_v57 = vrot.slane %v456_v46, 1  ;;  %v453_v58 = vld [vmem:[#allocation2 + $0x40] sm:$0xfe]  ;;  %v455_v60 = vld [vmem:[#allocation2 + $0x50] sm:$0x1]  ;;  %v5582_v0 = vpack.c.bf16 %v4548_v49, %v4547_v48 }
  0x2e   : > { %v458_v62 = vld [vmem:[#allocation2 + $0x68] sm:$0xfe]  ;;  %v460_v63 = vld [vmem:[#allocation2 + $0x78] sm:$0x1]  ;;  %v4549_v1 = vld [vmem:[%s8306_s1 + $0x330] sm:$0xff]  ;;  %v5480_v4 = vpack.c.bf16 %v418_v55, %v417_v54  ;;  %v522_v9 = vrot.slane %v453_v58, 1 }
  0x2f   : > { %5577 = vmatpush1.bf16.msra.mxu1 %v5576_v32  ;;  %v4550_v2 = vld [vmem:[%s8306_s1 + $0x338] sm:$0xff]  ;;  %v419_v7 = vld [vmem:[%s8306_s1 + $0x20] sm:$0xff]  ;;  %v420_v8 = vld [vmem:[%s8306_s1 + $0x28] sm:$0xff]  ;;  %v523_v10 = vrot.slane %v455_v60, 1  ;;  %v531_v11 = vrot.slane %v458_v62, 1  ;;  %v527_v13 = vsel %vm509_vm2, %v525_v56, %v526_v57 }
  0x30   : > { %5463 = vmatpush1.bf16.msra.mxu0 %v5462_v5  ;;  %5578 = vmatprep.subr.bf16.mxu1 %v6128_v3  ;;  %v518_v5 = vsel %vm509_vm2, %v516_v50, %v517_v51  ;;  %v457_v14 = vld [vmem:[#allocation2 + $0x60] sm:$0xfe]  ;;  %v459_v15 = vld [vmem:[#allocation2 + $0x70] sm:$0x1]  ;;  %v462_v16 = vld [vmem:[#allocation2 + $0x88] sm:$0xfe]  ;;  %v5585_v17 = vpack.c.bf16 %v4550_v2, %v4549_v1  ;;  %v5483_v23 = vpack.c.bf16 %v420_v8, %v419_v7 }
  0x31   : > { %5464 = vmatprep.subr.bf16.mxu0 %v6128_v3  ;;  %v464_v18 = vld [vmem:[#allocation2 + $0x98] sm:$0x1]  ;;  %v4551_v19 = vld [vmem:[%s8306_s1 + $0x340] sm:$0xff]  ;;  %v421_v21 = vld [vmem:[%s8306_s1 + $0x30] sm:$0xff]  ;;  %v524_v24 = vsel %vm509_vm2, %v522_v9, %v523_v10  ;;  %v528_v25 = vrot.slane %v457_v14, 1  ;;  %v537_v30 = vrot.slane %v462_v16, 1 }
  0x32   : > { %v422_v22 = vld [vmem:[%s8306_s1 + $0x38] sm:$0xff]  ;;  %v461_v27 = vld [vmem:[#allocation2 + $0x80] sm:$0xfe]  ;;  %v463_v28 = vld [vmem:[#allocation2 + $0x90] sm:$0x1]  ;;  %v538_v31 = vrot.slane %v464_v18, 1 }
  0x33   : > { %5580 = vmatpush1.bf16.msra.mxu1 %v5579_v47  ;;  %v466_v32 = vld [vmem:[#allocation2 + $0xa8] sm:$0xfe]  ;;  %v468_v33 = vld [vmem:[#allocation2 + $0xb8] sm:$0x1]  ;;  %v4553_v35 = vld [vmem:[%s8306_s1 + $0x350] sm:$0xff]  ;;  %v534_v37 = vrot.slane %v461_v27, 1  ;;  %v5486_v39 = vpack.c.bf16 %v422_v22, %v421_v21 }
  0x34   : > { %5466 = vmatpush1.bf16.msra.mxu0 %v5465_v12  ;;  %5581 = vmatprep.subr.bf16.mxu1 %v6128_v3  ;;  %v532_v12 = vrot.slane %v460_v63, 1  ;;  %v4554_v36 = vld [vmem:[%s8306_s1 + $0x358] sm:$0xff]  ;;  %v423_v40 = vld [vmem:[%s8306_s1 + $0x40] sm:$0xff]  ;;  %v424_v41 = vld [vmem:[%s8306_s1 + $0x48] sm:$0xff]  ;;  %v543_v43 = vrot.slane %v466_v32, 1  ;;  %v544_v44 = vrot.slane %v468_v33, 1  ;;  %v539_v46 = vsel %vm509_vm2, %v537_v30, %v538_v31 }
  0x35   : > { %5467 = vmatprep.subr.bf16.mxu0 %v6128_v3  ;;  %v465_v45 = vld [vmem:[#allocation2 + $0xa0] sm:$0xfe]  ;;  %v467_v47 = vld [vmem:[#allocation2 + $0xb0] sm:$0x1]  ;;  %v470_v48 = vld [vmem:[#allocation2 + $0xc8] sm:$0xfe]  ;;  %v5591_v50 = vpack.c.bf16 %v4554_v36, %v4553_v35 }
  0x36   : > { %v533_v29 = vsel %vm509_vm2, %v531_v11, %v532_v12  ;;  %v472_v49 = vld [vmem:[#allocation2 + $0xd8] sm:$0x1]  ;;  %v4555_v51 = vld [vmem:[%s8306_s1 + $0x360] sm:$0xff]  ;;  %v425_v55 = vld [vmem:[%s8306_s1 + $0x50] sm:$0xff]  ;;  %v540_v57 = vrot.slane %v465_v45, 1  ;;  %v541_v58 = vrot.slane %v467_v47, 1  ;;  %v545_v62 = vsel %vm509_vm2, %v543_v43, %v544_v44 }
  0x37   : > { %5583 = vmatpush1.bf16.msra.mxu1 %v5582_v0  ;;  %v426_v56 = vld [vmem:[%s8306_s1 + $0x58] sm:$0xff]  ;;  %v550_v60 = vrot.slane %v472_v49, 1  ;;  %v469_v63 = vld [vmem:[#allocation2 + $0xc0] sm:$0xfe]  ;;  %v471_v0 = vld [vmem:[#allocation2 + $0xd0] sm:$0x1] }
  0x38   : > { %5469 = vmatpush1.bf16.msra.mxu0 %v5468_v20  ;;  %5584 = vmatprep.subr.bf16.mxu1 %v6128_v3  ;;  %v4552_v20 = vld [vmem:[%s8306_s1 + $0x348] sm:$0xff]  ;;  %v4558_v7 = vld [vmem:[%s8306_s1 + $0x378] sm:$0xff]  ;;  %v5492_v8 = vpack.c.bf16 %v426_v56, %v425_v55  ;;  %v427_v9 = vld [vmem:[%s8306_s1 + $0x60] sm:$0xff]  ;;  %v542_v11 = vsel %vm509_vm2, %v540_v57, %v541_v58  ;;  %v546_v12 = vrot.slane %v469_v63, 1 }
  0x39   : > { %5470 = vmatprep.subr.bf16.mxu0 %v6128_v3  ;;  %v5588_v34 = vpack.c.bf16 %v4552_v20, %v4551_v19  ;;  %v474_v1 = vld [vmem:[#allocation2 + $0xe8] sm:$0xfe]  ;;  %v475_v18 = vld [vmem:[#allocation2 + $0xf0] sm:$0x1]  ;;  %v4559_v20 = vld [vmem:[%s8306_s1 + $0x380] sm:$0xff] }
  0x3a   : > { %v428_v10 = vld [vmem:[%s8306_s1 + $0x68] sm:$0xff]  ;;  %v430_v27 = vld [vmem:[%s8306_s1 + $0x78] sm:$0xff]  ;;  %v4561_v31 = vld [vmem:[%s8306_s1 + $0x390] sm:$0xff] }
  0x3b   : > { %5586 = vmatpush1.bf16.msra.mxu1 %v5585_v17  ;;  %v473_v17 = vld [vmem:[#allocation2 + $0xe0] sm:$0xfe]  ;;  %v4560_v21 = vld [vmem:[%s8306_s1 + $0x388] sm:$0xff]  ;;  %v5495_v22 = vpack.c.bf16 %v428_v10, %v427_v9  ;;  %v304_v30 = vld [vmem:[%s6276_s20 + $0x78] sm:$0xff] }
  0x3c   : > { %5472 = vmatpush1.bf16.msra.mxu0 %v5471_v26  ;;  %v529_v26 = vrot.slane %v459_v15, 1  ;;  %5587 = vmatprep.subr.bf16.mxu1 %v6128_v3  ;;  %v555_v15 = vrot.slane %v474_v1, 1  ;;  %v4562_v32 = vld [vmem:[%s8306_s1 + $0x398] sm:$0xff]  ;;  %v336_v33 = vrot.slane %v304_v30, 7  ;;  %v4564_v43 = vld [vmem:[%s8306_s1 + $0x3a8] sm:$0xff]  ;;  %v433_v45 = vld [vmem:[%s8306_s1 + $0x90] sm:$0xff] }
  0x3d   : > { %5473 = vmatprep.subr.bf16.mxu0 %v6128_v3  ;;  %v4566_v49 = vld [vmem:[%s8306_s1 + $0x3b8] sm:$0xff]  ;;  %v437_v57 = vld [vmem:[%s8306_s1 + $0xb0] sm:$0xff]  ;;  %v6608_v63 = vld [vmem:[#allocation2 + $0x20] sm:$0xff] }
  0x3e   : > { %v530_v42 = vsel %vm509_vm2, %v528_v25, %v529_v26  ;;  %v553_v25 = vrot.slane %v475_v18, 1  ;;  %v429_v26 = vld [vmem:[%s8306_s1 + $0x70] sm:$0xff]  ;;  %385 = vst.msk [vmem:[#allocation2 + $0x108] sm:$0xfe] %vm355_vm3, %v336_v33  ;;  %v4614_v55 = vld [vmem:[%s8306_s1 + $0x4b8] sm:$0xff]  ;;  %v439_v1 = vld [vmem:[%s8306_s1 + $0xc0] sm:$0xff] }
  0x3f   : > { %5589 = vmatpush1.bf16.msra.mxu1 %v5588_v34  ;;  %v303_v34 = vld [vmem:[%s6276_s20 + $0x70] sm:$0xff]  ;;  %v5498_v36 = vpack.c.bf16 %v430_v27, %v429_v26  ;;  %387 = vst.msk [vmem:[#allocation2 + $0x118] sm:$0x1] %vm358_vm4, %v336_v33  ;;  %v438_v58 = vld [vmem:[%s8306_s1 + $0xb8] sm:$0xff]  ;;  %v6629_v9 = vld [vmem:[#allocation2 + $0x40] sm:$0xff] }
  0x40   : > { %5475 = vmatpush1.bf16.msra.mxu0 %v5474_v38  ;;  %v535_v38 = vrot.slane %v463_v28, 1  ;;  %5590 = vmatprep.subr.bf16.mxu1 %v6128_v3  ;;  %v335_v35 = vrot.slane %v303_v34, 7  ;;  %v4499_v27 = vld [vmem:[%s8306_s1 + $0x1e0] sm:$0xff]  ;;  %v4624_v33 = vld [vmem:[%s8306_s1 + $0x508] sm:$0xff] }
  0x41   : > { %5476 = vmatprep.subr.bf16.mxu0 %v6128_v3 }
  0x42   : > { %v536_v54 = vsel %vm509_vm2, %v534_v37, %v535_v38  ;;  %v431_v38 = vld [vmem:[%s8306_s1 + $0x80] sm:$0xff]  ;;  %384 = vst [vmem:[#allocation2 + $0x100] sm:$0xfe] %v335_v35  ;;  %386 = vst [vmem:[#allocation2 + $0x110] sm:$0x1] %v335_v35  ;;  %v4501_v35 = vld [vmem:[%s8306_s1 + $0x1f0] sm:$0xff] }
  0x43   : > { %678 = vmatmul.mubr.f32.vlgmr.msra.gmra.mrb[0].mxu0 %v512_v52  ;;  %v4556_v52 = vld [vmem:[%s8306_s1 + $0x368] sm:$0xff]  ;;  %5592 = vmatpush1.bf16.msra.mxu1 %v5591_v50 }
  0x44   : > { %5478 = vmatpush1.bf16.msra.mxu0 %v5477_v53  ;;  %4484 = vmatprep.mubr.msk.f32.mxu0 %vm226_vm0, %v521_v59  ;;  %v5489_v53 = vpack.c.bf16 %v424_v41, %v423_v40  ;;  %v549_v59 = vrot.slane %v470_v48, 1  ;;  %v5594_v2 = vpack.c.bf16 %v4556_v52, %v4555_v51  ;;  %v400_v40 = vld [vmem:[#allocation2 + $0x8] sm:$0xff]  ;;  %v5603_v41 = vpack.c.bf16 %v4562_v32, %v4561_v31  ;;  %v4565_v48 = vld [vmem:[%s8306_s1 + $0x3b0] sm:$0xff]  ;;  %v435_v51 = vld [vmem:[%s8306_s1 + $0xa0] sm:$0xff] }
  0x45   : > { %5479 = vmatprep.subr.bf16.mxu0 %v6128_v3  ;;  %5593 = vmatprep.subr.bf16.mxu1 %v6128_v3  ;;  %v436_v52 = vld [vmem:[%s8306_s1 + $0xa8] sm:$0xff]  ;;  %v6686_v31 = vld [vmem:[#allocation2 + $0xa0] sm:$0xff] }
  0x46   : > { %v551_v14 = vsel %vm509_vm2, %v549_v59, %v550_v60  ;;  %v5507_v56 = vpack.c.bf16 %v436_v52, %v435_v51  ;;  %v4615_v60 = vld [vmem:[%s8306_s1 + $0x4c0] sm:$0xff] }
  0x47   : > { %683 = vmatmul.mubr.f32.gmra.mrb[2].mxu0 %v518_v5  ;;  %v4557_v5 = vld [vmem:[%s8306_s1 + $0x370] sm:$0xff]  ;;  %5595 = vmatpush1.bf16.msra.mxu1 %v5594_v2  ;;  %v440_v2 = vld [vmem:[%s8306_s1 + $0xc8] sm:$0xff]  ;;  %v4623_v32 = vld [vmem:[%s8306_s1 + $0x500] sm:$0xff] }
  0x48   : > { %5481 = vmatpush1.bf16.msra.mxu0 %v5480_v4  ;;  %4485 = vmatprep.mubr.msk.f32.mxu0 %vm226_vm0, %v527_v13  ;;  %v476_v4 = vld [vmem:[#allocation2 + $0xf8] sm:$0x1]  ;;  %v547_v13 = vrot.slane %v471_v0, 1  ;;  %v5597_v19 = vpack.c.bf16 %v4558_v7, %v4557_v5  ;;  %v5510_v0 = vpack.c.bf16 %v438_v58, %v437_v57  ;;  %v4617_v7 = vld [vmem:[%s8306_s1 + $0x4d0] sm:$0xff]  ;;  %v5513_v10 = vpack.c.bf16 %v440_v2, %v439_v1  ;;  %v4631_v2 = vld [vmem:[%s8306_s1 + $0x540] sm:$0xff] }
  0x49   : > { %5482 = vmatprep.subr.bf16.mxu0 %v6128_v3  ;;  %v556_v16 = vrot.slane %v476_v4, 1  ;;  %5596 = vmatprep.subr.bf16.mxu1 %v6128_v3  ;;  %v6618_v4 = vld [vmem:[#allocation2 + $0x48] sm:$0xff]  ;;  %v4629_v58 = vld [vmem:[%s8306_s1 + $0x530] sm:$0xff] }
  0x4b   : > { %688 = vmatmul.mubr.f32.gmra.mrb[4].mxu0 %v524_v24  ;;  %v552_v24 = vrot.slane %v473_v17, 1  ;;  %v557_v28 = vsel %vm509_vm2, %v555_v15, %v556_v16  ;;  %5598 = vmatpush1.bf16.msra.mxu1 %v5597_v19  ;;  %v4619_v15 = vld [vmem:[%s8306_s1 + $0x4e0] sm:$0xff]  ;;  %v4620_v16 = vld [vmem:[%s8306_s1 + $0x4e8] sm:$0xff] }
  0x4c   : > { %5484 = vmatpush1.bf16.msra.mxu0 %v5483_v23  ;;  %4486 = vmatprep.mubr.msk.f32.mxu0 %vm226_vm0, %v533_v29  ;;  %v548_v23 = vsel %vm509_vm2, %v546_v12, %v547_v13  ;;  %v5600_v29 = vpack.c.bf16 %v4560_v21, %v4559_v20  ;;  %v442_v12 = vld [vmem:[%s8306_s1 + $0xd8] sm:$0xff]  ;;  %v6639_v13 = vld [vmem:[#allocation2 + $0x68] sm:$0xff]  ;;  %v6650_v17 = vld [vmem:[#allocation2 + $0x60] sm:$0xff] }
  0x4d   : > { %5485 = vmatprep.subr.bf16.mxu0 %v6128_v3  ;;  %5599 = vmatprep.subr.bf16.mxu1 %v6128_v3  ;;  %v554_v37 = vsel %vm509_vm2, %v552_v24, %v553_v25  ;;  %v443_v19 = vld [vmem:[%s8306_s1 + $0xe0] sm:$0xff]  ;;  %v444_v20 = vld [vmem:[%s8306_s1 + $0xe8] sm:$0xff]  ;;  %v4622_v24 = vld [vmem:[%s8306_s1 + $0x4f8] sm:$0xff] }
  0x4e   : > { %v6660_v21 = vld [vmem:[#allocation2 + $0x88] sm:$0xff]  ;;  %v6671_v25 = vld [vmem:[#allocation2 + $0x80] sm:$0xff]  ;;  %v5519_v26 = vpack.c.bf16 %v444_v20, %v443_v19 }
  0x4f   : > { %693 = vmatmul.mubr.f32.gmra.mrb[6].mxu0 %v530_v42  ;;  %5601 = vmatpush1.bf16.msra.mxu1 %v5600_v29  ;;  %v4563_v42 = vld [vmem:[%s8306_s1 + $0x3a0] sm:$0xff]  ;;  %v6681_v29 = vld [vmem:[#allocation2 + $0xa8] sm:$0xff] }
  0x50   : > { %5487 = vmatpush1.bf16.msra.mxu0 %v5486_v39  ;;  %4487 = vmatprep.mubr.msk.f32.mxu0 %vm226_vm0, %v539_v46  ;;  %v432_v39 = vld [vmem:[%s8306_s1 + $0x88] sm:$0xff]  ;;  %v434_v46 = vld [vmem:[%s8306_s1 + $0x98] sm:$0xff]  ;;  %v5606_v47 = vpack.c.bf16 %v4564_v43, %v4563_v42  ;;  %v6716_v42 = vld [vmem:[#allocation2 + $0xc0] sm:$0xff] }
  0x51   : > { %5488 = vmatprep.subr.bf16.mxu0 %v6128_v3  ;;  %5602 = vmatprep.subr.bf16.mxu1 %v6128_v3  ;;  %v5501_v44 = vpack.c.bf16 %v432_v39, %v431_v38  ;;  %v5504_v50 = vpack.c.bf16 %v434_v46, %v433_v45  ;;  %v5672_v38 = vpack.c.bf16 %v4624_v33, %v4623_v32  ;;  %v4625_v39 = vld [vmem:[%s8306_s1 + $0x510] sm:$0xff]  ;;  %v1593_v43 = vld [vmem:[#allocation2 + $0x28] sm:$0xfc]  ;;  %v4639_v33 = vld [vmem:[%s8306_s1 + $0x580] sm:$0xff] }
  0x52   : > { %v4504_v45 = vld [vmem:[%s8306_s1 + $0x208] sm:$0xff] }
  0x53   : > { %698 = vmatmul.mubr.f32.gmra.mrb[8].mxu0 %v536_v54  ;;  %5604 = vmatpush1.bf16.msra.mxu1 %v5603_v41  ;;  %v4613_v54 = vld [vmem:[%s8306_s1 + $0x4b0] sm:$0xff]  ;;  %v6725_v46 = vld [vmem:[#allocation2 + $0xe8] sm:$0xff] }
  0x54   : > { %5490 = vmatpush1.bf16.msra.mxu0 %v5489_v53  ;;  %4488 = vmatprep.mubr.msk.f32.mxu0 %vm226_vm0, %v545_v62  ;;  %v5609_v53 = vpack.c.bf16 %v4566_v49, %v4565_v48  ;;  %v5657_v59 = vpack.c.bf16 %v4614_v55, %v4613_v54  ;;  %v4616_v62 = vld [vmem:[%s8306_s1 + $0x4c8] sm:$0xff]  ;;  %v4627_v48 = vld [vmem:[%s8306_s1 + $0x520] sm:$0xff]  ;;  %v4505_v54 = vld [vmem:[%s8306_s1 + $0x210] sm:$0xff] }
  0x55   : > { %5491 = vmatprep.subr.bf16.mxu0 %v6128_v3  ;;  %5605 = vmatprep.subr.bf16.mxu1 %v6128_v3  ;;  %v5660_v5 = vpack.c.bf16 %v4616_v62, %v4615_v60  ;;  %v4628_v49 = vld [vmem:[%s8306_s1 + $0x528] sm:$0xff]  ;;  %v4506_v55 = vld [vmem:[%s8306_s1 + $0x218] sm:$0xff] }
  0x56   : > { %v5678_v57 = vpack.c.bf16 %v4628_v49, %v4627_v48  ;;  %v5531_v62 = vpack.c.bf16 %v4506_v55, %v4505_v54  ;;  %v4636_v19 = vld [vmem:[%s8306_s1 + $0x568] sm:$0xff]  ;;  %v4689_v49 = vld [vmem:[%s8306_s1 + $0x690] sm:$0xff] }
  0x57   : > { %703 = vmatmul.mubr.f32.gmra.mrb[10].mxu0 %v542_v11  ;;  %5607 = vmatpush1.bf16.msra.mxu1 %v5606_v47  ;;  %v441_v11 = vld [vmem:[%s8306_s1 + $0xd0] sm:$0xff]  ;;  %v1143_v47 = vld [vmem:[#allocation2 + $0x108] sm:$0xff] }
  0x58   : > { %5493 = vmatpush1.bf16.msra.mxu0 %v5492_v8  ;;  %4489 = vmatprep.mubr.msk.f32.mxu0 %vm226_vm0, %v551_v14  ;;  %v4618_v8 = vld [vmem:[%s8306_s1 + $0x4d8] sm:$0xff]  ;;  %v5516_v18 = vpack.c.bf16 %v442_v12, %v441_v11  ;;  %v1598_v54 = vld [vmem:[#allocation2 + $0x50] sm:$0x3] }
  0x59   : > { %5494 = vmatprep.subr.bf16.mxu0 %v6128_v3  ;;  %5608 = vmatprep.subr.bf16.mxu1 %v6128_v3  ;;  %v5663_v14 = vpack.c.bf16 %v4618_v8, %v4617_v7  ;;  %v4509_v7 = vld [vmem:[%s8306_s1 + $0x230] sm:$0xff]  ;;  %v4510_v8 = vld [vmem:[%s8306_s1 + $0x238] sm:$0xff] }
  0x5a   : > { %v4634_v11 = vld [vmem:[%s8306_s1 + $0x558] sm:$0xff]  ;;  %v5537_v12 = vpack.c.bf16 %v4510_v8, %v4509_v7  ;;  %v1600_v8 = vld [vmem:[#allocation2 + $0x60] sm:$0xfc] }
  0x5b   : > { %708 = vmatmul.mubr.f32.gmra.mrb[12].mxu0 %v548_v23  ;;  %5610 = vmatpush1.bf16.msra.mxu1 %v5609_v53  ;;  %v4621_v23 = vld [vmem:[%s8306_s1 + $0x4f0] sm:$0xff]  ;;  %v6740_v53 = vld [vmem:[#allocation2 + $0xe0] sm:$0xff] }
  0x5c   : > { %5496 = vmatpush1.bf16.msra.mxu0 %v5495_v22  ;;  %4490 = vmatprep.mubr.msk.f32.mxu0 %vm226_vm0, %v557_v28  ;;  %v5666_v22 = vpack.c.bf16 %v4620_v16, %v4619_v15  ;;  %v4500_v28 = vld [vmem:[%s8306_s1 + $0x1e8] sm:$0xff]  ;;  %v5669_v30 = vpack.c.bf16 %v4622_v24, %v4621_v23  ;;  %v850_v16 = vld [vmem:[#allocation2 + $0x18] sm:$0x3] }
  0x5d   : > { %5497 = vmatprep.subr.bf16.mxu0 %v6128_v3  ;;  %5656 = vmatprep.subr.bf16.mxu1 %v6128_v3  ;;  %v5522_v34 = vpack.c.bf16 %v4500_v28, %v4499_v27  ;;  %v848_v15 = vld [vmem:[#allocation2 + $0x8] sm:$0xfc]  ;;  %v916_v24 = vrot.slane %v850_v16, 2  ;;  %v4638_v27 = vld [vmem:[%s8306_s1 + $0x578] sm:$0xff] }
  0x5e   : > { %1264 = vmatmul.mubr.f32.vlgmr.msra.gmra.mrb[0].mxu1 %v6608_v63  ;;  %v915_v23 = vrot.slane %v848_v15, 2 }
  0x5f   : > { %713 = vmatmul.mubr.f32.gmra.mrb[14].mxu0 %v554_v37  ;;  %5658 = vmatpush1.bf16.msra.mxu1 %v5657_v59  ;;  %v6702_v37 = vld [vmem:[#allocation2 + $0xc8] sm:$0xff]  ;;  %v4630_v59 = vld [vmem:[%s8306_s1 + $0x538] sm:$0xff] }
  0x60   : > { %5499 = vmatpush1.bf16.msra.mxu0 %v5498_v36  ;;  %4491 = vmatprep.mubr.msk.f32.mxu0 %vm226_vm0, %v400_v40  ;;  %v4502_v36 = vld [vmem:[%s8306_s1 + $0x1f8] sm:$0xff]  ;;  %v5681_v1 = vpack.c.bf16 %v4630_v59, %v4629_v58  ;;  %v4521_v58 = vld [vmem:[%s8306_s1 + $0x290] sm:$0xff] }
  0x61   : > { %5500 = vmatprep.subr.bf16.mxu0 %v6128_v3  ;;  %4568 = vmatprep.mubr.msk.f32.mxu1 %vm226_vm0, %v6618_v4  ;;  %v4626_v40 = vld [vmem:[%s8306_s1 + $0x518] sm:$0xff]  ;;  %v5525_v41 = vpack.c.bf16 %v4502_v36, %v4501_v35  ;;  %v4517_v36 = vld [vmem:[%s8306_s1 + $0x270] sm:$0xff] }
  0x62   : > { %5659 = vmatprep.subr.bf16.mxu1 %v6128_v3  ;;  %1269 = vmatmul.mubr.f32.gmra.mrb[2].mxu1 %v6629_v9  ;;  %v4522_v59 = vld [vmem:[%s8306_s1 + $0x298] sm:$0xff] }
  0x63   : > { %5661 = vmatpush1.bf16.msra.mxu1 %v5660_v5  ;;  %4569 = vmatprep.mubr.msk.f32.mxu1 %vm226_vm0, %v6639_v13 }
  0x64   : > { %5502 = vmatpush1.bf16.msra.mxu0 %v5501_v44  ;;  %5662 = vmatprep.subr.bf16.mxu1 %v6128_v3  ;;  %v1595_v44 = vld [vmem:[#allocation2 + $0x38] sm:$0x3] }
  0x65   : > { %5503 = vmatprep.subr.bf16.mxu0 %v6128_v3  ;;  %v1660_v51 = vrot.slane %v1595_v44, 2  ;;  %v1597_v44 = vld [vmem:[#allocation2 + $0x48] sm:$0xfc] }
  0x66   : > { %1274 = vmatmul.mubr.f32.gmra.mrb[4].mxu1 %v6650_v17 }
  0x67   : > { %5664 = vmatpush1.bf16.msra.mxu1 %v5663_v14  ;;  %4570 = vmatprep.mubr.msk.f32.mxu1 %vm226_vm0, %v6660_v21  ;;  %v4512_v14 = vld [vmem:[%s8306_s1 + $0x248] sm:$0xff] }
  0x68   : > { %5505 = vmatpush1.bf16.msra.mxu0 %v5504_v50  ;;  %5665 = vmatprep.subr.bf16.mxu1 %v6128_v3  ;;  %v1659_v50 = vrot.slane %v1593_v43, 2 }
  0x69   : > { %5506 = vmatprep.subr.bf16.mxu0 %v6128_v3 }
  0x6a   : > { %1279 = vmatmul.mubr.f32.gmra.mrb[6].mxu1 %v6671_v25  ;;  %v1661_v60 = vsel %vm911_vm5, %v1659_v50, %v1660_v51  ;;  %v4690_v50 = vld [vmem:[%s8306_s1 + $0x698] sm:$0xff]  ;;  %v1665_v51 = vrot.slane %v1597_v44, 2  ;;  %v1608_v44 = vld [vmem:[#allocation2 + $0xa0] sm:$0xfc] }
  0x6b   : > { %5667 = vmatpush1.bf16.msra.mxu1 %v5666_v22  ;;  %4571 = vmatprep.mubr.msk.f32.mxu1 %vm226_vm0, %v6681_v29  ;;  %v4514_v22 = vld [vmem:[%s8306_s1 + $0x258] sm:$0xff] }
  0x6c   : > { %5508 = vmatpush1.bf16.msra.mxu0 %v5507_v56  ;;  %5668 = vmatprep.subr.bf16.mxu1 %v6128_v3  ;;  %v1142_v56 = vld [vmem:[#allocation2 + $0x100] sm:$0xff] }
  0x6d   : > { %5509 = vmatprep.subr.bf16.mxu0 %v6128_v3 }
  0x6e   : > { %1284 = vmatmul.mubr.f32.gmra.mrb[8].mxu1 %v6686_v31 }
  0x6f   : > { %5670 = vmatpush1.bf16.msra.mxu1 %v5669_v30  ;;  %4572 = vmatprep.mubr.msk.f32.mxu1 %vm226_vm0, %v6702_v37  ;;  %v4516_v30 = vld [vmem:[%s8306_s1 + $0x268] sm:$0xff] }
  0x70   : > { %5511 = vmatpush1.bf16.msra.mxu0 %v5510_v0  ;;  %5671 = vmatprep.subr.bf16.mxu1 %v6128_v3  ;;  %v4508_v0 = vld [vmem:[%s8306_s1 + $0x228] sm:$0xff] }
  0x71   : > { %5512 = vmatprep.subr.bf16.mxu0 %v6128_v3 }
  0x72   : > { %1289 = vmatmul.mubr.f32.gmra.mrb[10].mxu1 %v6716_v42 }
  0x73   : > { %5673 = vmatpush1.bf16.msra.mxu1 %v5672_v38  ;;  %4573 = vmatprep.mubr.msk.f32.mxu1 %vm226_vm0, %v6725_v46 }
  0x74   : > { %5514 = vmatpush1.bf16.msra.mxu0 %v5513_v10  ;;  %5674 = vmatprep.subr.bf16.mxu1 %v6128_v3  ;;  %v4633_v10 = vld [vmem:[%s8306_s1 + $0x550] sm:$0xff] }
  0x75   : > { %5515 = vmatprep.subr.bf16.mxu0 %v6128_v3 }
  0x76   : > { %1294 = vmatmul.mubr.f32.gmra.mrb[12].mxu1 %v6740_v53 }
  0x77   : > { %4574 = vmatprep.mubr.msk.f32.mxu1 %vm226_vm0, %v1143_v47 }
  0x78   : > { %5517 = vmatpush1.bf16.msra.mxu0 %v5516_v18  ;;  %v4635_v18 = vld [vmem:[%s8306_s1 + $0x560] sm:$0xff] }
  0x79   : > { %5518 = vmatprep.subr.bf16.mxu0 %v6128_v3 }
  0x7a   : > { %1299 = vmatmul.mubr.f32.gmra.mrb[14].mxu1 %v1142_v56  ;;  %v1601_v56 = vld [vmem:[#allocation2 + $0x68] sm:$0xfc] }
  0x7b   : > { %4643 = vmatprep.mubr.msk.f32.mxu1 %vm226_vm0, %v1661_v60 }
  0x7c   : > { %5520 = vmatpush1.bf16.msra.mxu0 %v5519_v26  ;;  %v4637_v26 = vld [vmem:[%s8306_s1 + $0x570] sm:$0xff] }
  0x7d   : > { %5521 = vmatprep.subr.bf16.mxu0 %v6128_v3  ;;  %v5693_v32 = vpack.c.bf16 %v4638_v27, %v4637_v26  ;;  %v1609_v27 = vld [vmem:[#allocation2 + $0xa8] sm:$0xfc] }
  0x7f   : > { %807 = vmatmul.mubr.f32.vlgmr.msra.gmra.mrb[16].mxu0 %v6129_v6  ;;  %v4503_v6 = vld [vmem:[%s8306_s1 + $0x200] sm:$0xff] }
  0x80   : > { %5523 = vmatpush1.bf16.msra.mxu0 %v5522_v34  ;;  %4492 = vmatprep.mubr.msk.f32.mxu0 %vm226_vm0, %v6334_v61  ;;  %v5675_v61 = vpack.c.bf16 %v4626_v40, %v4625_v39  ;;  %v5528_v52 = vpack.c.bf16 %v4504_v45, %v4503_v6  ;;  %v4640_v34 = vld [vmem:[%s8306_s1 + $0x588] sm:$0xff]  ;;  %v4641_v39 = vld [vmem:[%s8306_s1 + $0x590] sm:$0xff]  ;;  %v4642_v40 = vld [vmem:[%s8306_s1 + $0x598] sm:$0xff] }
  0x81   : > { %5524 = vmatprep.subr.bf16.mxu0 %v6128_v3  ;;  %v5696_v38 = vpack.c.bf16 %v4640_v34, %v4639_v33  ;;  %v1599_v6 = vld [vmem:[#allocation2 + $0x58] sm:$0x3]  ;;  %v4519_v45 = vld [vmem:[%s8306_s1 + $0x280] sm:$0xff] }
  0x82   : > { %5676 = vmatpush1.bf16.msra.mxu1 %v5675_v61  ;;  %v5699_v61 = vpack.c.bf16 %v4642_v40, %v4641_v39  ;;  %v6931_v39 = vld [vmem:[%s8306_s1 + $0x2c0] sm:$0xff]  ;;  %v6936_v40 = vld [vmem:[%s8306_s1 + $0x2c8] sm:$0xff] }
  0x83   : > { %812 = vmatmul.mubr.f32.gmra.mrb[18].mxu0 %v6608_v63  ;;  %5677 = vmatprep.subr.bf16.mxu1 %v6128_v3  ;;  %v4507_v63 = vld [vmem:[%s8306_s1 + $0x220] sm:$0xff] }
  0x84   : > { %5526 = vmatpush1.bf16.msra.mxu0 %v5525_v41  ;;  %4493 = vmatprep.mubr.msk.f32.mxu0 %vm226_vm0, %v6618_v4  ;;  %v4632_v4 = vld [vmem:[%s8306_s1 + $0x548] sm:$0xff]  ;;  %v5534_v5 = vpack.c.bf16 %v4508_v0, %v4507_v63  ;;  %v1592_v41 = vld [vmem:[#allocation2 + $0x20] sm:$0xfc]  ;;  %v1663_v0 = vrot.slane %v1598_v54, 2 }
  0x85   : > { %5527 = vmatprep.subr.bf16.mxu0 %v6128_v3  ;;  %v1656_v47 = vrot.slane %v1592_v41, 2 }
  0x86   : > { %5679 = vmatpush1.bf16.msra.mxu1 %v5678_v57  ;;  %v1603_v57 = vld [vmem:[#allocation2 + $0x78] sm:$0x3] }
  0x87   : > { %817 = vmatmul.mubr.f32.gmra.mrb[20].mxu0 %v6629_v9  ;;  %5680 = vmatprep.subr.bf16.mxu1 %v6128_v3  ;;  %v5684_v9 = vpack.c.bf16 %v4632_v4, %v4631_v2  ;;  %v4692_v2 = vld [vmem:[%s8306_s1 + $0x6a8] sm:$0xff]  ;;  %v1672_v7 = vrot.slane %v1603_v57, 2  ;;  %v4697_v57 = vld [vmem:[%s8306_s1 + $0x6d0] sm:$0xff] }
  0x88   : > { %5529 = vmatpush1.bf16.msra.mxu0 %v5528_v52  ;;  %4494 = vmatprep.mubr.msk.f32.mxu0 %vm226_vm0, %v6639_v13  ;;  %v4511_v13 = vld [vmem:[%s8306_s1 + $0x240] sm:$0xff]  ;;  %v1666_v52 = vrot.slane %v1599_v6, 2  ;;  %v1610_v6 = vld [vmem:[#allocation2 + $0xb0] sm:$0x3] }
  0x89   : > { %5530 = vmatprep.subr.bf16.mxu0 %v6128_v3  ;;  %v5540_v20 = vpack.c.bf16 %v4512_v14, %v4511_v13  ;;  %v4523_v13 = vld [vmem:[%s8306_s1 + $0x2a0] sm:$0xff]  ;;  %v4524_v14 = vld [vmem:[%s8306_s1 + $0x2a8] sm:$0xff] }
  0x8a   : > { %5682 = vmatpush1.bf16.msra.mxu1 %v5681_v1  ;;  %v4691_v1 = vld [vmem:[%s8306_s1 + $0x6a0] sm:$0xff]  ;;  %v1667_v4 = vsel %vm911_vm5, %v1665_v51, %v1666_v52  ;;  %v5558_v26 = vpack.c.bf16 %v4524_v14, %v4523_v13  ;;  %v6947_v52 = vld [vmem:[#allocation2 + $0x30] sm:$0x3]  ;;  %v858_v13 = vld [vmem:[#allocation2 + $0x58] sm:$0x3] }
  0x8b   : > { %822 = vmatmul.mubr.f32.gmra.mrb[22].mxu0 %v6650_v17  ;;  %5683 = vmatprep.subr.bf16.mxu1 %v6128_v3  ;;  %v5687_v17 = vpack.c.bf16 %v4634_v11, %v4633_v10  ;;  %v5555_v10 = vpack.c.bf16 %v4522_v59, %v4521_v58  ;;  %v1605_v11 = vld [vmem:[#allocation2 + $0x88] sm:$0xfc]  ;;  %v5750_v16 = vpack.c.bf16 %v4692_v2, %v4691_v1  ;;  %v6945_v51 = vld [vmem:[#allocation2 + $0x20] sm:$0xfc]  ;;  %v4698_v58 = vld [vmem:[%s8306_s1 + $0x6d8] sm:$0xff] }
  0x8c   : > { %5532 = vmatpush1.bf16.msra.mxu0 %v5531_v62  ;;  %4495 = vmatprep.mubr.msk.f32.mxu0 %vm226_vm0, %v6660_v21  ;;  %v4513_v21 = vld [vmem:[%s8306_s1 + $0x250] sm:$0xff]  ;;  %v5747_v62 = vpack.c.bf16 %v4690_v50, %v4689_v49  ;;  %v854_v50 = vld [vmem:[#allocation2 + $0x38] sm:$0x3]  ;;  %v6960_v59 = vld [vmem:[%s8306_s1 + $0x3c0] sm:$0xff] }
  0x8d   : > { %5533 = vmatprep.subr.bf16.mxu0 %v6128_v3  ;;  %v5543_v28 = vpack.c.bf16 %v4514_v22, %v4513_v21  ;;  %v1677_v22 = vrot.slane %v1605_v11, 2  ;;  %v1612_v1 = vld [vmem:[#allocation2 + $0xc0] sm:$0xfc]  ;;  %v1614_v2 = vld [vmem:[#allocation2 + $0xd0] sm:$0x3]  ;;  %v919_v11 = vrot.slane %v6947_v52, 2 }
  0x8e   : > { %5685 = vmatpush1.bf16.msra.mxu1 %v5684_v9  ;;  %v1602_v9 = vld [vmem:[#allocation2 + $0x70] sm:$0x3]  ;;  %v6975_v14 = vld [vmem:[#allocation2 + $0x40] sm:$0xfc]  ;;  %v4580_v52 = vld [vmem:[%s8306_s1 + $0x3e8] sm:$0xff] }
  0x8f   : > { %827 = vmatmul.mubr.f32.gmra.mrb[24].mxu0 %v6671_v25  ;;  %5686 = vmatprep.subr.bf16.mxu1 %v6128_v3  ;;  %v5690_v25 = vpack.c.bf16 %v4636_v19, %v4635_v18  ;;  %v1669_v18 = vrot.slane %v1602_v9, 2  ;;  %v4693_v19 = vld [vmem:[%s8306_s1 + $0x6b0] sm:$0xff]  ;;  %v1619_v9 = vld [vmem:[#allocation2 + $0xf8] sm:$0x3] }
  0x90   : > { %5535 = vmatpush1.bf16.msra.mxu0 %v5534_v5  ;;  %4496 = vmatprep.mubr.msk.f32.mxu0 %vm226_vm0, %v6681_v29  ;;  %v4515_v29 = vld [vmem:[%s8306_s1 + $0x260] sm:$0xff]  ;;  %v1671_v5 = vrot.slane %v1601_v56, 2  ;;  %v1681_v56 = vrot.slane %v1610_v6, 2 }
  0x91   : > { %5536 = vmatprep.subr.bf16.mxu0 %v6128_v3  ;;  %v5546_v35 = vpack.c.bf16 %v4516_v30, %v4515_v29  ;;  %v4525_v29 = vld [vmem:[%s8306_s1 + $0x2b0] sm:$0xff]  ;;  %v4526_v30 = vld [vmem:[%s8306_s1 + $0x2b8] sm:$0xff]  ;;  %v7012_v6 = vld [vmem:[%s8306_s1 + $0x3e0] sm:$0xff] }
  0x92   : > { %5688 = vmatpush1.bf16.msra.mxu1 %v5687_v17  ;;  %v1668_v17 = vrot.slane %v1600_v8, 2  ;;  %v1673_v21 = vsel %vm911_vm5, %v1671_v5, %v1672_v7  ;;  %v922_v7 = vrot.slane %v854_v50, 2  ;;  %v1617_v8 = vld [vmem:[#allocation2 + $0xe8] sm:$0xfc] }
  0x93   : > { %832 = vmatmul.mubr.f32.gmra.mrb[26].mxu0 %v6686_v31  ;;  %5689 = vmatprep.subr.bf16.mxu1 %v6128_v3  ;;  %v917_v31 = vsel %vm911_vm5, %v915_v23, %v916_v24  ;;  %v1604_v24 = vld [vmem:[#allocation2 + $0x80] sm:$0xfc] }
  0x94   : > { %5538 = vmatpush1.bf16.msra.mxu0 %v5537_v12  ;;  %4497 = vmatprep.mubr.msk.f32.mxu0 %vm226_vm0, %v6702_v37  ;;  %v4518_v37 = vld [vmem:[%s8306_s1 + $0x278] sm:$0xff]  ;;  %v1670_v33 = vsel %vm911_vm5, %v1668_v17, %v1669_v18  ;;  %v1686_v17 = vrot.slane %v1612_v1, 2  ;;  %v1687_v18 = vrot.slane %v1614_v2, 2 }
  0x95   : > { %5539 = vmatprep.subr.bf16.mxu0 %v6128_v3  ;;  %v5549_v43 = vpack.c.bf16 %v4518_v37, %v4517_v36  ;;  %v1607_v12 = vld [vmem:[#allocation2 + $0x98] sm:$0x3]  ;;  %v4695_v37 = vld [vmem:[%s8306_s1 + $0x6c0] sm:$0xff] }
  0x96   : > { %5691 = vmatpush1.bf16.msra.mxu1 %v5690_v25  ;;  %v1678_v23 = vrot.slane %v1607_v12, 2  ;;  %v1606_v25 = vld [vmem:[#allocation2 + $0x90] sm:$0x3]  ;;  %v856_v12 = vld [vmem:[#allocation2 + $0x48] sm:$0xfc] }
  0x97   : > { %837 = vmatmul.mubr.f32.gmra.mrb[28].mxu0 %v6716_v42  ;;  %5692 = vmatprep.subr.bf16.mxu1 %v6128_v3  ;;  %v1594_v42 = vld [vmem:[#allocation2 + $0x30] sm:$0x3]  ;;  %v1675_v36 = vrot.slane %v1606_v25, 2  ;;  %v1616_v25 = vld [vmem:[#allocation2 + $0xe0] sm:$0xfc] }
  0x98   : > { %5541 = vmatpush1.bf16.msra.mxu0 %v5540_v20  ;;  %4498 = vmatprep.mubr.msk.f32.mxu0 %vm226_vm0, %v6725_v46  ;;  %v4520_v46 = vld [vmem:[%s8306_s1 + $0x288] sm:$0xff]  ;;  %v1657_v48 = vrot.slane %v1594_v42, 2  ;;  %v4694_v20 = vld [vmem:[%s8306_s1 + $0x6b8] sm:$0xff]  ;;  %v1679_v41 = vsel %vm911_vm5, %v1677_v22, %v1678_v23  ;;  %v1683_v42 = vrot.slane %v1609_v27, 2  ;;  %v1695_v23 = vrot.slane %v1617_v8, 2 }
  0x99   : > { %5542 = vmatprep.subr.bf16.mxu0 %v6128_v3  ;;  %v5552_v55 = vpack.c.bf16 %v4520_v46, %v4519_v45  ;;  %v5753_v34 = vpack.c.bf16 %v4694_v20, %v4693_v19  ;;  %v5561_v45 = vpack.c.bf16 %v4526_v30, %v4525_v29  ;;  %v6940_v46 = vld [vmem:[#allocation2 + $0x28] sm:$0xfc]  ;;  %v4699_v19 = vld [vmem:[%s8306_s1 + $0x6e0] sm:$0xff]  ;;  %v4578_v29 = vld [vmem:[%s8306_s1 + $0x3d8] sm:$0xff]  ;;  %v927_v30 = vrot.slane %v856_v12, 2 }
  0x9a   : > { %5694 = vmatpush1.bf16.msra.mxu1 %v5693_v32  ;;  %v1658_v60 = vsel %vm911_vm5, %v1656_v47, %v1657_v48  ;;  %v6918_v32 = vld [vmem:[#allocation2 + $0x10] sm:$0x3]  ;;  %v1615_v47 = vld [vmem:[#allocation2 + $0xd8] sm:$0x3]  ;;  %v921_v5 = vrot.slane %v6940_v46, 2  ;;  %v4700_v20 = vld [vmem:[%s8306_s1 + $0x6e8] sm:$0xff] }
  0x9b   : > { %842 = vmatmul.mubr.f32.gmra.mrb[30].mxu0 %v6740_v53  ;;  %5695 = vmatprep.subr.bf16.mxu1 %v6128_v3  ;;  %v1596_v53 = vld [vmem:[#allocation2 + $0x40] sm:$0xfc]  ;;  %v913_v49 = vrot.slane %v6918_v32, 2  ;;  %v1623_v32 = vld [vmem:[#allocation2 + $0x118] sm:$0x3] }
  0x9c   : > { %5544 = vmatpush1.bf16.msra.mxu0 %v5543_v28  ;;  %4529 = vmatprep.mubr.msk.f32.mxu0 %vm226_vm0, %v917_v31  ;;  %v1662_v63 = vrot.slane %v1596_v53, 2  ;;  %v1611_v28 = vld [vmem:[#allocation2 + $0xb8] sm:$0x3]  ;;  %v6916_v31 = vld [vmem:[#allocation2] sm:$0xfc] }
  0x9d   : > { %5545 = vmatprep.subr.bf16.mxu0 %v6128_v3  ;;  %v912_v48 = vrot.slane %v6916_v31, 2  ;;  %v1621_v31 = vld [vmem:[#allocation2 + $0x108] sm:$0xfc] }
  0x9e   : > { %5697 = vmatpush1.bf16.msra.mxu1 %v5696_v38  ;;  %v1664_v15 = vsel %vm911_vm5, %v1662_v63, %v1663_v0  ;;  %v4696_v38 = vld [vmem:[%s8306_s1 + $0x6c8] sm:$0xff]  ;;  %v1690_v0 = vrot.slane %v1615_v47, 2  ;;  %v1701_v46 = vrot.slane %v1621_v31, 2  ;;  %v1620_v47 = vld [vmem:[#allocation2 + $0x100] sm:$0xfc] }
  0x9f   : > { %5698 = vmatprep.subr.bf16.mxu1 %v6128_v3  ;;  %v5756_v54 = vpack.c.bf16 %v4696_v38, %v4695_v37  ;;  %v914_v27 = vsel %vm911_vm5, %v912_v48, %v913_v49  ;;  %v860_v37 = vld [vmem:[#allocation2 + $0x68] sm:$0xfc]  ;;  %v862_v38 = vld [vmem:[#allocation2 + $0x78] sm:$0x3]  ;;  %v1622_v48 = vld [vmem:[#allocation2 + $0x110] sm:$0x3] }
  0xa0   : > { %5547 = vmatpush1.bf16.msra.mxu0 %v5546_v35  ;;  %v1674_v35 = vrot.slane %v1604_v24, 2  ;;  %v1696_v24 = vrot.slane %v1619_v9, 2  ;;  %v1698_v1 = vrot.slane %v1620_v47, 2  ;;  %v1699_v2 = vrot.slane %v1622_v48, 2  ;;  %v4586_v47 = vld [vmem:[%s8306_s1 + $0x418] sm:$0xff] }
  0xa1   : > { %5548 = vmatprep.subr.bf16.mxu0 %v6128_v3 }
  0xa2   : > { %5700 = vmatpush1.bf16.msra.mxu1 %v5699_v61  ;;  %v1613_v61 = vld [vmem:[#allocation2 + $0xc8] sm:$0xfc]  ;;  %v1676_v53 = vsel %vm911_vm5, %v1674_v35, %v1675_v36  ;;  %v857_v35 = vld [vmem:[#allocation2 + $0x50] sm:$0x3]  ;;  %v924_v36 = vrot.slane %v6975_v14, 2 }
  0xa3   : > { %5746 = vmatprep.subr.bf16.mxu1 %v6128_v3  ;;  %v1689_v63 = vrot.slane %v1613_v61, 2  ;;  %v1702_v61 = vrot.slane %v1623_v32, 2  ;;  %v4581_v14 = vld [vmem:[%s8306_s1 + $0x3f0] sm:$0xff]  ;;  %v4583_v32 = vld [vmem:[%s8306_s1 + $0x400] sm:$0xff] }
  0xa4   : > { %5550 = vmatpush1.bf16.msra.mxu0 %v5549_v43  ;;  %v1684_v43 = vrot.slane %v1611_v28, 2 }
  0xa5   : > { %5551 = vmatprep.subr.bf16.mxu0 %v6128_v3  ;;  %1824 = vmatmul.mubr.f32.vlgmr.msra.gmra.mrb[16].mxu1 %v1658_v60  ;;  %v6965_v60 = vld [vmem:[%s8306_s1 + $0x3c8] sm:$0xff]  ;;  %v1691_v22 = vsel %vm911_vm5, %v1689_v63, %v1690_v0 }
  0xa6   : > { %5748 = vmatpush1.bf16.msra.mxu1 %v5747_v62  ;;  %4644 = vmatprep.mubr.msk.f32.mxu1 %vm226_vm0, %v1667_v4  ;;  %v1685_v62 = vsel %vm911_vm5, %v1683_v42, %v1684_v43  ;;  %v5564_v4 = vpack.c.bf16 %v6936_v40, %v6931_v39  ;;  %v5612_v28 = vpack.c.bf16 %v6965_v60, %v6960_v59  ;;  %v4701_v43 = vld [vmem:[%s8306_s1 + $0x6f0] sm:$0xff]  ;;  %v864_v60 = vld [vmem:[#allocation2 + $0x88] sm:$0xfc] }
  0xa7   : > { %5749 = vmatprep.subr.bf16.mxu1 %v6128_v3  ;;  %v1688_v39 = vsel %vm911_vm5, %v1686_v17, %v1687_v18  ;;  %v5762_v40 = vpack.c.bf16 %v4700_v20, %v4699_v19  ;;  %v861_v59 = vld [vmem:[#allocation2 + $0x70] sm:$0x3]  ;;  %v939_v17 = vrot.slane %v864_v60, 2  ;;  %v863_v19 = vld [vmem:[#allocation2 + $0x80] sm:$0xfc] }
  0xa8   : > { %5553 = vmatpush1.bf16.msra.mxu0 %v5552_v55  ;;  %v1680_v55 = vrot.slane %v1608_v44, 2  ;;  %v4702_v44 = vld [vmem:[%s8306_s1 + $0x6f8] sm:$0xff]  ;;  %v865_v20 = vld [vmem:[#allocation2 + $0x90] sm:$0x3] }
  0xa9   : > { %5554 = vmatprep.subr.bf16.mxu0 %v6128_v3  ;;  %1829 = vmatmul.mubr.f32.gmra.mrb[18].mxu1 %v1664_v15  ;;  %v5765_v0 = vpack.c.bf16 %v4702_v44, %v4701_v43  ;;  %v937_v31 = vrot.slane %v865_v20, 2  ;;  %v4708_v43 = vld [vmem:[%s8306_s1 + $0x728] sm:$0xff] }
  0xaa   : > { %5751 = vmatpush1.bf16.msra.mxu1 %v5750_v16  ;;  %4645 = vmatprep.mubr.msk.f32.mxu1 %vm226_vm0, %v1673_v21  ;;  %v1682_v15 = vsel %vm911_vm5, %v1680_v55, %v1681_v56  ;;  %v5759_v16 = vpack.c.bf16 %v4698_v58, %v4697_v57  ;;  %v6988_v21 = vld [vmem:[%s8306_s1 + $0x3d0] sm:$0xff]  ;;  %v933_v56 = vrot.slane %v860_v37, 2  ;;  %v934_v57 = vrot.slane %v862_v38, 2  ;;  %v859_v58 = vld [vmem:[#allocation2 + $0x60] sm:$0xfc] }
  0xab   : > { %5752 = vmatprep.subr.bf16.mxu1 %v6128_v3  ;;  %v5615_v50 = vpack.c.bf16 %v4578_v29, %v6988_v21  ;;  %v930_v12 = vrot.slane %v859_v58, 2  ;;  %v868_v21 = vld [vmem:[#allocation2 + $0xa8] sm:$0xfc]  ;;  %v867_v37 = vld [vmem:[#allocation2 + $0xa0] sm:$0xfc] }
  0xac   : > { %5556 = vmatpush1.bf16.msra.mxu0 %v5555_v10  ;;  %v918_v10 = vrot.slane %v6945_v51, 2  ;;  %v925_v51 = vrot.slane %v857_v35, 2  ;;  %v945_v35 = vrot.slane %v868_v21, 2  ;;  %v869_v38 = vld [vmem:[#allocation2 + $0xb0] sm:$0x3] }
  0xad   : > { %5557 = vmatprep.subr.bf16.mxu0 %v6128_v3  ;;  %1834 = vmatmul.mubr.f32.gmra.mrb[20].mxu1 %v1670_v33  ;;  %v923_v33 = vsel %vm911_vm5, %v921_v5, %v922_v7  ;;  %v4703_v5 = vld [vmem:[%s8306_s1 + $0x700] sm:$0xff]  ;;  %v4704_v7 = vld [vmem:[%s8306_s1 + $0x708] sm:$0xff] }
  0xae   : > { %5754 = vmatpush1.bf16.msra.mxu1 %v5753_v34  ;;  %4646 = vmatprep.mubr.msk.f32.mxu1 %vm226_vm0, %v1679_v41  ;;  %v928_v34 = vrot.slane %v858_v13, 2  ;;  %v1692_v41 = vrot.slane %v1616_v25, 2  ;;  %v920_v49 = vsel %vm911_vm5, %v918_v10, %v919_v11  ;;  %v926_v10 = vsel %vm911_vm5, %v924_v36, %v925_v51  ;;  %v4705_v25 = vld [vmem:[%s8306_s1 + $0x710] sm:$0xff]  ;;  %v871_v51 = vld [vmem:[#allocation2 + $0xc0] sm:$0xfc] }
  0xaf   : > { %5755 = vmatprep.subr.bf16.mxu1 %v6128_v3  ;;  %v5618_v11 = vpack.c.bf16 %v4580_v52, %v7012_v6  ;;  %v931_v13 = vrot.slane %v861_v59, 2  ;;  %v873_v52 = vld [vmem:[#allocation2 + $0xd0] sm:$0x3]  ;;  %v948_v60 = vrot.slane %v871_v51, 2 }
  0xb0   : > { %5559 = vmatpush1.bf16.msra.mxu0 %v5558_v26  ;;  %v1618_v26 = vld [vmem:[#allocation2 + $0xf0] sm:$0x3]  ;;  %v929_v55 = vsel %vm911_vm5, %v927_v30, %v928_v34  ;;  %v936_v30 = vrot.slane %v863_v19, 2  ;;  %v4590_v19 = vld [vmem:[%s8306_s1 + $0x438] sm:$0xff] }
  0xb1   : > { %5560 = vmatprep.subr.bf16.mxu0 %v6128_v3  ;;  %1839 = vmatmul.mubr.f32.gmra.mrb[22].mxu1 %v1676_v53  ;;  %v1693_v42 = vrot.slane %v1618_v26, 2  ;;  %v2058_v53 = vld [vmem:[#allocation2 + $0x48] sm:$0xfe]  ;;  %v4706_v26 = vld [vmem:[%s8306_s1 + $0x718] sm:$0xff] }
  0xb2   : > { %5757 = vmatpush1.bf16.msra.mxu1 %v5756_v54  ;;  %4647 = vmatprep.mubr.msk.f32.mxu1 %vm226_vm0, %v1685_v62  ;;  %v2060_v54 = vld [vmem:[#allocation2 + $0x58] sm:$0x1]  ;;  %v2124_v8 = vrot.slane %v2058_v53, 1  ;;  %v938_v44 = vsel %vm911_vm5, %v936_v30, %v937_v31  ;;  %v876_v53 = vld [vmem:[#allocation2 + $0xe8] sm:$0xfc]  ;;  %v4715_v31 = vld [vmem:[%s8306_s1 + $0x760] sm:$0xff] }
  0xb3   : > { %5758 = vmatprep.subr.bf16.mxu1 %v6128_v3  ;;  %v866_v62 = vld [vmem:[#allocation2 + $0x98] sm:$0x3]  ;;  %v1694_v63 = vsel %vm911_vm5, %v1692_v41, %v1693_v42  ;;  %v2125_v9 = vrot.slane %v2060_v54, 1  ;;  %v5771_v41 = vpack.c.bf16 %v4706_v26, %v4705_v25  ;;  %v4707_v42 = vld [vmem:[%s8306_s1 + $0x720] sm:$0xff] }
  0xb4   : > { %5562 = vmatpush1.bf16.msra.mxu0 %v5561_v45  ;;  %v1697_v45 = vsel %vm911_vm5, %v1695_v23, %v1696_v24  ;;  %v940_v18 = vrot.slane %v866_v62, 2  ;;  %v1700_v23 = vsel %vm911_vm5, %v1698_v1, %v1699_v2  ;;  %v5768_v24 = vpack.c.bf16 %v4704_v7, %v4703_v5  ;;  %v878_v54 = vld [vmem:[#allocation2 + $0xf8] sm:$0x3]  ;;  %v875_v5 = vld [vmem:[#allocation2 + $0xe0] sm:$0xfc] }
  0xb5   : > { %5563 = vmatprep.subr.bf16.mxu0 %v6128_v3  ;;  %1844 = vmatmul.mubr.f32.gmra.mrb[24].mxu1 %v1682_v15  ;;  %v4582_v15 = vld [vmem:[%s8306_s1 + $0x3f8] sm:$0xff]  ;;  %v949_v62 = vrot.slane %v873_v52, 2  ;;  %v957_v2 = vrot.slane %v876_v53, 2  ;;  %v877_v7 = vld [vmem:[#allocation2 + $0xf0] sm:$0x3] }
  0xb6   : > { %5760 = vmatpush1.bf16.msra.mxu1 %v5759_v16  ;;  %4648 = vmatprep.mubr.msk.f32.mxu1 %vm226_vm0, %v1691_v22  ;;  %v935_v16 = vsel %vm911_vm5, %v933_v56, %v934_v57  ;;  %v870_v22 = vld [vmem:[#allocation2 + $0xb8] sm:$0x3]  ;;  %v5621_v29 = vpack.c.bf16 %v4582_v15, %v4581_v14  ;;  %v941_v34 = vsel %vm911_vm5, %v939_v17, %v940_v18  ;;  %v4709_v56 = vld [vmem:[%s8306_s1 + $0x730] sm:$0xff]  ;;  %v954_v15 = vrot.slane %v875_v5, 2  ;;  %v2066_v52 = vld [vmem:[#allocation2 + $0x88] sm:$0xfe] }
  0xb7   : > { %5761 = vmatprep.subr.bf16.mxu1 %v6128_v3  ;;  %v946_v36 = vrot.slane %v870_v22, 2  ;;  %v4710_v57 = vld [vmem:[%s8306_s1 + $0x738] sm:$0xff]  ;;  %v4589_v18 = vld [vmem:[%s8306_s1 + $0x430] sm:$0xff]  ;;  %v4599_v5 = vld [vmem:[%s8306_s1 + $0x480] sm:$0xff] }
  0xb8   : > { %5565 = vmatpush1.bf16.msra.mxu0 %v5564_v4  ;;  %v1703_v4 = vsel %vm911_vm5, %v1701_v46, %v1702_v61  ;;  %v943_v46 = vrot.slane %v869_v38, 2  ;;  %v4585_v61 = vld [vmem:[%s8306_s1 + $0x410] sm:$0xff]  ;;  %v5633_v26 = vpack.c.bf16 %v4590_v19, %v4589_v18  ;;  %v4718_v38 = vld [vmem:[%s8306_s1 + $0x778] sm:$0xff] }
  0xb9   : > { %5611 = vmatprep.subr.bf16.mxu0 %v6128_v3  ;;  %1849 = vmatmul.mubr.f32.gmra.mrb[26].mxu1 %v1688_v39  ;;  %v872_v39 = vld [vmem:[#allocation2 + $0xc8] sm:$0xfc]  ;;  %v947_v48 = vsel %vm911_vm5, %v945_v35, %v946_v36  ;;  %v5627_v59 = vpack.c.bf16 %v4586_v47, %v4585_v61  ;;  %v4594_v35 = vld [vmem:[%s8306_s1 + $0x458] sm:$0xff]  ;;  %v4601_v19 = vld [vmem:[%s8306_s1 + $0x490] sm:$0xff] }
  0xba   : > { %5763 = vmatpush1.bf16.msra.mxu1 %v5762_v40  ;;  %4649 = vmatprep.mubr.msk.f32.mxu1 %vm226_vm0, %v1697_v45  ;;  %v874_v40 = vld [vmem:[#allocation2 + $0xd8] sm:$0x3]  ;;  %v942_v45 = vrot.slane %v867_v37, 2  ;;  %v4717_v37 = vld [vmem:[%s8306_s1 + $0x770] sm:$0xff] }
  0xbb   : > { %1080 = vmatmul.mubr.f32.vlgmr.msra.gmra.mrb[32].mxu0 %v914_v27  ;;  %5764 = vmatprep.subr.bf16.mxu1 %v6128_v3  ;;  %v2126_v27 = vsel %vm509_vm2, %v2124_v8, %v2125_v9  ;;  %v1313_v8 = vld [vmem:[#allocation2 + $0x28] sm:$0xfe]  ;;  %v1315_v9 = vld [vmem:[#allocation2 + $0x38] sm:$0x1] }
  0xbc   : > { %5613 = vmatpush1.bf16.msra.mxu0 %v5612_v28  ;;  %4530 = vmatprep.mubr.msk.f32.mxu0 %vm226_vm0, %v923_v33  ;;  %v932_v28 = vsel %vm911_vm5, %v930_v12, %v931_v13  ;;  %v4584_v33 = vld [vmem:[%s8306_s1 + $0x408] sm:$0xff]  ;;  %v944_v58 = vsel %vm911_vm5, %v942_v45, %v943_v46  ;;  %v950_v13 = vsel %vm911_vm5, %v948_v60, %v949_v62  ;;  %v1379_v20 = vrot.slane %v1313_v8, 1  ;;  %v2068_v53 = vld [vmem:[#allocation2 + $0x98] sm:$0x1] }
  0xbd   : > { %5614 = vmatprep.subr.bf16.mxu0 %v6128_v3  ;;  %1854 = vmatmul.mubr.f32.gmra.mrb[28].mxu1 %v1694_v63  ;;  %v5624_v6 = vpack.c.bf16 %v4584_v33, %v4583_v32  ;;  %v4587_v63 = vld [vmem:[%s8306_s1 + $0x420] sm:$0xff]  ;;  %v4712_v12 = vld [vmem:[%s8306_s1 + $0x748] sm:$0xff]  ;;  %v1380_v21 = vrot.slane %v1315_v9, 1  ;;  %v5789_v45 = vpack.c.bf16 %v4718_v38, %v4717_v37  ;;  %v2136_v60 = vrot.slane %v2066_v52, 1  ;;  %v2076_v18 = vld [vmem:[#allocation2 + $0xd8] sm:$0x1] }
  0xbe   : > { %5766 = vmatpush1.bf16.msra.mxu1 %v5765_v0  ;;  %4650 = vmatprep.mubr.msk.f32.mxu1 %vm226_vm0, %v1703_v4  ;;  %v4588_v0 = vld [vmem:[%s8306_s1 + $0x428] sm:$0xff]  ;;  %v958_v4 = vrot.slane %v878_v54, 2  ;;  %v4597_v54 = vld [vmem:[%s8306_s1 + $0x470] sm:$0xff]  ;;  %v2137_v62 = vrot.slane %v2068_v53, 1  ;;  %v1319_v38 = vld [vmem:[#allocation2 + $0x58] sm:$0x1] }
  0xbf   : > { %1085 = vmatmul.mubr.f32.gmra.mrb[34].mxu0 %v920_v49  ;;  %5767 = vmatprep.subr.bf16.mxu1 %v6128_v3  ;;  %v951_v49 = vrot.slane %v872_v39, 2  ;;  %v5630_v14 = vpack.c.bf16 %v4588_v0, %v4587_v63  ;;  %v4716_v32 = vld [vmem:[%s8306_s1 + $0x768] sm:$0xff]  ;;  %v2057_v39 = vld [vmem:[#allocation2 + $0x40] sm:$0xfe]  ;;  %v2067_v0 = vld [vmem:[#allocation2 + $0x90] sm:$0x1] }
  0xc0   : > { %5616 = vmatpush1.bf16.msra.mxu0 %v5615_v50  ;;  %4531 = vmatprep.mubr.msk.f32.mxu0 %vm226_vm0, %v929_v55  ;;  %v952_v50 = vrot.slane %v874_v40, 2  ;;  %v5774_v55 = vpack.c.bf16 %v4708_v43, %v4707_v42  ;;  %v959_v17 = vsel %vm911_vm5, %v957_v2, %v958_v4  ;;  %v5786_v36 = vpack.c.bf16 %v4716_v32, %v4715_v31  ;;  %v2059_v40 = vld [vmem:[#allocation2 + $0x50] sm:$0x1]  ;;  %v2062_v42 = vld [vmem:[#allocation2 + $0x68] sm:$0xfe]  ;;  %v4603_v31 = vld [vmem:[%s8306_s1 + $0x4a0] sm:$0xff] }
  0xc1   : > { %5617 = vmatprep.subr.bf16.mxu0 %v6128_v3  ;;  %1859 = vmatmul.mubr.f32.gmra.mrb[30].mxu1 %v1700_v23  ;;  %v4713_v23 = vld [vmem:[%s8306_s1 + $0x750] sm:$0xff]  ;;  %v2064_v43 = vld [vmem:[#allocation2 + $0x78] sm:$0x1]  ;;  %v2121_v46 = vrot.slane %v2057_v39, 1  ;;  %v2122_v61 = vrot.slane %v2059_v40, 1  ;;  %v2130_v47 = vrot.slane %v2062_v42, 1 }
  0xc2   : > { %5769 = vmatpush1.bf16.msra.mxu1 %v5768_v24  ;;  %4719 = vmatprep.mubr.msk.f32.mxu1 %vm226_vm0, %v2126_v27  ;;  %v953_v1 = vsel %vm911_vm5, %v951_v49, %v952_v50  ;;  %v4714_v24 = vld [vmem:[%s8306_s1 + $0x758] sm:$0xff]  ;;  %v4591_v27 = vld [vmem:[%s8306_s1 + $0x440] sm:$0xff]  ;;  %v2063_v50 = vld [vmem:[#allocation2 + $0x70] sm:$0x1]  ;;  %v1386_v53 = vrot.slane %v1319_v38, 1 }
  0xc3   : > { %1090 = vmatmul.mubr.f32.gmra.mrb[36].mxu0 %v926_v10  ;;  %5770 = vmatprep.subr.bf16.mxu1 %v6128_v3  ;;  %v5777_v10 = vpack.c.bf16 %v4710_v57, %v4709_v56  ;;  %v5783_v30 = vpack.c.bf16 %v4714_v24, %v4713_v23  ;;  %v2061_v49 = vld [vmem:[#allocation2 + $0x60] sm:$0xfe]  ;;  %v2123_v56 = vsel %vm509_vm2, %v2121_v46, %v2122_v61  ;;  %v2070_v2 = vld [vmem:[#allocation2 + $0xa8] sm:$0xfe]  ;;  %v2072_v4 = vld [vmem:[#allocation2 + $0xb8] sm:$0x1] }
  0xc4   : > { %5619 = vmatpush1.bf16.msra.mxu0 %v5618_v11  ;;  %4532 = vmatprep.mubr.msk.f32.mxu0 %vm226_vm0, %v935_v16  ;;  %v4711_v11 = vld [vmem:[%s8306_s1 + $0x740] sm:$0xff]  ;;  %v955_v16 = vrot.slane %v877_v7, 2  ;;  %v2127_v57 = vrot.slane %v2061_v49, 1  ;;  %v4600_v7 = vld [vmem:[%s8306_s1 + $0x488] sm:$0xff]  ;;  %v2079_v46 = vld [vmem:[#allocation2 + $0xf0] sm:$0x1] }
  0xc5   : > { %5620 = vmatprep.subr.bf16.mxu0 %v6128_v3  ;;  %v5780_v22 = vpack.c.bf16 %v4712_v12, %v4711_v11  ;;  %v2065_v63 = vld [vmem:[#allocation2 + $0x80] sm:$0xfe]  ;;  %v2138_v11 = vsel %vm509_vm2, %v2136_v60, %v2137_v62  ;;  %v2142_v12 = vrot.slane %v2070_v2, 1  ;;  %v2078_v32 = vld [vmem:[#allocation2 + $0xe8] sm:$0xfe]  ;;  %v2152_v60 = vrot.slane %v2079_v46, 1 }
  0xc6   : > { %5772 = vmatpush1.bf16.msra.mxu1 %v5771_v41  ;;  %v956_v25 = vsel %vm911_vm5, %v954_v15, %v955_v16  ;;  %v2133_v9 = vrot.slane %v2065_v63, 1  ;;  %v2071_v15 = vld [vmem:[#allocation2 + $0xb0] sm:$0x1]  ;;  %v5648_v16 = vpack.c.bf16 %v4600_v7, %v4599_v5  ;;  %v1317_v37 = vld [vmem:[#allocation2 + $0x48] sm:$0xfe] }
  0xc7   : > { %1095 = vmatmul.mubr.f32.gmra.mrb[38].mxu0 %v932_v28  ;;  %5773 = vmatprep.subr.bf16.mxu1 %v6128_v3  ;;  %v4592_v28 = vld [vmem:[%s8306_s1 + $0x448] sm:$0xff]  ;;  %v2140_v24 = vrot.slane %v2071_v15, 1  ;;  %v7201_v39 = vld [vmem:[#allocation2 + $0x40] sm:$0xfe]  ;;  %v1385_v52 = vrot.slane %v1317_v37, 1  ;;  %v4653_v62 = vld [vmem:[%s8306_s1 + $0x5b0] sm:$0xff] }
  0xc8   : > { %5622 = vmatpush1.bf16.msra.mxu0 %v5621_v29  ;;  %4533 = vmatprep.mubr.msk.f32.mxu0 %vm226_vm0, %v941_v34  ;;  %v1381_v29 = vsel %vm509_vm2, %v1379_v20, %v1380_v21  ;;  %v5636_v33 = vpack.c.bf16 %v4592_v28, %v4591_v27  ;;  %v4593_v34 = vld [vmem:[%s8306_s1 + $0x450] sm:$0xff]  ;;  %v4602_v20 = vld [vmem:[%s8306_s1 + $0x498] sm:$0xff]  ;;  %v1312_v21 = vld [vmem:[#allocation2 + $0x20] sm:$0xfe]  ;;  %v2149_v27 = vrot.slane %v2076_v18, 1 }
  0xc9   : > { %5623 = vmatprep.subr.bf16.mxu0 %v6128_v3  ;;  %v5639_v41 = vpack.c.bf16 %v4594_v35, %v4593_v34  ;;  %v2073_v28 = vld [vmem:[#allocation2 + $0xc0] sm:$0xfe]  ;;  %v4604_v34 = vld [vmem:[%s8306_s1 + $0x4a8] sm:$0xff]  ;;  %v1314_v35 = vld [vmem:[#allocation2 + $0x30] sm:$0x1] }
  0xca   : > { %5775 = vmatpush1.bf16.msra.mxu1 %v5774_v55  ;;  %v4598_v55 = vld [vmem:[%s8306_s1 + $0x478] sm:$0xff]  ;;  %v5654_v61 = vpack.c.bf16 %v4604_v34, %v4603_v31  ;;  %v2082_v49 = vld [vmem:[#allocation2 + $0x108] sm:$0xfe]  ;;  %v2081_v2 = vld [vmem:[#allocation2 + $0x100] sm:$0xfe] }
  0xcb   : > { %1100 = vmatmul.mubr.f32.gmra.mrb[40].mxu0 %v938_v44  ;;  %5776 = vmatprep.subr.bf16.mxu1 %v6128_v3  ;;  %v4595_v44 = vld [vmem:[%s8306_s1 + $0x460] sm:$0xff]  ;;  %v1327_v18 = vld [vmem:[#allocation2 + $0x98] sm:$0x1]  ;;  %v1326_v37 = vld [vmem:[#allocation2 + $0x90] sm:$0x1] }
  0xcc   : > { %5625 = vmatpush1.bf16.msra.mxu0 %v5624_v6  ;;  %4534 = vmatprep.mubr.msk.f32.mxu0 %vm226_vm0, %v947_v48  ;;  %v4596_v6 = vld [vmem:[%s8306_s1 + $0x468] sm:$0xff]  ;;  %v2131_v48 = vrot.slane %v2064_v43, 1  ;;  %v1320_v15 = vld [vmem:[#allocation2 + $0x60] sm:$0xfe]  ;;  %v1395_v46 = vrot.slane %v1326_v37, 1  ;;  %v4665_v37 = vld [vmem:[%s8306_s1 + $0x610] sm:$0xff] }
  0xcd   : > { %5626 = vmatprep.subr.bf16.mxu0 %v6128_v3  ;;  %v5642_v51 = vpack.c.bf16 %v4596_v6, %v4595_v44  ;;  %v2154_v44 = vrot.slane %v2078_v32, 1  ;;  %v4655_v31 = vld [vmem:[%s8306_s1 + $0x5c0] sm:$0xff]  ;;  %v4656_v32 = vld [vmem:[%s8306_s1 + $0x5c8] sm:$0xff] }
  0xce   : > { %5778 = vmatpush1.bf16.msra.mxu1 %v5777_v10  ;;  %v2134_v10 = vrot.slane %v2067_v0, 1  ;;  %v2160_v0 = vrot.slane %v2082_v49, 1  ;;  %v1329_v38 = vld [vmem:[#allocation2 + $0xa8] sm:$0xfe] }
  0xcf   : > { %1105 = vmatmul.mubr.f32.gmra.mrb[42].mxu0 %v944_v58  ;;  %5779 = vmatprep.subr.bf16.mxu1 %v6128_v3  ;;  %v2128_v58 = vrot.slane %v2063_v50, 1  ;;  %v2084_v50 = vld [vmem:[#allocation2 + $0x118] sm:$0x1]  ;;  %v1403_v49 = vrot.slane %v1329_v38, 1 }
  0xd0   : > { %5628 = vmatpush1.bf16.msra.mxu0 %v5627_v59  ;;  %4535 = vmatprep.mubr.msk.f32.mxu0 %vm226_vm0, %v953_v1  ;;  %v2132_v59 = vsel %vm509_vm2, %v2130_v47, %v2131_v48  ;;  %v5645_v1 = vpack.c.bf16 %v4598_v55, %v4597_v54  ;;  %v1377_v47 = vrot.slane %v1314_v35, 1  ;;  %v4651_v48 = vld [vmem:[%s8306_s1 + $0x5a0] sm:$0xff]  ;;  %v1318_v54 = vld [vmem:[#allocation2 + $0x50] sm:$0x1]  ;;  %v1382_v55 = vrot.slane %v7201_v39, 1  ;;  %v4666_v38 = vld [vmem:[%s8306_s1 + $0x618] sm:$0xff] }
  0xd1   : > { %5629 = vmatprep.subr.bf16.mxu0 %v6128_v3  ;;  %v2129_v8 = vsel %vm509_vm2, %v2127_v57, %v2128_v58  ;;  %v1323_v57 = vld [vmem:[#allocation2 + $0x78] sm:$0x1]  ;;  %v1398_v35 = vrot.slane %v1327_v18, 1  ;;  %v1338_v18 = vld [vmem:[#allocation2 + $0xf0] sm:$0x1] }
  0xd2   : > { %5781 = vmatpush1.bf16.msra.mxu1 %v5780_v22  ;;  %v2135_v22 = vsel %vm509_vm2, %v2133_v9, %v2134_v10  ;;  %v4654_v9 = vld [vmem:[%s8306_s1 + $0x5b8] sm:$0xff]  ;;  %v2086_v10 = vld [vmem:[#allocation2 + $0x128] sm:$0xfe] }
  0xd3   : > { %1110 = vmatmul.mubr.f32.gmra.mrb[44].mxu0 %v950_v13  ;;  %5782 = vmatprep.subr.bf16.mxu1 %v6128_v3  ;;  %v2143_v13 = vrot.slane %v2072_v4, 1  ;;  %v2083_v4 = vld [vmem:[#allocation2 + $0x110] sm:$0x1]  ;;  %v1331_v39 = vld [vmem:[#allocation2 + $0xb8] sm:$0x1] }
  0xd4   : > { %5631 = vmatpush1.bf16.msra.mxu0 %v5630_v14  ;;  %4536 = vmatprep.mubr.msk.f32.mxu0 %vm226_vm0, %v959_v17  ;;  %v2069_v14 = vld [vmem:[#allocation2 + $0xa0] sm:$0xfe]  ;;  %v2074_v17 = vld [vmem:[#allocation2 + $0xc8] sm:$0xfe] }
  0xd5   : > { %5632 = vmatprep.subr.bf16.mxu0 %v6128_v3  ;;  %v2139_v23 = vrot.slane %v2069_v14, 1  ;;  %v1392_v14 = vrot.slane %v1323_v57, 1 }
  0xd6   : > { %5784 = vmatpush1.bf16.msra.mxu1 %v5783_v30  ;;  %v5651_v30 = vpack.c.bf16 %v4602_v20, %v4601_v19  ;;  %v2157_v20 = vrot.slane %v2081_v2, 1  ;;  %v1332_v2 = vld [vmem:[#allocation2 + $0xc0] sm:$0xfe] }
  0xd7   : > { %1115 = vmatmul.mubr.f32.gmra.mrb[46].mxu0 %v956_v25  ;;  %5785 = vmatprep.subr.bf16.mxu1 %v6128_v3  ;;  %v2144_v25 = vsel %vm509_vm2, %v2142_v12, %v2143_v13  ;;  %v2141_v40 = vsel %vm509_vm2, %v2139_v23, %v2140_v24  ;;  %v1387_v12 = vsel %vm509_vm2, %v1385_v52, %v1386_v53  ;;  %v2166_v23 = vrot.slane %v2086_v10, 1  ;;  %v1330_v52 = vld [vmem:[#allocation2 + $0xb0] sm:$0x1]  ;;  %v1333_v53 = vld [vmem:[#allocation2 + $0xc8] sm:$0xfe] }
  0xd8   : > { %5634 = vmatpush1.bf16.msra.mxu0 %v5633_v26  ;;  %4605 = vmatprep.mubr.msk.f32.mxu0 %vm226_vm0, %v1381_v29  ;;  %v2148_v26 = vrot.slane %v2074_v17, 1  ;;  %v2075_v29 = vld [vmem:[#allocation2 + $0xd0] sm:$0x1]  ;;  %v1325_v17 = vld [vmem:[#allocation2 + $0x88] sm:$0xfe]  ;;  %v1406_v10 = vrot.slane %v1332_v2, 1 }
  0xd9   : > { %5635 = vmatprep.subr.bf16.mxu0 %v6128_v3  ;;  %v2146_v42 = vrot.slane %v2075_v29, 1  ;;  %v1388_v29 = vrot.slane %v1320_v15, 1  ;;  %v1397_v34 = vrot.slane %v1325_v17, 1  ;;  %v1336_v17 = vld [vmem:[#allocation2 + $0xe0] sm:$0xfe] }
  0xda   : > { %5787 = vmatpush1.bf16.msra.mxu1 %v5786_v36  ;;  %v1376_v36 = vrot.slane %v1312_v21, 1  ;;  %v2150_v43 = vsel %vm509_vm2, %v2148_v26, %v2149_v27  ;;  %v2158_v21 = vrot.slane %v2083_v4, 1  ;;  %v2087_v26 = vld [vmem:[#allocation2 + $0x130] sm:$0x1] }
  0xdb   : > { %5788 = vmatprep.subr.bf16.mxu1 %v6128_v3  ;;  %v1334_v4 = vld [vmem:[#allocation2 + $0xd0] sm:$0x1] }
  0xdc   : > { %5637 = vmatpush1.bf16.msra.mxu0 %v5636_v33  ;;  %v2080_v33 = vld [vmem:[#allocation2 + $0xf8] sm:$0x1]  ;;  %v1378_v5 = vsel %vm509_vm2, %v1376_v36, %v1377_v47  ;;  %v1324_v36 = vld [vmem:[#allocation2 + $0x80] sm:$0xfe] }
  0xdd   : > { %5638 = vmatprep.subr.bf16.mxu0 %v6128_v3  ;;  %v2155_v6 = vrot.slane %v2080_v33, 1  ;;  %v4658_v47 = vld [vmem:[%s8306_s1 + $0x5d8] sm:$0xff] }
  0xde   : > { %5790 = vmatpush1.bf16.msra.mxu1 %v5789_v45  ;;  %v2077_v45 = vld [vmem:[#allocation2 + $0xe0] sm:$0xfe] }
  0xdf   : > { %5836 = vmatprep.subr.bf16.mxu1 %v6128_v3  ;;  %v2156_v63 = vsel %vm509_vm2, %v2154_v44, %v2155_v6  ;;  %v5708_v6 = vpack.c.bf16 %v4656_v32, %v4655_v31  ;;  %v1342_v31 = vld [vmem:[#allocation2 + $0x110] sm:$0x1] }
  0xe0   : > { %5640 = vmatpush1.bf16.msra.mxu0 %v5639_v41  ;;  %v2145_v41 = vrot.slane %v2073_v28, 1  ;;  %v5705_v28 = vpack.c.bf16 %v4654_v9, %v4653_v62  ;;  %v4660_v62 = vld [vmem:[%s8306_s1 + $0x5e8] sm:$0xff] }
  0xe1   : > { %5641 = vmatprep.subr.bf16.mxu0 %v6128_v3  ;;  %2289 = vmatmul.mubr.f32.vlgmr.msra.gmra.mrb[32].mxu1 %v2123_v56  ;;  %v1321_v56 = vld [vmem:[#allocation2 + $0x68] sm:$0xfe] }
  0xe2   : > { %4720 = vmatprep.mubr.msk.f32.mxu1 %vm226_vm0, %v2132_v59  ;;  %v2147_v58 = vsel %vm509_vm2, %v2145_v41, %v2146_v42  ;;  %v2151_v59 = vrot.slane %v2077_v45, 1  ;;  %v1391_v13 = vrot.slane %v1321_v56, 1  ;;  %v2164_v42 = vrot.slane %v2087_v26, 1  ;;  %v4664_v26 = vld [vmem:[%s8306_s1 + $0x608] sm:$0xff] }
  0xe3   : > { %v1394_v45 = vrot.slane %v1324_v36, 1 }
  0xe4   : > { %5643 = vmatpush1.bf16.msra.mxu0 %v5642_v51  ;;  %v4652_v51 = vld [vmem:[%s8306_s1 + $0x5a8] sm:$0xff]  ;;  %v2153_v19 = vsel %vm509_vm2, %v2151_v59, %v2152_v60  ;;  %v1393_v33 = vsel %vm509_vm2, %v1391_v13, %v1392_v14  ;;  %v1401_v59 = vrot.slane %v1330_v52, 1  ;;  %v4659_v60 = vld [vmem:[%s8306_s1 + $0x5e0] sm:$0xff]  ;;  %v4662_v13 = vld [vmem:[%s8306_s1 + $0x5f8] sm:$0xff] }
  0xe5   : > { %5644 = vmatprep.subr.bf16.mxu0 %v6128_v3  ;;  %2294 = vmatmul.mubr.f32.gmra.mrb[34].mxu1 %v2129_v8  ;;  %v5702_v7 = vpack.c.bf16 %v4652_v51, %v4651_v48  ;;  %v1383_v8 = vrot.slane %v1318_v54, 1  ;;  %v1399_v48 = vsel %vm509_vm2, %v1397_v34, %v1398_v35  ;;  %v1328_v51 = vld [vmem:[#allocation2 + $0xa0] sm:$0xfe]  ;;  %v1335_v54 = vld [vmem:[#allocation2 + $0xd8] sm:$0x1]  ;;  %v1396_v56 = vsel %vm509_vm2, %v1394_v45, %v1395_v46 }
  0xe6   : > { %4721 = vmatprep.mubr.msk.f32.mxu1 %vm226_vm0, %v2138_v11  ;;  %v2088_v11 = vld [vmem:[#allocation2 + $0x138] sm:$0x1]  ;;  %v5714_v9 = vpack.c.bf16 %v4660_v62, %v4659_v60  ;;  %v1419_v35 = vrot.slane %v1342_v31, 1  ;;  %v4733_v31 = vld [vmem:[%s8306_s1 + $0x7b0] sm:$0xff] }
  0xe7   : > { %v2167_v24 = vrot.slane %v2088_v11, 1  ;;  %v1384_v27 = vsel %vm509_vm2, %v1382_v55, %v1383_v8  ;;  %v1407_v11 = vrot.slane %v1334_v4, 1  ;;  %v4670_v45 = vld [vmem:[%s8306_s1 + $0x638] sm:$0xff] }
  0xe8   : > { %5646 = vmatpush1.bf16.msra.mxu0 %v5645_v1  ;;  %v2161_v1 = vrot.slane %v2084_v50, 1  ;;  %v1404_v50 = vrot.slane %v1331_v39, 1 }
  0xe9   : > { %5647 = vmatprep.subr.bf16.mxu0 %v6128_v3  ;;  %2299 = vmatmul.mubr.f32.gmra.mrb[36].mxu1 %v2135_v22 }
  0xea   : > { %4722 = vmatprep.mubr.msk.f32.mxu1 %vm226_vm0, %v2144_v25  ;;  %v2162_v22 = vsel %vm509_vm2, %v2160_v0, %v2161_v1  ;;  %v2085_v25 = vld [vmem:[#allocation2 + $0x120] sm:$0xfe]  ;;  %v1409_v0 = vrot.slane %v1333_v53, 1  ;;  %v1410_v1 = vrot.slane %v1335_v54, 1  ;;  %v4673_v53 = vld [vmem:[%s8306_s1 + $0x650] sm:$0xff]  ;;  %v4674_v54 = vld [vmem:[%s8306_s1 + $0x658] sm:$0xff] }
  0xeb   : > { %v2163_v41 = vrot.slane %v2085_v25, 1  ;;  %v4663_v25 = vld [vmem:[%s8306_s1 + $0x600] sm:$0xff] }
  0xec   : > { %5649 = vmatpush1.bf16.msra.mxu0 %v5648_v16  ;;  %v1322_v16 = vld [vmem:[#allocation2 + $0x70] sm:$0x1]  ;;  %v1411_v14 = vsel %vm509_vm2, %v1409_v0, %v1410_v1  ;;  %v4678_v1 = vld [vmem:[%s8306_s1 + $0x678] sm:$0xff] }
  0xed   : > { %5650 = vmatprep.subr.bf16.mxu0 %v6128_v3  ;;  %2304 = vmatmul.mubr.f32.gmra.mrb[38].mxu1 %v2141_v40  ;;  %v2159_v40 = vsel %vm509_vm2, %v2157_v20, %v2158_v21  ;;  %v2165_v55 = vsel %vm509_vm2, %v2163_v41, %v2164_v42  ;;  %v1343_v20 = vld [vmem:[#allocation2 + $0x118] sm:$0x1]  ;;  %v1408_v21 = vsel %vm509_vm2, %v1406_v10, %v1407_v11  ;;  %v4667_v41 = vld [vmem:[%s8306_s1 + $0x620] sm:$0xff]  ;;  %v4668_v42 = vld [vmem:[%s8306_s1 + $0x628] sm:$0xff] }
  0xee   : > { %4723 = vmatprep.mubr.msk.f32.mxu1 %vm226_vm0, %v2150_v43  ;;  %v2168_v43 = vsel %vm509_vm2, %v2166_v23, %v2167_v24  ;;  %v1412_v23 = vrot.slane %v1336_v17, 1  ;;  %v1413_v24 = vrot.slane %v1338_v18, 1  ;;  %v4677_v0 = vld [vmem:[%s8306_s1 + $0x670] sm:$0xff]  ;;  %v1876_v18 = vld [vmem:[#allocation2 + $0x68] sm:$0xff] }
  0xf0   : > { %5652 = vmatpush1.bf16.msra.mxu0 %v5651_v30  ;;  %v1389_v30 = vrot.slane %v1322_v16, 1  ;;  %v1414_v32 = vsel %vm509_vm2, %v1412_v23, %v1413_v24  ;;  %v1875_v23 = vld [vmem:[#allocation2 + $0x60] sm:$0xff] }
  0xf1   : > { %5653 = vmatprep.subr.bf16.mxu0 %v6128_v3  ;;  %2309 = vmatmul.mubr.f32.gmra.mrb[40].mxu1 %v2147_v58  ;;  %v1400_v58 = vrot.slane %v1328_v51, 1 }
  0xf2   : > { %4724 = vmatprep.mubr.msk.f32.mxu1 %vm226_vm0, %v2156_v63  ;;  %v1390_v44 = vsel %vm509_vm2, %v1388_v29, %v1389_v30  ;;  %v1405_v63 = vsel %vm509_vm2, %v1403_v49, %v1404_v50  ;;  %v1422_v29 = vrot.slane %v1343_v20, 1  ;;  %v1340_v30 = vld [vmem:[#allocation2 + $0x100] sm:$0xfe]  ;;  %v4672_v49 = vld [vmem:[%s8306_s1 + $0x648] sm:$0xff]  ;;  %v4730_v20 = vld [vmem:[%s8306_s1 + $0x798] sm:$0xff] }
  0xf3   : > { %v1402_v8 = vsel %vm509_vm2, %v1400_v58, %v1401_v59  ;;  %v1418_v34 = vrot.slane %v1340_v30, 1  ;;  %v4675_v58 = vld [vmem:[%s8306_s1 + $0x660] sm:$0xff]  ;;  %v4676_v59 = vld [vmem:[%s8306_s1 + $0x668] sm:$0xff] }
  0xf4   : > { %5655 = vmatpush1.bf16.msra.mxu0 %v5654_v61  ;;  %v4657_v61 = vld [vmem:[%s8306_s1 + $0x5d0] sm:$0xff]  ;;  %v1880_v30 = vld [vmem:[#allocation2 + $0xa8] sm:$0xff] }
  0xf5   : > { %5701 = vmatprep.subr.bf16.mxu0 %v6128_v3  ;;  %2314 = vmatmul.mubr.f32.gmra.mrb[42].mxu1 %v2153_v19  ;;  %v5711_v57 = vpack.c.bf16 %v4658_v47, %v4657_v61  ;;  %v1341_v19 = vld [vmem:[#allocation2 + $0x108] sm:$0xfe]  ;;  %v1420_v39 = vsel %vm509_vm2, %v1418_v34, %v1419_v35 }
  0xf6   : > { %4725 = vmatprep.mubr.msk.f32.mxu1 %vm226_vm0, %v2162_v22  ;;  %v1882_v35 = vld [vmem:[#allocation2 + $0xc8] sm:$0xff] }
  0xf7   : > { %1544 = vmatmul.mubr.f32.vlgmr.msra.gmra.mrb[48].mxu0 %v1378_v5  ;;  %v1337_v5 = vld [vmem:[#allocation2 + $0xe8] sm:$0xfe] }
  0xf8   : > { %5703 = vmatpush1.bf16.msra.mxu0 %v5702_v7  ;;  %4606 = vmatprep.mubr.msk.f32.mxu0 %vm226_vm0, %v1387_v12  ;;  %v1339_v7 = vld [vmem:[#allocation2 + $0xf8] sm:$0x1]  ;;  %v4661_v12 = vld [vmem:[%s8306_s1 + $0x5f0] sm:$0xff]  ;;  %v1415_v15 = vrot.slane %v1337_v5, 1  ;;  %v5741_v5 = vpack.c.bf16 %v4678_v1, %v4677_v0 }
  0xf9   : > { %5704 = vmatprep.subr.bf16.mxu0 %v6128_v3  ;;  %2319 = vmatmul.mubr.f32.gmra.mrb[44].mxu1 %v2159_v40  ;;  %v1416_v16 = vrot.slane %v1339_v7, 1  ;;  %v5717_v22 = vpack.c.bf16 %v4662_v13, %v4661_v12  ;;  %v5723_v40 = vpack.c.bf16 %v4666_v38, %v4665_v37  ;;  %v4679_v7 = vld [vmem:[%s8306_s1 + $0x680] sm:$0xff]  ;;  %v4728_v13 = vld [vmem:[%s8306_s1 + $0x788] sm:$0xff] }
  0xfa   : > { %4726 = vmatprep.mubr.msk.f32.mxu1 %vm226_vm0, %v2168_v43  ;;  %v1874_v43 = vld [vmem:[#allocation2 + $0x48] sm:$0xff]  ;;  %v4727_v12 = vld [vmem:[%s8306_s1 + $0x780] sm:$0xff] }
  0xfb   : > { %1549 = vmatmul.mubr.f32.gmra.mrb[50].mxu0 %v1384_v27  ;;  %v1417_v27 = vsel %vm509_vm2, %v1415_v15, %v1416_v16  ;;  %v1873_v16 = vld [vmem:[#allocation2 + $0x40] sm:$0xff]  ;;  %v5792_v17 = vpack.c.bf16 %v4728_v13, %v4727_v12  ;;  %v4736_v37 = vld [vmem:[%s8306_s1 + $0x7c8] sm:$0xff] }
  0xfc   : > { %5706 = vmatpush1.bf16.msra.mxu0 %v5705_v28  ;;  %4607 = vmatprep.mubr.msk.f32.mxu0 %vm226_vm0, %v1393_v33  ;;  %v1421_v28 = vrot.slane %v1341_v19, 1  ;;  %v5720_v33 = vpack.c.bf16 %v4664_v26, %v4663_v25  ;;  %v4729_v19 = vld [vmem:[%s8306_s1 + $0x790] sm:$0xff]  ;;  %v1878_v25 = vld [vmem:[#allocation2 + $0x88] sm:$0xff]  ;;  %v4731_v26 = vld [vmem:[%s8306_s1 + $0x7a0] sm:$0xff] }
  0xfd   : > { %5707 = vmatprep.subr.bf16.mxu0 %v6128_v3  ;;  %2324 = vmatmul.mubr.f32.gmra.mrb[46].mxu1 %v2165_v55  ;;  %v5795_v24 = vpack.c.bf16 %v4730_v20, %v4729_v19  ;;  %v7441_v12 = vld [vmem:[#allocation2] sm:$0xff] }
  0xfe   : > { %v1423_v36 = vsel %vm509_vm2, %v1421_v28, %v1422_v29  ;;  %v1877_v28 = vld [vmem:[#allocation2 + $0x80] sm:$0xff]  ;;  %5121 = vmatprep.mubr.msk.f32.mxu1 %vm6130_vm6, %v7441_v12  ;;  %268 = vst.msk [vmem:[#allocation3] sm:$0xff] %vm267_vm9, %v7441_v12  ;;  %271 = vst.msk [vmem:[#allocation3 + $0x10] sm:$0xff] %vm267_vm9, %v7441_v12 }
  0xff   : > { %1554 = vmatmul.mubr.f32.gmra.mrb[52].mxu0 %v1390_v44  ;;  %v5726_v44 = vpack.c.bf16 %v4668_v42, %v4667_v41  ;;  %v1884_v42 = vld [vmem:[#allocation2 + $0xe8] sm:$0xff]  ;;  %270 = vst.msk [vmem:[#allocation3 + $0x8] sm:$0x3] %vm269_vm10, %v7441_v12  ;;  %272 = vst.msk [vmem:[#allocation3 + $0x18] sm:$0x3] %vm269_vm10, %v7441_v12 }
 0x100   : > { %5709 = vmatpush1.bf16.msra.mxu0 %v5708_v6  ;;  %4608 = vmatprep.mubr.msk.f32.mxu0 %vm226_vm0, %v1399_v48  ;;  %v4669_v6 = vld [vmem:[%s8306_s1 + $0x630] sm:$0xff]  ;;  %v4671_v48 = vld [vmem:[%s8306_s1 + $0x640] sm:$0xff]  ;;  %273 = vst.msk [vmem:[#allocation3 + $0x20] sm:$0xff] %vm267_vm9, %v7441_v12  ;;  %275 = vst.msk [vmem:[#allocation3 + $0x30] sm:$0xff] %vm267_vm9, %v7441_v12 }
 0x101   : > { %5710 = vmatprep.subr.bf16.mxu0 %v6128_v3  ;;  %v5729_v47 = vpack.c.bf16 %v4670_v45, %v4669_v6  ;;  %v5732_v52 = vpack.c.bf16 %v4672_v49, %v4671_v48  ;;  %v1883_v45 = vld [vmem:[#allocation2 + $0xe0] sm:$0xff]  ;;  %v1886_v48 = vld [vmem:[#allocation2 + $0x108] sm:$0xff]  ;;  %274 = vst.msk [vmem:[#allocation3 + $0x28] sm:$0x3] %vm269_vm10, %v7441_v12  ;;  %276 = vst.msk [vmem:[#allocation3 + $0x38] sm:$0x3] %vm269_vm10, %v7441_v12 }
 0x102   : > { %v4739_v49 = vld [vmem:[%s8306_s1 + $0x7e0] sm:$0xff]  ;;  %277 = vst.msk [vmem:[#allocation3 + $0x40] sm:$0xff] %vm267_vm9, %v7441_v12  ;;  %279 = vst.msk [vmem:[#allocation3 + $0x50] sm:$0xff] %vm267_vm9, %v7441_v12 }
 0x103   : > { %1559 = vmatmul.mubr.f32.gmra.mrb[54].mxu0 %v1396_v56  ;;  %278 = vst.msk [vmem:[#allocation3 + $0x48] sm:$0x3] %vm269_vm10, %v7441_v12  ;;  %280 = vst.msk [vmem:[#allocation3 + $0x58] sm:$0x3] %vm269_vm10, %v7441_v12 }
 0x104   : > { %5712 = vmatpush1.bf16.msra.mxu0 %v5711_v57  ;;  %4609 = vmatprep.mubr.msk.f32.mxu0 %vm226_vm0, %v1405_v63  ;;  %v5735_v57 = vpack.c.bf16 %v4674_v54, %v4673_v53  ;;  %v5738_v63 = vpack.c.bf16 %v4676_v59, %v4675_v58  ;;  %v2340_v53 = vld [vmem:[#allocation2 + $0x58] sm:$0x3]  ;;  %v1888_v59 = vld [vmem:[#allocation2 + $0x128] sm:$0xff]  ;;  %281 = vst.msk [vmem:[#allocation3 + $0x60] sm:$0xff] %vm267_vm9, %v7441_v12  ;;  %283 = vst.msk [vmem:[#allocation3 + $0x70] sm:$0xff] %vm267_vm9, %v7441_v12 }
 0x105   : > { %5713 = vmatprep.subr.bf16.mxu0 %v6128_v3  ;;  %v2405_v1 = vrot.slane %v2340_v53, 2  ;;  %v4756_v53 = vld [vmem:[%s8306_s1 + $0x868] sm:$0xff]  ;;  %282 = vst.msk [vmem:[#allocation3 + $0x68] sm:$0x3] %vm269_vm10, %v7441_v12  ;;  %284 = vst.msk [vmem:[#allocation3 + $0x78] sm:$0x3] %vm269_vm10, %v7441_v12 }
 0x106   : > { %285 = vst.msk [vmem:[#allocation3 + $0x80] sm:$0xff] %vm267_vm9, %v7441_v12  ;;  %287 = vst.msk [vmem:[#allocation3 + $0x90] sm:$0xff] %vm267_vm9, %v7441_v12 }
 0x107   : > { %1564 = vmatmul.mubr.f32.gmra.mrb[56].mxu0 %v1402_v8  ;;  %v4680_v8 = vld [vmem:[%s8306_s1 + $0x688] sm:$0xff]  ;;  %286 = vst.msk [vmem:[#allocation3 + $0x88] sm:$0x3] %vm269_vm10, %v7441_v12  ;;  %288 = vst.msk [vmem:[#allocation3 + $0x98] sm:$0x3] %vm269_vm10, %v7441_v12 }
 0x108   : > { %5715 = vmatpush1.bf16.msra.mxu0 %v5714_v9  ;;  %4610 = vmatprep.mubr.msk.f32.mxu0 %vm226_vm0, %v1411_v14  ;;  %v5744_v11 = vpack.c.bf16 %v4680_v8, %v4679_v7  ;;  %v4743_v8 = vld [vmem:[%s8306_s1 + $0x800] sm:$0xff] }
 0x109   : > { %5716 = vmatprep.subr.bf16.mxu0 %v6128_v3 }
 0x10b   : > { %1569 = vmatmul.mubr.f32.gmra.mrb[58].mxu0 %v1408_v21 }
 0x10c   : > { %5718 = vmatpush1.bf16.msra.mxu0 %v5717_v22  ;;  %4611 = vmatprep.mubr.msk.f32.mxu0 %vm226_vm0, %v1417_v27  ;;  %v4732_v27 = vld [vmem:[%s8306_s1 + $0x7a8] sm:$0xff] }
 0x10d   : > { %5719 = vmatprep.subr.bf16.mxu0 %v6128_v3  ;;  %v5798_v29 = vpack.c.bf16 %v4732_v27, %v4731_v26  ;;  %v4748_v26 = vld [vmem:[%s8306_s1 + $0x828] sm:$0xff] }
 0x10f   : > { %1574 = vmatmul.mubr.f32.gmra.mrb[60].mxu0 %v1414_v32  ;;  %v4734_v32 = vld [vmem:[%s8306_s1 + $0x7b8] sm:$0xff] }
 0x110   : > { %5721 = vmatpush1.bf16.msra.mxu0 %v5720_v33  ;;  %4612 = vmatprep.mubr.msk.f32.mxu0 %vm226_vm0, %v1423_v36  ;;  %v1879_v33 = vld [vmem:[#allocation2 + $0xa0] sm:$0xff]  ;;  %v5801_v34 = vpack.c.bf16 %v4734_v32, %v4733_v31  ;;  %v4749_v32 = vld [vmem:[%s8306_s1 + $0x830] sm:$0xff] }
 0x111   : > { %5722 = vmatprep.subr.bf16.mxu0 %v6128_v3  ;;  %v4735_v36 = vld [vmem:[%s8306_s1 + $0x7c0] sm:$0xff] }
 0x113   : > { %1579 = vmatmul.mubr.f32.gmra.mrb[62].mxu0 %v1420_v39  ;;  %v1881_v39 = vld [vmem:[#allocation2 + $0xc0] sm:$0xff] }
 0x114   : > { %5724 = vmatpush1.bf16.msra.mxu0 %v5723_v40  ;;  %4681 = vmatprep.mubr.msk.f32.mxu0 %vm226_vm0, %v1874_v43  ;;  %v5804_v40 = vpack.c.bf16 %v4736_v37, %v4735_v36  ;;  %v4737_v43 = vld [vmem:[%s8306_s1 + $0x7d0] sm:$0xff] }
 0x115   : > { %5725 = vmatprep.subr.bf16.mxu0 %v6128_v3 }
 0x116   : > { %v7311_v46 = vpop.f32.mrb[0].mxu0 }
 0x117   : > { %v681_v61 = vpop.f32.mrb[1].mxu0 }
 0x118   : > { %5727 = vmatpush1.bf16.msra.mxu0 %v5726_v44  ;;  %v4738_v44 = vld [vmem:[%s8306_s1 + $0x7d8] sm:$0xff] }
 0x119   : > { %5728 = vmatprep.subr.bf16.mxu0 %v6128_v3  ;;  %v5807_v61 = vpack.c.bf16 %v4738_v44, %v4737_v43 }
 0x11a   : > { %v7320_v50 = vpop.f32.mrb[2].mxu0 }
 0x11b   : > { %v686_v51 = vpop.f32.mrb[3].mxu0 }
 0x11c   : > { %5730 = vmatpush1.bf16.msra.mxu0 %v5729_v47  ;;  %v4740_v51 = vld [vmem:[%s8306_s1 + $0x7e8] sm:$0xff] }
 0x11d   : > { %5731 = vmatprep.subr.bf16.mxu0 %v6128_v3 }
 0x11e   : > { %v7329_v55 = vpop.f32.mrb[4].mxu0 }
 0x11f   : > { %v691_v56 = vpop.f32.mrb[5].mxu0 }
 0x120   : > { %5733 = vmatpush1.bf16.msra.mxu0 %v5732_v52  ;;  %v2338_v52 = vld [vmem:[#allocation2 + $0x48] sm:$0xfc]  ;;  %v1885_v56 = vld [vmem:[#allocation2 + $0x100] sm:$0xff] }
 0x121   : > { %5734 = vmatprep.subr.bf16.mxu0 %v6128_v3  ;;  %v2404_v0 = vrot.slane %v2338_v52, 2  ;;  %v4755_v52 = vld [vmem:[%s8306_s1 + $0x860] sm:$0xff] }
 0x122   : > { %v7338_v60 = vpop.f32.mrb[6].mxu0 }
 0x123   : > { %v696_v62 = vpop.f32.mrb[7].mxu0 }
 0x124   : > { %5736 = vmatpush1.bf16.msra.mxu0 %v5735_v57  ;;  %v5810_v57 = vpack.c.bf16 %v4740_v51, %v4739_v49  ;;  %v4741_v62 = vld [vmem:[%s8306_s1 + $0x7f0] sm:$0xff] }
 0x125   : > { %5737 = vmatprep.subr.bf16.mxu0 %v6128_v3 }
 0x126   : > { %v7347_v2 = vpop.f32.mrb[8].mxu0 }
 0x127   : > { %v701_v4 = vpop.f32.mrb[9].mxu0 }
 0x128   : > { %5739 = vmatpush1.bf16.msra.mxu0 %v5738_v63  ;;  %v4742_v63 = vld [vmem:[%s8306_s1 + $0x7f8] sm:$0xff] }
 0x129   : > { %5740 = vmatprep.subr.bf16.mxu0 %v6128_v3 }
 0x12a   : > { %v7356_v9 = vpop.f32.mrb[10].mxu0 }
 0x12b   : > { %v706_v10 = vpop.f32.mrb[11].mxu0 }
 0x12c   : > { %5742 = vmatpush1.bf16.msra.mxu0 %v5741_v5  ;;  %v5813_v5 = vpack.c.bf16 %v4742_v63, %v4741_v62  ;;  %v4744_v10 = vld [vmem:[%s8306_s1 + $0x808] sm:$0xff]  ;;  %v2344_v62 = vld [vmem:[#allocation2 + $0x78] sm:$0x3] }
 0x12d   : > { %5743 = vmatprep.subr.bf16.mxu0 %v6128_v3 }
 0x12e   : > { %v7365_v14 = vpop.f32.mrb[12].mxu0 }
 0x12f   : > { %v711_v15 = vpop.f32.mrb[13].mxu0 }
 0x130   : > { %5745 = vmatpush1.bf16.msra.mxu0 %v5744_v11  ;;  %v2406_v11 = vsel %vm911_vm5, %v2404_v0, %v2405_v1  ;;  %v5816_v15 = vpack.c.bf16 %v4744_v10, %v4743_v8  ;;  %v5834_v0 = vpack.c.bf16 %v4756_v53, %v4755_v52  ;;  %v2411_v8 = vrot.slane %v2344_v62, 2  ;;  %v2341_v10 = vld [vmem:[#allocation2 + $0x60] sm:$0xfc] }
 0x131   : > { %5791 = vmatprep.subr.bf16.mxu0 %v6128_v3  ;;  %v7400_v38 = vpop.f32.mrb[0].mxu1  ;;  %v2353_v52 = vld [vmem:[#allocation2 + $0xc0] sm:$0xfc] }
 0x132   : > { %v7374_v21 = vpop.f32.mrb[14].mxu0  ;;  %v1267_v41 = vpop.f32.mrb[1].mxu1  ;;  %v2425_v62 = vrot.slane %v2353_v52, 2 }
 0x133   : > { %2009 = vmatmul.mubr.f32.vlgmr.msra.gmra.mrb[64].mxu0 %v1873_v16  ;;  %v716_v22 = vpop.f32.mrb[15].mxu0  ;;  %v4752_v41 = vld [vmem:[%s8306_s1 + $0x848] sm:$0xff] }
 0x134   : > { %5793 = vmatpush1.bf16.msra.mxu0 %v5792_v17  ;;  %4682 = vmatprep.mubr.msk.f32.mxu0 %vm226_vm0, %v1876_v18  ;;  %v4745_v17 = vld [vmem:[%s8306_s1 + $0x810] sm:$0xff]  ;;  %v4746_v18 = vld [vmem:[%s8306_s1 + $0x818] sm:$0xff] }
 0x135   : > { %5794 = vmatprep.subr.bf16.mxu0 %v6128_v3  ;;  %v7410_v6 = vpop.f32.mrb[2].mxu1 }
 0x136   : > { %v1272_v47 = vpop.f32.mrb[3].mxu1 }
 0x137   : > { %2014 = vmatmul.mubr.f32.gmra.mrb[66].mxu0 %v1875_v23  ;;  %v5819_v23 = vpack.c.bf16 %v4746_v18, %v4745_v17  ;;  %v4754_v47 = vld [vmem:[%s8306_s1 + $0x858] sm:$0xff] }
 0x138   : > { %5796 = vmatpush1.bf16.msra.mxu0 %v5795_v24  ;;  %4683 = vmatprep.mubr.msk.f32.mxu0 %vm226_vm0, %v1878_v25  ;;  %v4747_v25 = vld [vmem:[%s8306_s1 + $0x820] sm:$0xff]  ;;  %v2348_v17 = vld [vmem:[#allocation2 + $0x98] sm:$0x3] }
 0x139   : > { %5797 = vmatprep.subr.bf16.mxu0 %v6128_v3  ;;  %v7420_v54 = vpop.f32.mrb[4].mxu1 }
 0x13a   : > { %v1277_v58 = vpop.f32.mrb[5].mxu1 }
 0x13b   : > { %2019 = vmatmul.mubr.f32.gmra.mrb[68].mxu0 %v1877_v28 }
 0x13c   : > { %5799 = vmatpush1.bf16.msra.mxu0 %v5798_v29  ;;  %4684 = vmatprep.mubr.msk.f32.mxu0 %vm226_vm0, %v1880_v30  ;;  %v5822_v30 = vpack.c.bf16 %v4748_v26, %v4747_v25 }
 0x13d   : > { %5800 = vmatprep.subr.bf16.mxu0 %v6128_v3  ;;  %v7430_v4 = vpop.f32.mrb[6].mxu1 }
 0x13e   : > { %v1282_v7 = vpop.f32.mrb[7].mxu1 }
 0x13f   : > { %2024 = vmatmul.mubr.f32.gmra.mrb[70].mxu0 %v1879_v33  ;;  %v4750_v33 = vld [vmem:[%s8306_s1 + $0x838] sm:$0xff] }
 0x140   : > { %5802 = vmatpush1.bf16.msra.mxu0 %v5801_v34  ;;  %4685 = vmatprep.mubr.msk.f32.mxu0 %vm226_vm0, %v1882_v35  ;;  %v5825_v37 = vpack.c.bf16 %v4750_v33, %v4749_v32  ;;  %v2350_v32 = vld [vmem:[#allocation2 + $0xa8] sm:$0xfc]  ;;  %v2352_v33 = vld [vmem:[#allocation2 + $0xb8] sm:$0x3] }
 0x141   : > { %5803 = vmatprep.subr.bf16.mxu0 %v6128_v3  ;;  %v7444_v13 = vpop.f32.mrb[8].mxu1 }
 0x142   : > { %v1287_v16 = vpop.f32.mrb[9].mxu1 }
 0x143   : > { %2029 = vmatmul.mubr.f32.gmra.mrb[72].mxu0 %v1881_v39  ;;  %v2346_v16 = vld [vmem:[#allocation2 + $0x88] sm:$0xfc] }
 0x144   : > { %5805 = vmatpush1.bf16.msra.mxu0 %v5804_v40  ;;  %4686 = vmatprep.mubr.msk.f32.mxu0 %vm226_vm0, %v1884_v42  ;;  %v4751_v40 = vld [vmem:[%s8306_s1 + $0x840] sm:$0xff]  ;;  %v2416_v26 = vrot.slane %v2346_v16, 2 }
 0x145   : > { %5806 = vmatprep.subr.bf16.mxu0 %v6128_v3  ;;  %v7457_v24 = vpop.f32.mrb[10].mxu1 }
 0x146   : > { %v1292_v27 = vpop.f32.mrb[11].mxu1 }
 0x147   : > { %2034 = vmatmul.mubr.f32.gmra.mrb[74].mxu0 %v1883_v45  ;;  %v5828_v45 = vpack.c.bf16 %v4752_v41, %v4751_v40  ;;  %v2417_v27 = vrot.slane %v2348_v17, 2  ;;  %v2349_v40 = vld [vmem:[#allocation2 + $0xa0] sm:$0xfc]  ;;  %v2351_v41 = vld [vmem:[#allocation2 + $0xb0] sm:$0x3] }
 0x148   : > { %5808 = vmatpush1.bf16.msra.mxu0 %v5807_v61  ;;  %4687 = vmatprep.mubr.msk.f32.mxu0 %vm226_vm0, %v1886_v48  ;;  %v4753_v61 = vld [vmem:[%s8306_s1 + $0x850] sm:$0xff] }
 0x149   : > { %5809 = vmatprep.subr.bf16.mxu0 %v6128_v3  ;;  %v7469_v31 = vpop.f32.mrb[12].mxu1 }
 0x14a   : > { %v1297_v34 = vpop.f32.mrb[13].mxu1 }
 0x14b   : > { %2039 = vmatmul.mubr.f32.gmra.mrb[76].mxu0 %v1885_v56  ;;  %v2337_v56 = vld [vmem:[#allocation2 + $0x40] sm:$0xfc] }
 0x14c   : > { %5811 = vmatpush1.bf16.msra.mxu0 %v5810_v57  ;;  %4688 = vmatprep.mubr.msk.f32.mxu0 %vm226_vm0, %v1888_v59  ;;  %v2339_v57 = vld [vmem:[#allocation2 + $0x50] sm:$0x3]  ;;  %v2342_v59 = vld [vmem:[#allocation2 + $0x68] sm:$0xfc]  ;;  %v2401_v1 = vrot.slane %v2337_v56, 2 }
 0x14d   : > { %5812 = vmatprep.subr.bf16.mxu0 %v6128_v3  ;;  %v7481_v39 = vpop.f32.mrb[14].mxu1  ;;  %v2410_v7 = vrot.slane %v2342_v59, 2  ;;  %v2355_v56 = vld [vmem:[#allocation2 + $0xd0] sm:$0x3] }
 0x14e   : > { %v1302_v42 = vpop.f32.mrb[15].mxu1 }
 0x14f   : > { %2044 = vmatmul.mubr.f32.gmra.mrb[78].mxu0 %v7441_v12  ;;  %v2412_v25 = vsel %vm911_vm5, %v2410_v7, %v2411_v8  ;;  %v2418_v42 = vsel %vm911_vm5, %v2416_v26, %v2417_v27  ;;  %v2357_v7 = vld [vmem:[#allocation2 + $0xe0] sm:$0xfc]  ;;  %v2359_v8 = vld [vmem:[#allocation2 + $0xf0] sm:$0x3]  ;;  %v2366_v27 = vld [vmem:[#allocation2 + $0x128] sm:$0xfc] }
 0x150   : > { %5814 = vmatpush1.bf16.msra.mxu0 %v5813_v5  ;;  %4757 = vmatprep.mubr.msk.f32.mxu0 %vm226_vm0, %v2406_v11  ;;  %v2402_v5 = vrot.slane %v2339_v57, 2  ;;  %v2343_v11 = vld [vmem:[#allocation2 + $0x70] sm:$0x3]  ;;  %v2358_v57 = vld [vmem:[#allocation2 + $0xe8] sm:$0xfc]  ;;  %v2431_v16 = vrot.slane %v2357_v7, 2 }
 0x151   : > { %5815 = vmatprep.subr.bf16.mxu0 %v6128_v3  ;;  %v2432_v17 = vrot.slane %v2359_v8, 2  ;;  %v2363_v26 = vld [vmem:[#allocation2 + $0x110] sm:$0x3] }
 0x152   : > { %v808_v19 = vpop.f32.mrb[16].mxu0 }
 0x153   : > { %v7455_v20 = vadd.f32 %v808_v19, %v7311_v46  ;;  %v810_v22 = vpop.f32.mrb[17].mxu0 }
 0x154   : > { %5817 = vmatpush1.bf16.msra.mxu0 %v5816_v15  ;;  %v2407_v22 = vrot.slane %v2341_v10, 2  ;;  %v2362_v10 = vld [vmem:[#allocation2 + $0x108] sm:$0xfc] }
 0x155   : > { %5818 = vmatprep.subr.bf16.mxu0 %v6128_v3 }
 0x156   : > { %v813_v28 = vpop.f32.mrb[18].mxu0 }
 0x157   : > { %v7467_v46 = vadd.f32 %v813_v28, %v7320_v50  ;;  %v815_v29 = vpop.f32.mrb[19].mxu0  ;;  %v2345_v28 = vld [vmem:[#allocation2 + $0x80] sm:$0xfc] }
 0x158   : > { %5820 = vmatpush1.bf16.msra.mxu0 %v5819_v23  ;;  %v2408_v23 = vrot.slane %v2343_v11, 2  ;;  %v2347_v29 = vld [vmem:[#allocation2 + $0x90] sm:$0x3]  ;;  %v2364_v11 = vld [vmem:[#allocation2 + $0x118] sm:$0x3] }
 0x159   : > { %5821 = vmatprep.subr.bf16.mxu0 %v6128_v3 }
 0x15a   : > { %v818_v35 = vpop.f32.mrb[20].mxu0 }
 0x15b   : > { %v7479_v50 = vadd.f32 %v818_v35, %v7329_v55  ;;  %v820_v36 = vpop.f32.mrb[21].mxu0  ;;  %v2409_v35 = vsel %vm911_vm5, %v2407_v22, %v2408_v23 }
 0x15c   : > { %5823 = vmatpush1.bf16.msra.mxu0 %v5822_v30  ;;  %v2413_v36 = vrot.slane %v2345_v28, 2 }
 0x15d   : > { %5824 = vmatprep.subr.bf16.mxu0 %v6128_v3 }
 0x15e   : > { %v823_v43 = vpop.f32.mrb[22].mxu0 }
 0x15f   : > { %v7491_v55 = vadd.f32 %v823_v43, %v7338_v60  ;;  %v825_v44 = vpop.f32.mrb[23].mxu0  ;;  %v5831_v60 = vpack.c.bf16 %v4754_v47, %v4753_v61  ;;  %v2422_v43 = vrot.slane %v2350_v32, 2  ;;  %v2356_v61 = vld [vmem:[#allocation2 + $0xd8] sm:$0x3]  ;;  %v2419_v47 = vrot.slane %v2349_v40, 2 }
 0x160   : > { %5826 = vmatpush1.bf16.msra.mxu0 %v5825_v37  ;;  %v2414_v37 = vrot.slane %v2347_v29, 2  ;;  %v2423_v44 = vrot.slane %v2352_v33, 2  ;;  %v2368_v29 = vld [vmem:[#allocation2 + $0x138] sm:$0x3]  ;;  %v2438_v33 = vrot.slane %v2363_v26, 2 }
 0x161   : > { %5827 = vmatprep.subr.bf16.mxu0 %v6128_v3  ;;  %v2365_v40 = vld [vmem:[#allocation2 + $0x120] sm:$0xfc] }
 0x162   : > { %v828_v48 = vpop.f32.mrb[24].mxu0  ;;  %v2424_v53 = vsel %vm911_vm5, %v2422_v43, %v2423_v44  ;;  %v2443_v44 = vrot.slane %v2365_v40, 2 }
 0x163   : > { %v7501_v49 = vadd.f32 %v828_v48, %v7347_v2  ;;  %v830_v51 = vpop.f32.mrb[25].mxu0  ;;  %v2415_v48 = vsel %vm911_vm5, %v2413_v36, %v2414_v37  ;;  %v2447_v37 = vrot.slane %v2368_v29, 2 }
 0x164   : > { %5829 = vmatpush1.bf16.msra.mxu0 %v5828_v45  ;;  %v2354_v45 = vld [vmem:[#allocation2 + $0xc8] sm:$0xfc] }
 0x165   : > { %5830 = vmatprep.subr.bf16.mxu0 %v6128_v3  ;;  %v2428_v51 = vrot.slane %v2354_v45, 2 }
 0x166   : > { %v833_v58 = vpop.f32.mrb[26].mxu0 }
 0x167   : > { %v7511_v2 = vadd.f32 %v833_v58, %v7356_v9  ;;  %v835_v63 = vpop.f32.mrb[27].mxu0  ;;  %v2403_v9 = vsel %vm911_vm5, %v2401_v1, %v2402_v5  ;;  %v2360_v58 = vld [vmem:[#allocation2 + $0xf8] sm:$0x3] }
 0x168   : > { %5832 = vmatpush1.bf16.msra.mxu0 %v5831_v60  ;;  %v2429_v60 = vrot.slane %v2356_v61, 2  ;;  %v2426_v63 = vrot.slane %v2355_v56, 2  ;;  %v2435_v1 = vrot.slane %v2360_v58, 2 }
 0x169   : > { %5833 = vmatprep.subr.bf16.mxu0 %v6128_v3 }
 0x16a   : > { %v838_v15 = vpop.f32.mrb[28].mxu0  ;;  %v2430_v5 = vsel %vm911_vm5, %v2428_v51, %v2429_v60 }
 0x16b   : > { %v7515_v18 = vadd.f32 %v838_v15, %v7365_v14  ;;  %v840_v19 = vpop.f32.mrb[29].mxu0  ;;  %v2427_v15 = vsel %vm911_vm5, %v2425_v62, %v2426_v63 }
 0x16c   : > { %5835 = vmatpush1.bf16.msra.mxu0 %v5834_v0  ;;  %v2434_v0 = vrot.slane %v2358_v57, 2  ;;  %v2440_v19 = vrot.slane %v2362_v10, 2 }
 0x16d   : > { %6028 = vmatprep.subr.bf16.mxu0 %v6128_v3 }
 0x16e   : > { %v843_v30 = vpop.f32.mrb[30].mxu0  ;;  %v2436_v23 = vsel %vm911_vm5, %v2434_v0, %v2435_v1 }
 0x16f   : > { %v7521_v14 = vadd.f32 %v843_v30, %v7374_v21  ;;  %2569 = vmatmul.mubr.f32.vlgmr.msra.gmra.mrb[80].mxu0 %v2403_v9  ;;  %v845_v34 = vpop.f32.mrb[31].mxu0  ;;  %v2420_v21 = vrot.slane %v2351_v41, 2  ;;  %v2361_v9 = vld [vmem:[#allocation2 + $0x100] sm:$0xfc]  ;;  %v2433_v30 = vsel %vm911_vm5, %v2431_v16, %v2432_v17  ;;  %v2367_v41 = vld [vmem:[#allocation2 + $0x130] sm:$0x3] }
 0x170   : > { %4758 = vmatprep.mubr.msk.f32.mxu0 %vm226_vm0, %v2412_v25  ;;  %v2441_v25 = vrot.slane %v2364_v11, 2  ;;  %v2437_v32 = vrot.slane %v2361_v9, 2  ;;  %v2446_v34 = vrot.slane %v2366_v27, 2  ;;  %v2444_v45 = vrot.slane %v2367_v41, 2 }
 0x171   : > { %v2421_v59 = vsel %vm911_vm5, %v2419_v47, %v2420_v21 }
 0x172   : > { %v2442_v36 = vsel %vm911_vm5, %v2440_v19, %v2441_v25  ;;  %v2439_v43 = vsel %vm911_vm5, %v2437_v32, %v2438_v33  ;;  %v2448_v47 = vsel %vm911_vm5, %v2446_v34, %v2447_v37 }
 0x173   : > { %2574 = vmatmul.mubr.f32.gmra.mrb[82].mxu0 %v2409_v35 }
 0x174   : > { %4759 = vmatprep.mubr.msk.f32.mxu0 %vm226_vm0, %v2418_v42 }
 0x177   : > { %2579 = vmatmul.mubr.f32.gmra.mrb[84].mxu0 %v2415_v48  ;;  %v2445_v48 = vsel %vm911_vm5, %v2443_v44, %v2444_v45 }
 0x178   : > { %4760 = vmatprep.mubr.msk.f32.mxu0 %vm226_vm0, %v2424_v53  ;;  %v7534_v22 = vpop.f32.mrb[16].mxu1 }
 0x179   : > { %v1827_v28 = vpop.f32.mrb[17].mxu1 }
 0x17b   : > { %2584 = vmatmul.mubr.f32.gmra.mrb[86].mxu0 %v2421_v59 }
 0x17c   : > { %4761 = vmatprep.mubr.msk.f32.mxu0 %vm226_vm0, %v2430_v5  ;;  %v7539_v35 = vpop.f32.mrb[18].mxu1 }
 0x17d   : > { %v1832_v42 = vpop.f32.mrb[19].mxu1 }
 0x17f   : > { %2589 = vmatmul.mubr.f32.gmra.mrb[88].mxu0 %v2427_v15 }
 0x180   : > { %4762 = vmatprep.mubr.msk.f32.mxu0 %vm226_vm0, %v2436_v23  ;;  %v7544_v61 = vpop.f32.mrb[20].mxu1 }
 0x181   : > { %v1837_v21 = vpop.f32.mrb[21].mxu1 }
 0x183   : > { %2594 = vmatmul.mubr.f32.gmra.mrb[90].mxu0 %v2433_v30 }
 0x184   : > { %4763 = vmatprep.mubr.msk.f32.mxu0 %vm226_vm0, %v2442_v36  ;;  %v7549_v51 = vpop.f32.mrb[22].mxu1 }
 0x185   : > { %v1842_v60 = vpop.f32.mrb[23].mxu1 }
 0x187   : > { %2599 = vmatmul.mubr.f32.gmra.mrb[92].mxu0 %v2439_v43 }
 0x188   : > { %4764 = vmatprep.mubr.msk.f32.mxu0 %vm226_vm0, %v2448_v47  ;;  %v7551_v52 = vpop.f32.mrb[24].mxu1 }
 0x189   : > { %v1847_v53 = vpop.f32.mrb[25].mxu1 }
 0x18b   : > { %2604 = vmatmul.mubr.f32.gmra.mrb[94].mxu0 %v2445_v48 }
 0x18c   : > { %v7554_v59 = vpop.f32.mrb[26].mxu1  ;;  %5428 = vmatprep.mubr.msk.f32.mxu0 %vm6130_vm6, %v7441_v12 }
 0x18d   : > { %v1852_v63 = vpop.f32.mrb[27].mxu1 }
 0x18e   : > { %v1081_v56 = vpop.f32.mrb[32].mxu0 }
 0x18f   : > { %v1120_v57 = vadd.f32 %v1081_v56, %v7455_v20  ;;  %v1083_v58 = vpop.f32.mrb[33].mxu0 }
 0x190   : > { %v7558_v7 = vpop.f32.mrb[28].mxu1 }
 0x191   : > { %v1304_v62 = vadd.f32 %v7400_v38, %v1120_v57  ;;  %v1857_v10 = vpop.f32.mrb[29].mxu1 }
 0x192   : > { %v1086_v0 = vpop.f32.mrb[34].mxu0 }
 0x193   : > { %v1121_v1 = vadd.f32 %v1086_v0, %v7467_v46  ;;  %v1088_v5 = vpop.f32.mrb[35].mxu0 }
 0x194   : > { %v7562_v20 = vpop.f32.mrb[30].mxu1 }
 0x195   : > { %v1305_v8 = vadd.f32 %v7410_v6, %v1121_v1  ;;  %v1862_v19 = vpop.f32.mrb[31].mxu1 }
 0x196   : > { %v1091_v11 = vpop.f32.mrb[36].mxu0 }
 0x197   : > { %v1122_v15 = vadd.f32 %v1091_v11, %v7479_v50  ;;  %v1093_v16 = vpop.f32.mrb[37].mxu0 }
 0x199   : > { %v1306_v17 = vadd.f32 %v7420_v54, %v1122_v15 }
 0x19a   : > { %v1096_v38 = vpop.f32.mrb[38].mxu0 }
 0x19b   : > { %v1123_v9 = vadd.f32 %v1096_v38, %v7491_v55  ;;  %v1098_v23 = vpop.f32.mrb[39].mxu0 }
 0x19d   : > { %v1307_v46 = vadd.f32 %v7430_v4, %v1123_v9 }
 0x19e   : > { %v1101_v25 = vpop.f32.mrb[40].mxu0 }
 0x19f   : > { %v1124_v26 = vadd.f32 %v1101_v25, %v7501_v49  ;;  %v1103_v6 = vpop.f32.mrb[41].mxu0 }
 0x1a1   : > { %v1308_v27 = vadd.f32 %v7444_v13, %v1124_v26 }
 0x1a2   : > { %v1106_v28 = vpop.f32.mrb[42].mxu0 }
 0x1a3   : > { %v1125_v50 = vadd.f32 %v1106_v28, %v7511_v2  ;;  %v1108_v29 = vpop.f32.mrb[43].mxu0 }
 0x1a5   : > { %v1309_v30 = vadd.f32 %v7457_v24, %v1125_v50 }
 0x1a6   : > { %v1111_v54 = vpop.f32.mrb[44].mxu0 }
 0x1a7   : > { %v1126_v32 = vadd.f32 %v1111_v54, %v7515_v18  ;;  %v1113_v33 = vpop.f32.mrb[45].mxu0  ;;  %v391_v54 = vld [vmem:[%s8309_s4 + $0x18] sm:$0xff] }
 0x1a9   : > { %v1310_v55 = vadd.f32 %v7469_v31, %v1126_v32 }
 0x1aa   : > { %v1116_v34 = vpop.f32.mrb[46].mxu0 }
 0x1ab   : > { %v1127_v4 = vadd.f32 %v1116_v34, %v7521_v14  ;;  %v1118_v36 = vpop.f32.mrb[47].mxu0  ;;  %v395_v34 = vld [vmem:[%s8309_s4 + $0x38] sm:$0xff] }
 0x1ad   : > { %v1311_v49 = vadd.f32 %v7481_v39, %v1127_v4 }
 0x1b4   : > { %v7575_v37 = vpop.f32.mrb[32].mxu1 }
 0x1b5   : > { %v2292_v13 = vpop.f32.mrb[33].mxu1 }
 0x1b8   : > { %v7577_v40 = vpop.f32.mrb[34].mxu1 }
 0x1b9   : > { %v2297_v2 = vpop.f32.mrb[35].mxu1 }
 0x1bc   : > { %v7579_v41 = vpop.f32.mrb[36].mxu1 }
 0x1bd   : > { %v2302_v24 = vpop.f32.mrb[37].mxu1 }
 0x1c0   : > { %v7581_v42 = vpop.f32.mrb[38].mxu1 }
 0x1c1   : > { %v2307_v18 = vpop.f32.mrb[39].mxu1 }
 0x1c4   : > { %v7583_v43 = vpop.f32.mrb[40].mxu1 }
 0x1c5   : > { %v2312_v31 = vpop.f32.mrb[41].mxu1 }
 0x1c8   : > { %v7585_v47 = vpop.f32.mrb[42].mxu1 }
 0x1c9   : > { %v2317_v21 = vpop.f32.mrb[43].mxu1 }
 0x1ca   : > { %v1545_v44 = vpop.f32.mrb[48].mxu0 }
 0x1cb   : > { %v1584_v14 = vadd.f32 %v1545_v44, %v1304_v62  ;;  %v1547_v45 = vpop.f32.mrb[49].mxu0 }
 0x1cc   : > { %v7590_v56 = vpop.f32.mrb[44].mxu1 }
 0x1cd   : > { %v7588_v39 = vadd.f32 %v7534_v22, %v1584_v14  ;;  %v2322_v58 = vpop.f32.mrb[45].mxu1 }
 0x1ce   : > { %v1550_v48 = vpop.f32.mrb[50].mxu0 }
 0x1cf   : > { %v1585_v60 = vadd.f32 %v1550_v48, %v1305_v8  ;;  %v1552_v53 = vpop.f32.mrb[51].mxu0 }
 0x1d0   : > { %v7593_v5 = vpop.f32.mrb[46].mxu1 }
 0x1d1   : > { %v1865_v57 = vadd.f32 %v7539_v35, %v1585_v60  ;;  %v2327_v10 = vpop.f32.mrb[47].mxu1 }
 0x1d2   : > { %v1555_v63 = vpop.f32.mrb[52].mxu0 }
 0x1d3   : > { %v1586_v0 = vadd.f32 %v1555_v63, %v1306_v17  ;;  %v1557_v1 = vpop.f32.mrb[53].mxu0  ;;  %v388_v17 = vld [vmem:[%s8309_s4] sm:$0xff] }
 0x1d5   : > { %v1866_v62 = vadd.f32 %v7544_v61, %v1586_v0  ;;  %v389_v61 = vld [vmem:[%s8309_s4 + $0x8] sm:$0xff] }
 0x1d6   : > { %v1560_v11 = vpop.f32.mrb[54].mxu0  ;;  %v5837_v26 = vpack.c.bf16 %v389_v61, %v388_v17 }
 0x1d7   : > { %v1587_v22 = vadd.f32 %v1560_v11, %v1307_v46  ;;  %v1562_v15 = vpop.f32.mrb[55].mxu0 }
 0x1d8   : > { %5838 = vmatpush3.bf16.msra.mxu1 %v5837_v26  ;;  %6030 = vmatpush3.bf16.msra.mxu0 %v5837_v26 }
 0x1d9   : > { %v1867_v16 = vadd.f32 %v7549_v51, %v1587_v22  ;;  %5839 = vmatprep.subr.bf16.mxu1 %v6128_v3  ;;  %6031 = vmatprep.subr.bf16.mxu0 %v6128_v3 }
 0x1da   : > { %v1565_v8 = vpop.f32.mrb[56].mxu0 }
 0x1db   : > { %v1588_v19 = vadd.f32 %v1565_v8, %v1308_v27  ;;  %v1567_v38 = vpop.f32.mrb[57].mxu0 }
 0x1dd   : > { %v1868_v9 = vadd.f32 %v7551_v52, %v1588_v19 }
 0x1de   : > { %v1570_v35 = vpop.f32.mrb[58].mxu0 }
 0x1df   : > { %v1589_v23 = vadd.f32 %v1570_v35, %v1309_v30  ;;  %v1572_v25 = vpop.f32.mrb[59].mxu0 }
 0x1e1   : > { %v1869_v46 = vadd.f32 %v7554_v59, %v1589_v23  ;;  %v390_v59 = vld [vmem:[%s8309_s4 + $0x10] sm:$0xff] }
 0x1e2   : > { %v1575_v51 = vpop.f32.mrb[60].mxu0  ;;  %v5840_v32 = vpack.c.bf16 %v391_v54, %v390_v59 }
 0x1e3   : > { %v1590_v6 = vadd.f32 %v1575_v51, %v1310_v55  ;;  %v1577_v27 = vpop.f32.mrb[61].mxu0  ;;  %v394_v55 = vld [vmem:[%s8309_s4 + $0x30] sm:$0xff] }
 0x1e4   : > { %5841 = vmatpush3.bf16.msra.mxu1 %v5840_v32  ;;  %6033 = vmatpush3.bf16.msra.mxu0 %v5840_v32  ;;  %v5846_v4 = vpack.c.bf16 %v395_v34, %v394_v55 }
 0x1e5   : > { %v1870_v52 = vadd.f32 %v7558_v7, %v1590_v6  ;;  %5842 = vmatprep.subr.bf16.mxu1 %v6128_v3  ;;  %v392_v7 = vld [vmem:[%s8309_s4 + $0x20] sm:$0xff]  ;;  %6034 = vmatprep.subr.bf16.mxu0 %v6128_v3 }
 0x1e6   : > { %v1580_v28 = vpop.f32.mrb[62].mxu0 }
 0x1e7   : > { %v1591_v50 = vadd.f32 %v1580_v28, %v1311_v49  ;;  %v1582_v29 = vpop.f32.mrb[63].mxu0 }
 0x1e9   : > { %v1871_v30 = vadd.f32 %v7562_v20, %v1591_v50  ;;  %v393_v20 = vld [vmem:[%s8309_s4 + $0x28] sm:$0xff] }
 0x1ea   : > { %v5843_v33 = vpack.c.bf16 %v393_v20, %v392_v7 }
 0x1ec   : > { %5844 = vmatpush3.bf16.msra.mxu1 %v5843_v33  ;;  %6036 = vmatpush3.bf16.msra.mxu0 %v5843_v33 }
 0x1ed   : > { %5845 = vmatprep.subr.bf16.mxu1 %v6128_v3  ;;  %6037 = vmatprep.subr.bf16.mxu0 %v6128_v3 }
 0x1f0   : > { %5847 = vmatpush3.bf16.msra.mxu1 %v5846_v4  ;;  %6039 = vmatpush3.bf16.msra.mxu0 %v5846_v4 }
 0x206   : > { %v2010_v36 = vpop.f32.mrb[64].mxu0 }
 0x207   : > { %v2049_v49 = vadd.f32 %v2010_v36, %v7588_v39  ;;  %v2012_v13 = vpop.f32.mrb[65].mxu0 }
 0x209   : > { %v2329_v2 = vadd.f32 %v7575_v37, %v2049_v49 }
 0x20a   : > { %v2015_v24 = vpop.f32.mrb[66].mxu0 }
 0x20b   : > { %v2050_v18 = vadd.f32 %v2015_v24, %v1865_v57  ;;  %v2017_v31 = vpop.f32.mrb[67].mxu0 }
 0x20d   : > { %v2330_v44 = vadd.f32 %v7577_v40, %v2050_v18 }
 0x20e   : > { %v2020_v14 = vpop.f32.mrb[68].mxu0 }
 0x20f   : > { %v2051_v45 = vadd.f32 %v2020_v14, %v1866_v62  ;;  %v2022_v21 = vpop.f32.mrb[69].mxu0 }
 0x211   : > { %v2331_v3 = vadd.f32 %v7579_v41, %v2051_v45 }
 0x212   : > { %v2025_v48 = vpop.f32.mrb[70].mxu0 }
 0x213   : > { %v2052_v60 = vadd.f32 %v2025_v48, %v1867_v16  ;;  %v2027_v53 = vpop.f32.mrb[71].mxu0 }
 0x215   : > { %v2332_v58 = vadd.f32 %v7581_v42, %v2052_v60 }
 0x216   : > { %v2030_v63 = vpop.f32.mrb[72].mxu0 }
 0x217   : > { %v2053_v39 = vadd.f32 %v2030_v63, %v1868_v9  ;;  %v2032_v0 = vpop.f32.mrb[73].mxu0 }
 0x219   : > { %v2333_v37 = vadd.f32 %v7583_v43, %v2053_v39 }
 0x21a   : > { %v2035_v1 = vpop.f32.mrb[74].mxu0 }
 0x21b   : > { %v2054_v57 = vadd.f32 %v2035_v1, %v1869_v46  ;;  %v2037_v10 = vpop.f32.mrb[75].mxu0 }
 0x21d   : > { %v2334_v40 = vadd.f32 %v7585_v47, %v2054_v57  ;;  %v4765_v47 = vld [vmem:[%s8308_s3] ss:$0 sm:$0xff] }
 0x21e   : > { %v2040_v11 = vpop.f32.mrb[76].mxu0 }
 0x21f   : > { %v2055_v62 = vadd.f32 %v2040_v11, %v1870_v52  ;;  %v2042_v22 = vpop.f32.mrb[77].mxu0 }
 0x221   : > { %v2335_v41 = vadd.f32 %v7590_v56, %v2055_v62 }
 0x222   : > { %v2045_v15 = vpop.f32.mrb[78].mxu0 }
 0x223   : > { %v2056_v16 = vadd.f32 %v2045_v15, %v1871_v30  ;;  %v2047_v8 = vpop.f32.mrb[79].mxu0 }
 0x225   : > { %v2336_v42 = vadd.f32 %v7593_v5, %v2056_v16 }
 0x242   : > { %v2570_v19 = vpop.f32.mrb[80].mxu0 }
 0x243   : > { %v2609_v38 = vadd.f32 %v2570_v19, %v2329_v2  ;;  %v2572_v9 = vpop.f32.mrb[81].mxu0 }
 0x245   : > { %v2621_v56 = vadd.f32 %v4765_v47, %v2609_v38 }
 0x246   : > { %v2575_v35 = vpop.f32.mrb[82].mxu0 }
 0x247   : > { %v2610_v43 = vadd.f32 %v2575_v35, %v2330_v44  ;;  %v2577_v23 = vpop.f32.mrb[83].mxu0  ;;  %v7647_v28 = vmax.f32 %v2621_v56, 0.0 }
 0x249   : > { %v2622_v46 = vadd.f32 %v4765_v47, %v2610_v43  ;;  %v2659_v20 = vmul.f32 %v7647_v28, %v7647_v28  ;;  %v2638_v13 = vsel %vm2637_vm7, %v7647_v28, 0.0 }
 0x24a   : > { %v2580_v25 = vpop.f32.mrb[84].mxu0 }
 0x24b   : > { %v2611_v17 = vadd.f32 %v2580_v25, %v2331_v3  ;;  %v2582_v61 = vpop.f32.mrb[85].mxu0  ;;  %v7645_v5 = vmax.f32 %v2622_v46, 0.0  ;;  %v2667_v44 = vsel %vm2637_vm7, %v2659_v20, 0.0 }
 0x24d   : > { %v2623_v26 = vadd.f32 %v4765_v47, %v2611_v17  ;;  %v2660_v54 = vmul.f32 %v7645_v5, %v7645_v5  ;;  %v2639_v34 = vsel %vm2637_vm7, %v7645_v5, 0.0 }
 0x24e   : > { %v2585_v51 = vpop.f32.mrb[86].mxu0  ;;  %v2640_v14 = vadd.f32 %v2639_v34, %v2638_v13 }
 0x24f   : > { %v2612_v6 = vadd.f32 %v2585_v51, %v2332_v58  ;;  %v2587_v27 = vpop.f32.mrb[87].mxu0  ;;  %v7649_v50 = vmax.f32 %v2623_v26, 0.0  ;;  %v2668_v2 = vsel %vm2637_vm7, %v2660_v54, 0.0 }
 0x250   : > { %v2669_v63 = vadd.f32 %v2668_v2, %v2667_v44  ;;  %v4767_v2 = vld [vmem:[%s8307_s2 + $0x50] sm:$0xff]  ;;  %v4770_v44 = vld [vmem:[%s8307_s2 + $0x68] sm:$0xff] }
 0x251   : > { %v2624_v52 = vadd.f32 %v4765_v47, %v2612_v6  ;;  %v2661_v33 = vmul.f32 %v7649_v50, %v7649_v50  ;;  %v2641_v24 = vsel %vm2637_vm7, %v7649_v50, 0.0 }
 0x252   : > { %v2590_v29 = vpop.f32.mrb[88].mxu0  ;;  %v2642_v39 = vadd.f32 %v2641_v24, %v2640_v14  ;;  %v4768_v24 = vld [vmem:[%s8307_s2 + $0x58] sm:$0xff] }
 0x253   : > { %v2613_v30 = vadd.f32 %v2590_v29, %v2333_v37  ;;  %v2592_v59 = vpop.f32.mrb[89].mxu0  ;;  %v7653_v32 = vmax.f32 %v2624_v52, 0.0  ;;  %v2670_v45 = vsel %vm2637_vm7, %v2661_v33, 0.0 }
 0x254   : > { %v2671_v10 = vadd.f32 %v2670_v45, %v2669_v63  ;;  %v4771_v45 = vld [vmem:[%s8307_s2 + $0x70] sm:$0xff] }
 0x255   : > { %v2625_v7 = vadd.f32 %v4765_v47, %v2613_v30  ;;  %v2662_v18 = vmul.f32 %v7653_v32, %v7653_v32  ;;  %v2643_v3 = vsel %vm2637_vm7, %v7653_v32, 0.0  ;;  %v4775_v63 = vld [vmem:[%s8307_s2 + $0x90] sm:$0xff] }
 0x256   : > { %v2595_v55 = vpop.f32.mrb[90].mxu0 }
 0x257   : > { %v7661_v4 = vmax.f32 %v2625_v7, 0.0  ;;  %v2614_v36 = vadd.f32 %v2595_v55, %v2334_v40  ;;  %v2597_v49 = vpop.f32.mrb[91].mxu0  ;;  %v2672_v0 = vsel %vm2637_vm7, %v2662_v18, 0.0  ;;  %v2644_v40 = vadd.f32 %v2643_v3, %v2642_v39  ;;  %v4776_v39 = vld [vmem:[%s8307_s2 + $0x98] sm:$0xff] }
 0x258   : > { %v2673_v8 = vadd.f32 %v2672_v0, %v2671_v10  ;;  %v5848_v18 = vpack.c.bf16 %v4768_v24, %v4767_v2  ;;  %v5864_v0 = vpack.c.bf16 %v4776_v39, %v4775_v63  ;;  %v2830_v10 = vld [vmem:[#allocation3 + $0x1] sm:$0xff]  ;;  %v4795_v63 = vld [vmem:[%s8307_s2 + $0xb0] sm:$0xff]  ;;  %v4796_v39 = vld [vmem:[%s8307_s2 + $0xb8] sm:$0xff] }
 0x259   : > { %v2626_v31 = vadd.f32 %v4765_v47, %v2614_v36  ;;  %v2663_v48 = vmul.f32 %v7661_v4, %v7661_v4  ;;  %v2645_v37 = vsel %vm2637_vm7, %v7661_v4, 0.0 }
 0x25a   : > { %v2600_v21 = vpop.f32.mrb[92].mxu0  ;;  %v2646_v19 = vadd.f32 %v2645_v37, %v2644_v40  ;;  %5849 = vmatprep.subr.bf16.mxu1 %v5848_v18  ;;  %v2820_v37 = vld [vmem:[%s8307_s2] sm:$0xff] }
 0x25b   : > { %v7676_v60 = vmax.f32 %v2626_v31, 0.0  ;;  %v2615_v53 = vadd.f32 %v2600_v21, %v2335_v41  ;;  %v2602_v58 = vpop.f32.mrb[93].mxu0  ;;  %v2674_v62 = vsel %vm2637_vm7, %v2663_v48, 0.0  ;;  %v4769_v31 = vld [vmem:[%s8307_s2 + $0x60] sm:$0xff]  ;;  %v4772_v21 = vld [vmem:[%s8307_s2 + $0x78] sm:$0xff] }
 0x25c   : > { %v2675_v23 = vadd.f32 %v2674_v62, %v2673_v8  ;;  %v5852_v14 = vpack.c.bf16 %v4770_v44, %v4769_v31  ;;  %v5856_v3 = vpack.c.bf16 %v4772_v21, %v4771_v45  ;;  %v4773_v48 = vld [vmem:[%s8307_s2 + $0x80] sm:$0xff]  ;;  %v2829_v44 = vld [vmem:[%s8307_s2 + $0x48] sm:$0xff] }
 0x25d   : > { %v2664_v1 = vmul.f32 %v7676_v60, %v7676_v60  ;;  %v2627_v57 = vadd.f32 %v4765_v47, %v2615_v53  ;;  %v2647_v22 = vsel %vm2637_vm7, %v7676_v60, 0.0  ;;  %v4774_v53 = vld [vmem:[%s8307_s2 + $0x88] sm:$0xff]  ;;  %v2828_v31 = vld [vmem:[%s8307_s2 + $0x40] sm:$0xff] }
 0x25e   : > { %v2605_v11 = vpop.f32.mrb[94].mxu0  ;;  %v2648_v25 = vadd.f32 %v2647_v22, %v2646_v19  ;;  %v5860_v58 = vpack.c.bf16 %v4774_v53, %v4773_v48  ;;  %v5884_v45 = vpack.c.bf16 %v2829_v44, %v2828_v31  ;;  %v2812_v21 = vld [vmem:[#allocation3] sm:$0xff]  ;;  %v4794_v53 = vld [vmem:[%s8307_s2 + $0xa8] sm:$0xff] }
 0x25f   : > { %v7686_v41 = vmax.f32 %v2627_v57, 0.0  ;;  %v2616_v15 = vadd.f32 %v2605_v11, %v2336_v42  ;;  %v2607_v16 = vpop.f32.mrb[95].mxu0  ;;  %v2676_v38 = vsel %vm2637_vm7, %v2664_v1, 0.0  ;;  %v2821_v1 = vld [vmem:[%s8307_s2 + $0x8] sm:$0xff]  ;;  %v4793_v48 = vld [vmem:[%s8307_s2 + $0xa0] sm:$0xff] }
 0x260   : > { %v2677_v46 = vadd.f32 %v2676_v38, %v2675_v23  ;;  %v5868_v57 = vpack.c.bf16 %v2821_v1, %v2820_v37  ;;  %v2776_v16 = vlaneseq  ;;  %v397_v38 = vld [vmem:[%s8308_s3 + $0x1] sm:$0x1]  ;;  %v398_v23 = vld [vmem:[%s8308_s3 + $0x2] sm:$0x1]  ;;  %v4834_v31 = vld [vmem:[%s8307_s2 + $0x168] sm:$0xff] }
 0x261   : > { %v2649_v9 = vsel %vm2637_vm7, %v7686_v41, 0.0  ;;  %v2665_v35 = vmul.f32 %v7686_v41, %v7686_v41  ;;  %v2628_v43 = vadd.f32 %v4765_v47, %v2616_v15  ;;  %v4797_v1 = vld [vmem:[%s8307_s2 + $0xc0] sm:$0xff] }
 0x262   : > { %v2650_v42 = vadd.f32 %v2649_v9, %v2648_v25  ;;  %v2777_v8 = vshrl.u32 %v2776_v16, 7 }
 0x263   : > { %v2678_v17 = vsel %vm2637_vm7, %v2665_v35, 0.0  ;;  %v7694_v61 = vmax.f32 %v2628_v43, 0.0 }
 0x264   : > { %v2679_v51 = vadd.f32 %v2678_v17, %v2677_v46  ;;  %v7783_v35 = vsub.s32 0, %v2777_v8  ;;  %v4801_v8 = vld [vmem:[%s8307_s2 + $0xe0] sm:$0xff] }
 0x265   : > { %v2651_v56 = vsel %vm2637_vm7, %v7694_v61, 0.0  ;;  %v2666_v26 = vmul.f32 %v7694_v61, %v7694_v61 }
 0x266   : > { %v2652_v6 = vadd.f32 %v2651_v56, %v2650_v42 }
 0x267   : > { %v2680_v27 = vsel %vm2637_vm7, %v2666_v26, 0.0 }
 0x268   : > { %v2653_v52 = vrot.slane %v2652_v6, 4  ;;  %v2681_v47 = vadd.f32 %v2680_v27, %v2679_v51 }
 0x26a   : > { %v2654_v29 = vadd.f32 %v2653_v52, %v2652_v6  ;;  %v2682_v30 = vrot.slane %v2681_v47, 4 }
 0x26c   : > { %v2655_v59 = vrot.slane %v2654_v29, 2  ;;  %v2683_v54 = vadd.f32 %v2682_v30, %v2681_v47 }
 0x26e   : > { %v2656_v7 = vadd.f32 %v2655_v59, %v2654_v29  ;;  %v2684_v20 = vrot.slane %v2683_v54, 2 }
 0x270   : > { %v2657_v33 = vrot.slane %v2656_v7, 1  ;;  %v2685_v55 = vadd.f32 %v2684_v20, %v2683_v54 }
 0x272   : > { %v2686_v34 = vrot.slane %v2685_v55, 1  ;;  %v2658_v36 = vadd.f32 %v2657_v33, %v2656_v7 }
 0x274   : > { %v2687_v49 = vadd.f32 %v2686_v34, %v2685_v55  ;;  %v2825_v55 = vld [vmem:[%s8307_s2 + $0x28] sm:$0xff] }
 0x276   : > { %v2689_v13 = vsel %vm2688_vm8, %v2658_v36, %v2687_v49  ;;  %v2826_v49 = vld [vmem:[%s8307_s2 + $0x30] sm:$0xff] }
 0x277   : > { %5122 = vmatmul.mubr.msk.f32.vlgmr.msra.gmra.mrb[48].mxu1 %vm2637_vm7, %v2689_v13  ;;  %v2827_v13 = vld [vmem:[%s8307_s2 + $0x38] sm:$0xff] }
 0x278   : > { %5851 = vmatpush3.bf16.msra.mxu1 %v5848_v18  ;;  %5144 = vmatprep.mubr.msk.f32.mxu1 %vm267_vm9, %v2830_v10  ;;  %v5880_v24 = vpack.c.bf16 %v2827_v13, %v2826_v49  ;;  %v4832_v49 = vld [vmem:[%s8307_s2 + $0x158] sm:$0xff] }
 0x279   : > { %5853 = vmatprep.subr.bf16.mxu1 %v5852_v14 }
 0x27c   : > { %5855 = vmatpush3.bf16.msra.mxu1 %v5852_v14 }
 0x27d   : > { %5857 = vmatprep.subr.bf16.mxu1 %v5856_v3 }
 0x280   : > { %5859 = vmatpush3.bf16.msra.mxu1 %v5856_v3 }
 0x281   : > { %5861 = vmatprep.subr.bf16.mxu1 %v5860_v58 }
 0x284   : > { %5863 = vmatpush3.bf16.msra.mxu1 %v5860_v58  ;;  %v5888_v58 = vpack.c.bf16 %v4794_v53, %v4793_v48  ;;  %v4837_v53 = vld [vmem:[%s8307_s2 + $0x180] sm:$0xff] }
 0x285   : > { %5865 = vmatprep.subr.bf16.mxu1 %v5864_v0 }
 0x288   : > { %5867 = vmatpush3.bf16.msra.mxu1 %v5864_v0  ;;  %v5892_v0 = vpack.c.bf16 %v4796_v39, %v4795_v63 }
 0x289   : > { %5869 = vmatprep.subr.bf16.mxu1 %v5868_v57 }
 0x34a   : > { %v2759_v40 = vpop.f32.mrb[48].mxu1 }
 0x34b   : > { %v2763_v11 = vmul.f32 %v2759_v40, %v2759_v40  ;;  %v5123_v12 = vpop.f32.mrb[49].mxu1 }
 0x34c   : > { %v4799_v12 = vld [vmem:[%s8307_s2 + $0xd0] sm:$0xff] }
 0x34d   : > { %v2765_v62 = vrot.slane %v2763_v11, 7 }
 0x34f   : > { %v2767_v22 = vsub.f32 %v2759_v40, %v2765_v62  ;;  %v4800_v62 = vld [vmem:[%s8307_s2 + $0xd8] sm:$0xff] }
 0x351   : > { %v2768_v15 = vadd.f32 1e-05, %v2767_v22 }
 0x353   : > { %6115 = vrsqrt.f32 %v2768_v15  ;;  %v5900_v15 = vpack.c.bf16 %v4800_v62, %v4799_v12  ;;  %v4851_v62 = vld [vmem:[%s8307_s2 + $0x1b0] sm:$0xff] }
 0x35d   : > { %v6116_v19 = vpop.eup %6115 }
 0x35e   : > { %v2771_v9 = vrot.slane %v6116_v19, 1  ;;  %v4802_v19 = vld [vmem:[%s8307_s2 + $0xe8] sm:$0xff] }
 0x360   : > { %v2773_v43 = vmul.f32 %v2771_v9, %v397_v38  ;;  %v5904_v9 = vpack.c.bf16 %v4802_v19, %v4801_v8  ;;  %v4853_v8 = vld [vmem:[%s8307_s2 + $0x1c0] sm:$0xff]  ;;  %v4854_v19 = vld [vmem:[%s8307_s2 + $0x1c8] sm:$0xff] }
 0x362   : > { %v2774_v25 = vmul.f32 %v2773_v43, %v2759_v40  ;;  %v2779_v17 = vrot.slane %v2773_v43, %v7783_v35  ;;  %v3107_v43 = vld [vmem:[#allocation3 + $0x2] sm:$0xff] }
 0x364   : > { %v2775_v46 = vsub.f32 %v398_v23, %v2774_v25  ;;  %v2780_v42 = vmul.f32 %v2779_v17, %v7647_v28  ;;  %v2781_v56 = vmul.f32 %v2779_v17, %v7645_v5  ;;  %v2782_v26 = vmul.f32 %v2779_v17, %v7649_v50  ;;  %v4811_v25 = vld [vmem:[%s8307_s2 + $0xf0] sm:$0xff] }
 0x365   : > { %v2783_v51 = vmul.f32 %v2779_v17, %v7653_v32  ;;  %v2784_v27 = vmul.f32 %v2779_v17, %v7661_v4  ;;  %v2785_v52 = vmul.f32 %v2779_v17, %v7676_v60  ;;  %v2786_v47 = vmul.f32 %v2779_v17, %v7686_v41  ;;  %v2822_v32 = vld [vmem:[%s8307_s2 + $0x10] sm:$0xff]  ;;  %v2823_v4 = vld [vmem:[%s8307_s2 + $0x18] sm:$0xff]  ;;  %v2824_v41 = vld [vmem:[%s8307_s2 + $0x20] sm:$0xff] }
 0x366   : > { %v2791_v6 = vrot.slane %v2775_v46, %v7783_v35  ;;  %v2787_v29 = vmul.f32 %v2779_v17, %v7694_v61  ;;  %v5872_v60 = vpack.c.bf16 %v2823_v4, %v2822_v32  ;;  %v5876_v34 = vpack.c.bf16 %v2825_v55, %v2824_v41  ;;  %v4812_v17 = vld [vmem:[%s8307_s2 + $0xf8] sm:$0xff]  ;;  %v4830_v41 = vld [vmem:[%s8307_s2 + $0x148] sm:$0xff] }
 0x367   : > { %v5908_v46 = vpack.c.bf16 %v4812_v17, %v4811_v25  ;;  %v4856_v25 = vld [vmem:[%s8307_s2 + $0x1d8] sm:$0xff] }
 0x368   : > { %v2792_v30 = vadd.f32 %v2791_v6, %v2780_v42  ;;  %v2793_v59 = vadd.f32 %v2791_v6, %v2781_v56  ;;  %v2794_v54 = vadd.f32 %v2791_v6, %v2782_v26  ;;  %v2795_v28 = vadd.f32 %v2791_v6, %v2783_v51  ;;  %v4813_v42 = vld [vmem:[%s8307_s2 + $0x100] sm:$0xff]  ;;  %v4814_v56 = vld [vmem:[%s8307_s2 + $0x108] sm:$0xff] }
 0x369   : > { %v2796_v7 = vadd.f32 %v2791_v6, %v2784_v27  ;;  %v2797_v5 = vadd.f32 %v2791_v6, %v2785_v52  ;;  %v2798_v20 = vadd.f32 %v2791_v6, %v2786_v47  ;;  %v2799_v50 = vadd.f32 %v2791_v6, %v2787_v29  ;;  %v4815_v6 = vld [vmem:[%s8307_s2 + $0x110] sm:$0xff]  ;;  %v4816_v27 = vld [vmem:[%s8307_s2 + $0x118] sm:$0xff] }
 0x36a   : > { %2801 = vst.msk [vmem:[#allocation3 + $0x11] sm:$0xff] %vm2637_vm7, %v2792_v30  ;;  %2802 = vst.msk [vmem:[#allocation3 + $0x21] sm:$0xff] %vm2637_vm7, %v2793_v59  ;;  %v5912_v26 = vpack.c.bf16 %v4814_v56, %v4813_v42  ;;  %v5916_v47 = vpack.c.bf16 %v4816_v27, %v4815_v6  ;;  %v4817_v30 = vld [vmem:[%s8307_s2 + $0x120] sm:$0xff]  ;;  %v4818_v59 = vld [vmem:[%s8307_s2 + $0x128] sm:$0xff] }
 0x36b   : > { %2803 = vst.msk [vmem:[#allocation3 + $0x31] sm:$0xff] %vm2637_vm7, %v2794_v54  ;;  %2804 = vst.msk [vmem:[#allocation3 + $0x41] sm:$0xff] %vm2637_vm7, %v2795_v28  ;;  %v5920_v28 = vpack.c.bf16 %v4818_v59, %v4817_v30  ;;  %v4865_v42 = vld [vmem:[%s8307_s2 + $0x1e0] sm:$0xff]  ;;  %v4866_v56 = vld [vmem:[%s8307_s2 + $0x1e8] sm:$0xff] }
 0x36c   : > { %2805 = vst.msk [vmem:[#allocation3 + $0x51] sm:$0xff] %vm2637_vm7, %v2796_v7  ;;  %2806 = vst.msk [vmem:[#allocation3 + $0x61] sm:$0xff] %vm2637_vm7, %v2797_v5  ;;  %v4819_v5 = vld [vmem:[%s8307_s2 + $0x130] sm:$0xff]  ;;  %v4868_v27 = vld [vmem:[%s8307_s2 + $0x1f8] sm:$0xff] }
 0x36d   : > { %2807 = vst.msk [vmem:[#allocation3 + $0x71] sm:$0xff] %vm2637_vm7, %v2798_v20  ;;  %2808 = vst.msk [vmem:[#allocation3 + $0x81] sm:$0xff] %vm2637_vm7, %v2799_v50  ;;  %v4820_v20 = vld [vmem:[%s8307_s2 + $0x138] sm:$0xff]  ;;  %v4867_v6 = vld [vmem:[%s8307_s2 + $0x1f0] sm:$0xff] }
 0x36e   : > { %v5924_v32 = vpack.c.bf16 %v4820_v20, %v4819_v5  ;;  %v4869_v30 = vld [vmem:[%s8307_s2 + $0x200] sm:$0xff]  ;;  %v4872_v5 = vld [vmem:[%s8307_s2 + $0x218] sm:$0xff] }
 0x371   : > { %v7815_v61 = vld [vmem:[#allocation3 + $0x11] sm:$0xff]  ;;  %v7817_v33 = vld [vmem:[#allocation3 + $0x21] sm:$0xff] }
 0x372   : > { %5145 = vmatmul.mubr.msk.f32.vlgmr.msra.gmra.mrb[50].mxu1 %vm267_vm9, %v7815_v61  ;;  %v7826_v36 = vld [vmem:[#allocation3 + $0x31] sm:$0xff]  ;;  %v7836_v2 = vld [vmem:[#allocation3 + $0x41] sm:$0xff] }
 0x373   : > { %5871 = vmatpush3.bf16.msra.mxu1 %v5868_v57  ;;  %5147 = vmatprep.mubr.msk.f32.mxu1 %vm267_vm9, %v7817_v33  ;;  %v7840_v18 = vld [vmem:[#allocation3 + $0x51] sm:$0xff]  ;;  %v7850_v14 = vld [vmem:[#allocation3 + $0x61] sm:$0xff] }
 0x374   : > { %5873 = vmatprep.subr.bf16.mxu1 %v5872_v60  ;;  %v7854_v3 = vld [vmem:[#allocation3 + $0x71] sm:$0xff]  ;;  %v4798_v57 = vld [vmem:[%s8307_s2 + $0xc8] sm:$0xff]  ;;  %v7881_v10 = vld [vmem:[#allocation3 + $0x20] sm:$0xff] }
 0x375   : > { %v7871_v37 = vld [vmem:[#allocation3 + $0x10] sm:$0xff]  ;;  %v5896_v40 = vpack.c.bf16 %v4798_v57, %v4797_v1  ;;  %v7895_v22 = vld [vmem:[#allocation3 + $0x40] sm:$0xff] }
 0x376   : > { %5148 = vmatmul.mubr.msk.f32.gmra.mrb[52].mxu1 %vm267_vm9, %v7826_v36  ;;  %v7885_v11 = vld [vmem:[#allocation3 + $0x30] sm:$0xff]  ;;  %v7909_v38 = vld [vmem:[#allocation3 + $0x60] sm:$0xff] }
 0x377   : > { %5875 = vmatpush3.bf16.msra.mxu1 %v5872_v60  ;;  %5150 = vmatprep.mubr.msk.f32.mxu1 %vm267_vm9, %v7836_v2  ;;  %v7899_v16 = vld [vmem:[#allocation3 + $0x50] sm:$0xff]  ;;  %v7940_v52 = vld [vmem:[#allocation3 + $0x22] sm:$0xff] }
 0x378   : > { %5877 = vmatprep.subr.bf16.mxu1 %v5876_v34  ;;  %v7913_v23 = vld [vmem:[#allocation3 + $0x70] sm:$0xff]  ;;  %v7954_v54 = vld [vmem:[#allocation3 + $0x42] sm:$0xff] }
 0x379   : > { %v7930_v51 = vld [vmem:[#allocation3 + $0x12] sm:$0xff]  ;;  %v7968_v50 = vld [vmem:[#allocation3 + $0x62] sm:$0xff] }
 0x37a   : > { %5151 = vmatmul.mubr.msk.f32.gmra.mrb[54].mxu1 %vm267_vm9, %v7840_v18  ;;  %v7944_v29 = vld [vmem:[#allocation3 + $0x32] sm:$0xff]  ;;  %v4829_v60 = vld [vmem:[%s8307_s2 + $0x140] sm:$0xff] }
 0x37b   : > { %5879 = vmatpush3.bf16.msra.mxu1 %v5876_v34  ;;  %5153 = vmatprep.mubr.msk.f32.mxu1 %vm267_vm9, %v7850_v14  ;;  %v7958_v7 = vld [vmem:[#allocation3 + $0x52] sm:$0xff]  ;;  %v5928_v55 = vpack.c.bf16 %v4830_v41, %v4829_v60  ;;  %v8020_v39 = vld [vmem:[#allocation3 + $0x80] sm:$0xff]  ;;  %v4874_v60 = vld [vmem:[%s8307_s2 + $0x228] sm:$0xff] }
 0x37c   : > { %5881 = vmatprep.subr.bf16.mxu1 %v5880_v24  ;;  %v7972_v4 = vld [vmem:[#allocation3 + $0x72] sm:$0xff]  ;;  %v4849_v57 = vld [vmem:[%s8307_s2 + $0x1a0] sm:$0xff] }
 0x37d   : > { %v4831_v34 = vld [vmem:[%s8307_s2 + $0x150] sm:$0xff] }
 0x37e   : > { %5154 = vmatmul.mubr.msk.f32.gmra.mrb[56].mxu1 %vm267_vm9, %v7854_v3  ;;  %v5932_v13 = vpack.c.bf16 %v4832_v49, %v4831_v34  ;;  %v4883_v34 = vld [vmem:[%s8307_s2 + $0x230] sm:$0xff]  ;;  %v4884_v49 = vld [vmem:[%s8307_s2 + $0x238] sm:$0xff] }
 0x37f   : > { %5883 = vmatpush3.bf16.msra.mxu1 %v5880_v24  ;;  %5176 = vmatprep.mubr.msk.f32.mxu1 %vm267_vm9, %v2812_v21  ;;  %v4833_v24 = vld [vmem:[%s8307_s2 + $0x160] sm:$0xff]  ;;  %v4836_v21 = vld [vmem:[%s8307_s2 + $0x178] sm:$0xff] }
 0x380   : > { %5885 = vmatprep.subr.bf16.mxu1 %v5884_v45  ;;  %v5936_v44 = vpack.c.bf16 %v4834_v31, %v4833_v24  ;;  %v4885_v24 = vld [vmem:[%s8307_s2 + $0x240] sm:$0xff]  ;;  %v4886_v31 = vld [vmem:[%s8307_s2 + $0x248] sm:$0xff] }
 0x383   : > { %5887 = vmatpush3.bf16.msra.mxu1 %v5884_v45  ;;  %v4835_v45 = vld [vmem:[%s8307_s2 + $0x170] sm:$0xff] }
 0x384   : > { %5889 = vmatprep.subr.bf16.mxu1 %v5888_v58  ;;  %v5940_v48 = vpack.c.bf16 %v4836_v21, %v4835_v45  ;;  %v4887_v45 = vld [vmem:[%s8307_s2 + $0x250] sm:$0xff] }
 0x386   : > { %5177 = vmatmul.mubr.msk.f32.vlgmr.msra.gmra.mrb[50].mxu1 %vm267_vm9, %v7871_v37 }
 0x387   : > { %5179 = vmatprep.mubr.msk.f32.mxu1 %vm267_vm9, %v7881_v10  ;;  %5891 = vmatpush3.bf16.msra.mxu1 %v5888_v58  ;;  %v4838_v58 = vld [vmem:[%s8307_s2 + $0x188] sm:$0xff] }
 0x388   : > { %5893 = vmatprep.subr.bf16.mxu1 %v5892_v0  ;;  %v5944_v63 = vpack.c.bf16 %v4838_v58, %v4837_v53  ;;  %v4890_v53 = vld [vmem:[%s8307_s2 + $0x268] sm:$0xff]  ;;  %v4892_v58 = vld [vmem:[%s8307_s2 + $0x278] sm:$0xff] }
 0x38a   : > { %5180 = vmatmul.mubr.msk.f32.gmra.mrb[52].mxu1 %vm267_vm9, %v7885_v11 }
 0x38b   : > { %5182 = vmatprep.mubr.msk.f32.mxu1 %vm267_vm9, %v7895_v22  ;;  %5895 = vmatpush3.bf16.msra.mxu1 %v5892_v0  ;;  %v4847_v0 = vld [vmem:[%s8307_s2 + $0x190] sm:$0xff] }
 0x38c   : > { %5897 = vmatprep.subr.bf16.mxu1 %v5896_v40 }
 0x38e   : > { %5183 = vmatmul.mubr.msk.f32.gmra.mrb[54].mxu1 %vm267_vm9, %v7899_v16 }
 0x38f   : > { %5185 = vmatprep.mubr.msk.f32.mxu1 %vm267_vm9, %v7909_v38  ;;  %5899 = vmatpush3.bf16.msra.mxu1 %v5896_v40  ;;  %v4850_v40 = vld [vmem:[%s8307_s2 + $0x1a8] sm:$0xff] }
 0x390   : > { %5901 = vmatprep.subr.bf16.mxu1 %v5900_v15  ;;  %v5952_v12 = vpack.c.bf16 %v4850_v40, %v4849_v57  ;;  %v4905_v57 = vld [vmem:[%s8307_s2 + $0x2a0] sm:$0xff] }
 0x392   : > { %5186 = vmatmul.mubr.msk.f32.gmra.mrb[56].mxu1 %vm267_vm9, %v7913_v23 }
 0x393   : > { %5903 = vmatpush3.bf16.msra.mxu1 %v5900_v15  ;;  %5208 = vmatprep.mubr.msk.f32.mxu1 %vm267_vm9, %v3107_v43  ;;  %v4855_v43 = vld [vmem:[%s8307_s2 + $0x1d0] sm:$0xff] }
 0x394   : > { %5905 = vmatprep.subr.bf16.mxu1 %v5904_v9  ;;  %v5964_v17 = vpack.c.bf16 %v4856_v25, %v4855_v43 }
 0x397   : > { %5907 = vmatpush3.bf16.msra.mxu1 %v5904_v9  ;;  %v5960_v9 = vpack.c.bf16 %v4854_v19, %v4853_v8 }
 0x398   : > { %5909 = vmatprep.subr.bf16.mxu1 %v5908_v46 }
 0x39a   : > { %5209 = vmatmul.mubr.msk.f32.vlgmr.msra.gmra.mrb[50].mxu1 %vm267_vm9, %v7930_v51 }
 0x39b   : > { %5211 = vmatprep.mubr.msk.f32.mxu1 %vm267_vm9, %v7940_v52  ;;  %5911 = vmatpush3.bf16.msra.mxu1 %v5908_v46  ;;  %v8068_v46 = vld [vmem:[#allocation3 + $0x81] sm:$0xff] }
 0x39c   : > { %5913 = vmatprep.subr.bf16.mxu1 %v5912_v26 }
 0x39e   : > { %5212 = vmatmul.mubr.msk.f32.gmra.mrb[52].mxu1 %vm267_vm9, %v7944_v29 }
 0x39f   : > { %5214 = vmatprep.mubr.msk.f32.mxu1 %vm267_vm9, %v7954_v54  ;;  %5915 = vmatpush3.bf16.msra.mxu1 %v5912_v26  ;;  %v5968_v26 = vpack.c.bf16 %v4866_v56, %v4865_v42 }
 0x3a0   : > { %5917 = vmatprep.subr.bf16.mxu1 %v5916_v47 }
 0x3a2   : > { %5215 = vmatmul.mubr.msk.f32.gmra.mrb[54].mxu1 %vm267_vm9, %v7958_v7 }
 0x3a3   : > { %5217 = vmatprep.mubr.msk.f32.mxu1 %vm267_vm9, %v7968_v50  ;;  %5919 = vmatpush3.bf16.msra.mxu1 %v5916_v47  ;;  %v5972_v47 = vpack.c.bf16 %v4868_v27, %v4867_v6 }
 0x3a4   : > { %5921 = vmatprep.subr.bf16.mxu1 %v5920_v28 }
 0x3a6   : > { %5218 = vmatmul.mubr.msk.f32.gmra.mrb[56].mxu1 %vm267_vm9, %v7972_v4 }
 0x3a7   : > { %5923 = vmatpush3.bf16.msra.mxu1 %v5920_v28  ;;  %5240 = vmatprep.mubr.msk.f32.mxu1 %vm267_vm9, %v7871_v37  ;;  %v4848_v37 = vld [vmem:[%s8307_s2 + $0x198] sm:$0xff]  ;;  %v4871_v28 = vld [vmem:[%s8307_s2 + $0x210] sm:$0xff] }
 0x3a8   : > { %5925 = vmatprep.subr.bf16.mxu1 %v5924_v32  ;;  %v5948_v1 = vpack.c.bf16 %v4848_v37, %v4847_v0  ;;  %v5980_v20 = vpack.c.bf16 %v4872_v5, %v4871_v28  ;;  %v4902_v0 = vld [vmem:[%s8307_s2 + $0x288] sm:$0xff]  ;;  %v4904_v37 = vld [vmem:[%s8307_s2 + $0x298] sm:$0xff] }
 0x3ab   : > { %5927 = vmatpush3.bf16.msra.mxu1 %v5924_v32  ;;  %v4873_v32 = vld [vmem:[%s8307_s2 + $0x220] sm:$0xff] }
 0x3ac   : > { %5929 = vmatprep.subr.bf16.mxu1 %v5928_v55  ;;  %v5984_v41 = vpack.c.bf16 %v4874_v60, %v4873_v32 }
 0x3ae   : > { %5241 = vmatmul.mubr.msk.f32.vlgmr.msra.gmra.mrb[50].mxu1 %vm267_vm9, %v7881_v10 }
 0x3af   : > { %5243 = vmatprep.mubr.msk.f32.mxu1 %vm267_vm9, %v7885_v11  ;;  %5931 = vmatpush3.bf16.msra.mxu1 %v5928_v55  ;;  %v8116_v55 = vld [vmem:[#allocation3 + $0x82] sm:$0xff] }
 0x3b0   : > { %5933 = vmatprep.subr.bf16.mxu1 %v5932_v13 }
 0x3b2   : > { %5244 = vmatmul.mubr.msk.f32.gmra.mrb[52].mxu1 %vm267_vm9, %v7895_v22 }
 0x3b3   : > { %5246 = vmatprep.mubr.msk.f32.mxu1 %vm267_vm9, %v7899_v16  ;;  %5935 = vmatpush3.bf16.msra.mxu1 %v5932_v13  ;;  %v5988_v13 = vpack.c.bf16 %v4884_v49, %v4883_v34 }
 0x3b4   : > { %5937 = vmatprep.subr.bf16.mxu1 %v5936_v44 }
 0x3b6   : > { %5247 = vmatmul.mubr.msk.f32.gmra.mrb[54].mxu1 %vm267_vm9, %v7909_v38 }
 0x3b7   : > { %5249 = vmatprep.mubr.msk.f32.mxu1 %vm267_vm9, %v7913_v23  ;;  %5939 = vmatpush3.bf16.msra.mxu1 %v5936_v44  ;;  %v5992_v44 = vpack.c.bf16 %v4886_v31, %v4885_v24 }
 0x3b8   : > { %5941 = vmatprep.subr.bf16.mxu1 %v5940_v48 }
 0x3ba   : > { %5250 = vmatmul.mubr.msk.f32.gmra.mrb[56].mxu1 %vm267_vm9, %v8020_v39 }
 0x3bb   : > { %5943 = vmatpush3.bf16.msra.mxu1 %v5940_v48  ;;  %5272 = vmatprep.mubr.msk.f32.mxu1 %vm267_vm9, %v7815_v61  ;;  %v4852_v61 = vld [vmem:[%s8307_s2 + $0x1b8] sm:$0xff]  ;;  %v4889_v48 = vld [vmem:[%s8307_s2 + $0x260] sm:$0xff] }
 0x3bc   : > { %5945 = vmatprep.subr.bf16.mxu1 %v5944_v63  ;;  %v5956_v15 = vpack.c.bf16 %v4852_v61, %v4851_v62  ;;  %v4908_v62 = vld [vmem:[%s8307_s2 + $0x2b8] sm:$0xff]  ;;  %v4910_v61 = vld [vmem:[%s8307_s2 + $0x2c8] sm:$0xff] }
 0x3bf   : > { %5947 = vmatpush3.bf16.msra.mxu1 %v5944_v63  ;;  %v4901_v63 = vld [vmem:[%s8307_s2 + $0x280] sm:$0xff] }
 0x3c0   : > { %5949 = vmatprep.subr.bf16.mxu1 %v5948_v1 }
 0x3c2   : > { %5273 = vmatmul.mubr.msk.f32.vlgmr.msra.gmra.mrb[50].mxu1 %vm267_vm9, %v7817_v33 }
 0x3c3   : > { %5275 = vmatprep.mubr.msk.f32.mxu1 %vm267_vm9, %v7826_v36  ;;  %5951 = vmatpush3.bf16.msra.mxu1 %v5948_v1 }
 0x3c4   : > { %5953 = vmatprep.subr.bf16.mxu1 %v5952_v12 }
 0x3c6   : > { %5276 = vmatmul.mubr.msk.f32.gmra.mrb[52].mxu1 %vm267_vm9, %v7836_v2 }
 0x3c7   : > { %5278 = vmatprep.mubr.msk.f32.mxu1 %vm267_vm9, %v7840_v18  ;;  %5955 = vmatpush3.bf16.msra.mxu1 %v5952_v12  ;;  %v4907_v12 = vld [vmem:[%s8307_s2 + $0x2b0] sm:$0xff] }
 0x3c8   : > { %5957 = vmatprep.subr.bf16.mxu1 %v5956_v15 }
 0x3ca   : > { %5279 = vmatmul.mubr.msk.f32.gmra.mrb[54].mxu1 %vm267_vm9, %v7850_v14 }
 0x3cb   : > { %5281 = vmatprep.mubr.msk.f32.mxu1 %vm267_vm9, %v7854_v3  ;;  %5959 = vmatpush3.bf16.msra.mxu1 %v5956_v15 }
 0x3cc   : > { %5961 = vmatprep.subr.bf16.mxu1 %v5960_v9 }
 0x3ce   : > { %5282 = vmatmul.mubr.msk.f32.gmra.mrb[56].mxu1 %vm267_vm9, %v8068_v46 }
 0x3cf   : > { %5963 = vmatpush3.bf16.msra.mxu1 %v5960_v9  ;;  %5304 = vmatprep.mubr.msk.f32.mxu1 %vm267_vm9, %v7930_v51  ;;  %v4870_v51 = vld [vmem:[%s8307_s2 + $0x208] sm:$0xff] }
 0x3d0   : > { %5965 = vmatprep.subr.bf16.mxu1 %v5964_v17  ;;  %v5976_v59 = vpack.c.bf16 %v4870_v51, %v4869_v30 }
 0x3d3   : > { %5967 = vmatpush3.bf16.msra.mxu1 %v5964_v17 }
 0x3d4   : > { %5969 = vmatprep.subr.bf16.mxu1 %v5968_v26 }
 0x3d6   : > { %5305 = vmatmul.mubr.msk.f32.vlgmr.msra.gmra.mrb[50].mxu1 %vm267_vm9, %v7940_v52 }
 0x3d7   : > { %5307 = vmatprep.mubr.msk.f32.mxu1 %vm267_vm9, %v7944_v29  ;;  %5971 = vmatpush3.bf16.msra.mxu1 %v5968_v26 }
 0x3d8   : > { %5973 = vmatprep.subr.bf16.mxu1 %v5972_v47 }
 0x3da   : > { %5308 = vmatmul.mubr.msk.f32.gmra.mrb[52].mxu1 %vm267_vm9, %v7954_v54 }
 0x3db   : > { %5310 = vmatprep.mubr.msk.f32.mxu1 %vm267_vm9, %v7958_v7  ;;  %5975 = vmatpush3.bf16.msra.mxu1 %v5972_v47 }
 0x3dc   : > { %5977 = vmatprep.subr.bf16.mxu1 %v5976_v59 }
 0x3de   : > { %5311 = vmatmul.mubr.msk.f32.gmra.mrb[54].mxu1 %vm267_vm9, %v7968_v50 }
 0x3df   : > { %5313 = vmatprep.mubr.msk.f32.mxu1 %vm267_vm9, %v7972_v4  ;;  %5979 = vmatpush3.bf16.msra.mxu1 %v5976_v59 }
 0x3e0   : > { %5981 = vmatprep.subr.bf16.mxu1 %v5980_v20 }
 0x3e2   : > { %5314 = vmatmul.mubr.msk.f32.gmra.mrb[56].mxu1 %vm267_vm9, %v8116_v55 }
 0x3e3   : > { %5983 = vmatpush3.bf16.msra.mxu1 %v5980_v20  ;;  %5336 = vmatprep.mubr.msk.f32.mxu1 %vm267_vm9, %v7881_v10  ;;  %v4888_v10 = vld [vmem:[%s8307_s2 + $0x258] sm:$0xff] }
 0x3e4   : > { %5985 = vmatprep.subr.bf16.mxu1 %v5984_v41  ;;  %v5996_v21 = vpack.c.bf16 %v4888_v10, %v4887_v45 }
 0x3e7   : > { %5987 = vmatpush3.bf16.msra.mxu1 %v5984_v41 }
 0x3e8   : > { %5989 = vmatprep.subr.bf16.mxu1 %v5988_v13 }
 0x3ea   : > { %5337 = vmatmul.mubr.msk.f32.vlgmr.msra.gmra.mrb[50].mxu1 %vm267_vm9, %v7885_v11  ;;  %v6000_v11 = vpack.c.bf16 %v4890_v53, %v4889_v48 }
 0x3eb   : > { %5339 = vmatprep.mubr.msk.f32.mxu1 %vm267_vm9, %v7895_v22  ;;  %5991 = vmatpush3.bf16.msra.mxu1 %v5988_v13  ;;  %v4891_v22 = vld [vmem:[%s8307_s2 + $0x270] sm:$0xff] }
 0x3ec   : > { %5993 = vmatprep.subr.bf16.mxu1 %v5992_v44 }
 0x3ee   : > { %5340 = vmatmul.mubr.msk.f32.gmra.mrb[52].mxu1 %vm267_vm9, %v7899_v16  ;;  %v3739_v16 = vld [vmem:[#allocation3 + $0x90] sm:$0xff] }
 0x3ef   : > { %5342 = vmatprep.mubr.msk.f32.mxu1 %vm267_vm9, %v7909_v38  ;;  %5995 = vmatpush3.bf16.msra.mxu1 %v5992_v44  ;;  %v6004_v38 = vpack.c.bf16 %v4892_v58, %v4891_v22 }
 0x3f0   : > { %5997 = vmatprep.subr.bf16.mxu1 %v5996_v21 }
 0x3f2   : > { %5343 = vmatmul.mubr.msk.f32.gmra.mrb[54].mxu1 %vm267_vm9, %v7913_v23  ;;  %v6008_v23 = vpack.c.bf16 %v4902_v0, %v4901_v63 }
 0x3f3   : > { %5345 = vmatprep.mubr.msk.f32.mxu1 %vm267_vm9, %v8020_v39  ;;  %5999 = vmatpush3.bf16.msra.mxu1 %v5996_v21  ;;  %v4903_v39 = vld [vmem:[%s8307_s2 + $0x290] sm:$0xff] }
 0x3f4   : > { %6001 = vmatprep.subr.bf16.mxu1 %v6000_v11  ;;  %v6012_v1 = vpack.c.bf16 %v4904_v37, %v4903_v39 }
 0x3f6   : > { %5346 = vmatmul.mubr.msk.f32.gmra.mrb[56].mxu1 %vm267_vm9, %v3739_v16 }
 0x3f7   : > { %6003 = vmatpush3.bf16.msra.mxu1 %v6000_v11  ;;  %5368 = vmatprep.mubr.msk.f32.mxu1 %vm267_vm9, %v7817_v33  ;;  %v4906_v33 = vld [vmem:[%s8307_s2 + $0x2a8] sm:$0xff] }
 0x3f8   : > { %6005 = vmatprep.subr.bf16.mxu1 %v6004_v38  ;;  %v6016_v40 = vpack.c.bf16 %v4906_v33, %v4905_v57 }
 0x3fb   : > { %6007 = vmatpush3.bf16.msra.mxu1 %v6004_v38 }
 0x3fc   : > { %6009 = vmatprep.subr.bf16.mxu1 %v6008_v23 }
 0x3fe   : > { %5369 = vmatmul.mubr.msk.f32.vlgmr.msra.gmra.mrb[50].mxu1 %vm267_vm9, %v7826_v36  ;;  %v6020_v36 = vpack.c.bf16 %v4908_v62, %v4907_v12 }
 0x3ff   : > { %5371 = vmatprep.mubr.msk.f32.mxu1 %vm267_vm9, %v7836_v2  ;;  %6011 = vmatpush3.bf16.msra.mxu1 %v6008_v23  ;;  %v4909_v2 = vld [vmem:[%s8307_s2 + $0x2c0] sm:$0xff] }
 0x400   : > { %6013 = vmatprep.subr.bf16.mxu1 %v6012_v1 }
 0x402   : > { %5372 = vmatmul.mubr.msk.f32.gmra.mrb[52].mxu1 %vm267_vm9, %v7840_v18  ;;  %v3895_v18 = vld [vmem:[#allocation3 + $0x91] sm:$0xff] }
 0x403   : > { %5374 = vmatprep.mubr.msk.f32.mxu1 %vm267_vm9, %v7850_v14  ;;  %6015 = vmatpush3.bf16.msra.mxu1 %v6012_v1  ;;  %v6024_v14 = vpack.c.bf16 %v4910_v61, %v4909_v2 }
 0x404   : > { %6017 = vmatprep.subr.bf16.mxu1 %v6016_v40 }
 0x406   : > { %5375 = vmatmul.mubr.msk.f32.gmra.mrb[54].mxu1 %vm267_vm9, %v7854_v3  ;;  %v4051_v3 = vld [vmem:[#allocation3 + $0x92] sm:$0xff] }
 0x407   : > { %5377 = vmatprep.mubr.msk.f32.mxu1 %vm267_vm9, %v8068_v46  ;;  %6019 = vmatpush3.bf16.msra.mxu1 %v6016_v40 }
 0x408   : > { %6021 = vmatprep.subr.bf16.mxu1 %v6020_v36 }
 0x40a   : > { %5378 = vmatmul.mubr.msk.f32.gmra.mrb[56].mxu1 %vm267_vm9, %v3895_v18 }
 0x40b   : > { %6023 = vmatpush3.bf16.msra.mxu1 %v6020_v36  ;;  %5400 = vmatprep.mubr.msk.f32.mxu1 %vm267_vm9, %v7940_v52  ;;  %v4919_v52 = vld [vmem:[%s8308_s3 + $0x3] ss:$0 sm:$0xff] }
 0x40c   : > { %6025 = vmatprep.subr.bf16.mxu1 %v6024_v14 }
 0x40f   : > { %6027 = vmatpush3.bf16.msra.mxu1 %v6024_v14 }
 0x412   : > { %5401 = vmatmul.mubr.msk.f32.vlgmr.msra.gmra.mrb[50].mxu1 %vm267_vm9, %v7944_v29 }
 0x413   : > { %5403 = vmatprep.mubr.msk.f32.mxu1 %vm267_vm9, %v7954_v54 }
 0x416   : > { %5404 = vmatmul.mubr.msk.f32.gmra.mrb[52].mxu1 %vm267_vm9, %v7958_v7 }
 0x417   : > { %5406 = vmatprep.mubr.msk.f32.mxu1 %vm267_vm9, %v7968_v50 }
 0x41a   : > { %5407 = vmatmul.mubr.msk.f32.gmra.mrb[54].mxu1 %vm267_vm9, %v7972_v4 }
 0x41b   : > { %5409 = vmatprep.mubr.msk.f32.mxu1 %vm267_vm9, %v8116_v55 }
 0x41e   : > { %5410 = vmatmul.mubr.msk.f32.gmra.mrb[56].mxu1 %vm267_vm9, %v4051_v3 }
 0x4e5   : > { %v5402_v29 = vpop.f32.mrb[50].mxu1 }
 0x4e6   : > { %v4205_v54 = vadd.f32 %v5402_v29, %v4919_v52  ;;  %v4153_v15 = vpop.f32.mrb[51].mxu1 }
 0x4e7   : > { %v4204_v7 = vadd.f32 %v4919_v52, %v4153_v15 }
 0x4e8   : > { %v8228_v8 = vmax.f32 %v4205_v54, 0.0 }
 0x4e9   : > { %v8230_v50 = vmax.f32 %v4204_v7, 0.0  ;;  %v5405_v19 = vpop.f32.mrb[52].mxu1 }
 0x4ea   : > { %v4242_v4 = vmul.f32 %v8228_v8, %v8228_v8  ;;  %v4207_v9 = vadd.f32 %v5405_v19, %v4919_v52  ;;  %v4163_v43 = vpop.f32.mrb[53].mxu1  ;;  %v4221_v25 = vsel %vm2637_vm7, %v8228_v8, 0.0 }
 0x4eb   : > { %v4220_v17 = vsel %vm2637_vm7, %v8230_v50, 0.0  ;;  %v4241_v46 = vmul.f32 %v8230_v50, %v8230_v50  ;;  %v4206_v42 = vadd.f32 %v4919_v52, %v4163_v43 }
 0x4ec   : > { %v8240_v56 = vmax.f32 %v4207_v9, 0.0  ;;  %v4250_v26 = vsel %vm2637_vm7, %v4242_v4, 0.0  ;;  %v4222_v30 = vadd.f32 %v4221_v25, %v4220_v17 }
 0x4ed   : > { %v4249_v6 = vsel %vm2637_vm7, %v4241_v46, 0.0  ;;  %v8244_v27 = vmax.f32 %v4206_v42, 0.0  ;;  %v5408_v47 = vpop.f32.mrb[54].mxu1 }
 0x4ee   : > { %v4244_v51 = vmul.f32 %v8240_v56, %v8240_v56  ;;  %v4209_v59 = vadd.f32 %v5408_v47, %v4919_v52  ;;  %v4173_v28 = vpop.f32.mrb[55].mxu1  ;;  %v4251_v60 = vadd.f32 %v4250_v26, %v4249_v6  ;;  %v4225_v34 = vsel %vm2637_vm7, %v8240_v56, 0.0 }
 0x4ef   : > { %v4223_v5 = vsel %vm2637_vm7, %v8244_v27, 0.0  ;;  %v4243_v20 = vmul.f32 %v8244_v27, %v8244_v27  ;;  %v4208_v32 = vadd.f32 %v4919_v52, %v4173_v28 }
 0x4f0   : > { %v4224_v41 = vadd.f32 %v4223_v5, %v4222_v30  ;;  %v8252_v55 = vmax.f32 %v4209_v59, 0.0  ;;  %v4254_v31 = vsel %vm2637_vm7, %v4244_v51, 0.0  ;;  %v2810_v5 = vld [vmem:[%s8308_s3 + $0x4] sm:$0x1] }
 0x4f1   : > { %v4252_v49 = vsel %vm2637_vm7, %v4243_v20, 0.0  ;;  %v8257_v13 = vmax.f32 %v4208_v32, 0.0  ;;  %v5411_v24 = vpop.f32.mrb[56].mxu1 }
 0x4f2   : > { %v4253_v44 = vadd.f32 %v4252_v49, %v4251_v60  ;;  %v4246_v45 = vmul.f32 %v8252_v55, %v8252_v55  ;;  %v4226_v10 = vadd.f32 %v4225_v34, %v4224_v41  ;;  %v4183_v21 = vpop.f32.mrb[57].mxu1  ;;  %v4211_v11 = vadd.f32 %v5411_v24, %v4919_v52  ;;  %v2811_v60 = vld [vmem:[%s8308_s3 + $0x5] sm:$0x1] }
 0x4f3   : > { %v4227_v48 = vsel %vm2637_vm7, %v8257_v13, 0.0  ;;  %v4245_v53 = vmul.f32 %v8257_v13, %v8257_v13  ;;  %v4210_v22 = vadd.f32 %v4919_v52, %v4183_v21  ;;  %v4229_v38 = vsel %vm2637_vm7, %v8252_v55, 0.0 }
 0x4f4   : > { %v4228_v58 = vadd.f32 %v4227_v48, %v4226_v10  ;;  %v4255_v16 = vadd.f32 %v4254_v31, %v4253_v44  ;;  %v4219_v0 = vmax.f32 %v4211_v11, 0.0  ;;  %v4258_v1 = vsel %vm2637_vm7, %v4246_v45, 0.0 }
 0x4f5   : > { %v4256_v63 = vsel %vm2637_vm7, %v4245_v53, 0.0  ;;  %v4218_v23 = vmax.f32 %v4210_v22, 0.0 }
 0x4f6   : > { %v4257_v39 = vadd.f32 %v4256_v63, %v4255_v16  ;;  %v4230_v37 = vadd.f32 %v4229_v38, %v4228_v58  ;;  %v4248_v57 = vmul.f32 %v4219_v0, %v4219_v0  ;;  %v4233_v36 = vsel %vm2637_vm7, %v4219_v0, 0.0 }
 0x4f7   : > { %v4231_v33 = vsel %vm2637_vm7, %v4218_v23, 0.0  ;;  %v4247_v40 = vmul.f32 %v4218_v23, %v4218_v23 }
 0x4f8   : > { %v4232_v12 = vadd.f32 %v4231_v33, %v4230_v37  ;;  %v4259_v62 = vadd.f32 %v4258_v1, %v4257_v39  ;;  %v4262_v14 = vsel %vm2637_vm7, %v4248_v57, 0.0 }
 0x4f9   : > { %v4260_v2 = vsel %vm2637_vm7, %v4247_v40, 0.0 }
 0x4fa   : > { %v4234_v61 = vadd.f32 %v4233_v36, %v4232_v12  ;;  %v4261_v18 = vadd.f32 %v4260_v2, %v4259_v62 }
 0x4fc   : > { %v4235_v3 = vrot.slane %v4234_v61, 4  ;;  %v4263_v52 = vadd.f32 %v4262_v14, %v4261_v18 }
 0x4fe   : > { %v4236_v29 = vadd.f32 %v4235_v3, %v4234_v61  ;;  %v4264_v54 = vrot.slane %v4263_v52, 4 }
 0x500   : > { %v4237_v15 = vrot.slane %v4236_v29, 2  ;;  %v4265_v7 = vadd.f32 %v4264_v54, %v4263_v52 }
 0x502   : > { %v4238_v19 = vadd.f32 %v4237_v15, %v4236_v29  ;;  %v4266_v4 = vrot.slane %v4265_v7, 2 }
 0x504   : > { %v4239_v9 = vrot.slane %v4238_v19, 1  ;;  %v4267_v43 = vadd.f32 %v4266_v4, %v4265_v7 }
 0x506   : > { %v4268_v25 = vrot.slane %v4267_v43, 1  ;;  %v4240_v17 = vadd.f32 %v4239_v9, %v4238_v19 }
 0x508   : > { %v4269_v46 = vadd.f32 %v4268_v25, %v4267_v43 }
 0x50a   : > { %v4270_v42 = vsel %vm2688_vm8, %v4240_v17, %v4269_v46 }
 0x50b   : > { %5429 = vmatmul.mubr.msk.f32.vlgmr.msra.gmra.mrb[96].mxu0 %vm2637_vm7, %v4270_v42 }
 0x5de   : > { %v4340_v26 = vpop.f32.mrb[96].mxu0 }
 0x5df   : > { %v4344_v6 = vmul.f32 %v4340_v26, %v4340_v26  ;;  %v5430_v47 = vpop.f32.mrb[97].mxu0 }
 0x5e1   : > { %v4346_v30 = vrot.slane %v4344_v6, 7 }
 0x5e3   : > { %v4348_v51 = vsub.f32 %v4340_v26, %v4346_v30 }
 0x5e5   : > { %v4349_v59 = vadd.f32 1e-05, %v4348_v51 }
 0x5e7   : > { %6117 = vrsqrt.f32 %v4349_v59 }
 0x5f1   : > { %v6118_v28 = vpop.eup %6117 }
 0x5f2   : > { %v4352_v20 = vrot.slane %v6118_v28, 1 }
 0x5f4   : > { %v4354_v32 = vmul.f32 %v4352_v20, %v2810_v5 }
 0x5f6   : > { %v4355_v41 = vmul.f32 %v4354_v32, %v4340_v26  ;;  %v4360_v34 = vrot.slane %v4354_v32, %v7783_v35 }
 0x5f8   : > { %v4356_v49 = vsub.f32 %v2811_v60, %v4355_v41  ;;  %v4361_v24 = vmul.f32 %v4360_v34, %v8230_v50  ;;  %v4362_v31 = vmul.f32 %v4360_v34, %v8228_v8  ;;  %v4363_v44 = vmul.f32 %v4360_v34, %v8244_v27 }
 0x5f9   : > { %v4364_v45 = vmul.f32 %v4360_v34, %v8240_v56  ;;  %v4365_v21 = vmul.f32 %v4360_v34, %v8257_v13  ;;  %v4366_v48 = vmul.f32 %v4360_v34, %v8252_v55  ;;  %v4367_v53 = vmul.f32 %v4360_v34, %v4218_v23 }
 0x5fa   : > { %v4372_v10 = vrot.slane %v4356_v49, %v7783_v35  ;;  %v4368_v11 = vmul.f32 %v4360_v34, %v4219_v0 }
 0x5fc   : > { %v4373_v22 = vadd.f32 %v4372_v10, %v4361_v24  ;;  %v4374_v50 = vadd.f32 %v4372_v10, %v4362_v31  ;;  %v4375_v58 = vadd.f32 %v4372_v10, %v4363_v44  ;;  %v4376_v8 = vadd.f32 %v4372_v10, %v4364_v45 }
 0x5fd   : > { %v4377_v16 = vadd.f32 %v4372_v10, %v4365_v21  ;;  %v4378_v27 = vadd.f32 %v4372_v10, %v4366_v48  ;;  %v4379_v38 = vadd.f32 %v4372_v10, %v4367_v53  ;;  %v4380_v56 = vadd.f32 %v4372_v10, %v4368_v11 }
 0x5fe   : > { %4381 = vst.msk [vmem:[%s224_s21] sm:$0xff] %vm2637_vm7, %v4373_v22  ;;  %4382 = vst.msk [vmem:[%s224_s21 + $0x8] sm:$0xff] %vm2637_vm7, %v4374_v50 }
 0x5ff   : > { %4383 = vst.msk [vmem:[%s224_s21 + $0x10] sm:$0xff] %vm2637_vm7, %v4375_v58  ;;  %4384 = vst.msk [vmem:[%s224_s21 + $0x18] sm:$0xff] %vm2637_vm7, %v4376_v8 }
 0x600   : > { %4385 = vst.msk [vmem:[%s224_s21 + $0x20] sm:$0xff] %vm2637_vm7, %v4377_v16  ;;  %4386 = vst.msk [vmem:[%s224_s21 + $0x28] sm:$0xff] %vm2637_vm7, %v4378_v27 }
 0x601   : > { %4387 = vst.msk [vmem:[%s224_s21 + $0x30] sm:$0xff] %vm2637_vm7, %v4379_v38  ;;  %4388 = vst.msk [vmem:[%s224_s21 + $0x38] sm:$0xff] %vm2637_vm7, %v4380_v56 }
 0x602 PF: > { %s15_s18 = sadd.s32 1, %s6126_s18  }
 0x603   : > { %p12_p4 = scmp.ge.s32.totalorder %s15_s18, 4  }
 0x605   :  { %14 = sbr.rel (!%p12_p4) target bundleno = 1 (0x1), region = 90 }

</bundles_post_ra>
